<compile_context>
chip_gen: v5e
topology: v5e:2x2
jax: 0.10.0
libtpu: 0.0.40
codegen_flags: <defaults>
</compile_context>

<pallas_src>
import functools

import jax
import jax.numpy as jnp
from jax.experimental import pallas as pl
from jax.experimental.pallas import tpu as pltpu

_SMPL_VERTS = 6890


# ---------------------------------------------------------------------------
# In-kernel helpers (TCN recompute prologue)
# ---------------------------------------------------------------------------
def _shift_down(a, s):
    """Causal shift along time (sublanes): out[t] = a[t - s], zeros for t < s."""
    if s == 0:
        return a
    L = a.shape[0]
    if s >= L:
        return jnp.zeros_like(a)
    return jnp.concatenate(
        [jnp.zeros((s,) + a.shape[1:], a.dtype), a[:L - s]], axis=0)


def _causal_conv(a, w_ref, b, dilation, K):
    """Dilated causal conv in time-major layout.

    a: (L, Cin), w_ref: (K, Cin, Cout) with w_ref[k] = W[:, :, k].T, b: (1, Cout).
    out[t] = b + sum_k a[t - (K-1-k)*dilation] @ W[:, :, k].T
    """
    L = a.shape[0]
    cout = w_ref.shape[2]
    acc = jnp.zeros((L, cout), jnp.float32)
    for k in range(K):
        shifted = _shift_down(a, (K - 1 - k) * dilation)
        acc = acc + jnp.dot(shifted, w_ref[k], preferred_element_type=jnp.float32)
    return acc + b


def _make_fused_kernel(block_meta, K):
    """block_meta: tuple of (dilation, has_downsample) per TemporalBlock.

    Kernel refs: (x, conv-weights..., w_lin_tile, out_tile). Each grid step
    recomputes the (tiny) TCN locally, then does its slice of hidden2dbs.
    """
    def kernel(*refs):
        x_ref, o_ref = refs[0], refs[-1]
        wlin_ref = refs[-2]                                 # (H, TO) bf16
        wrefs = refs[1:-2]
        a = x_ref[...].astype(jnp.float32)                  # (L, C_in)
        i = 0
        for dilation, has_ds in block_meta:
            w1, b1, w2, b2 = wrefs[i], wrefs[i + 1], wrefs[i + 2], wrefs[i + 3]
            i += 4
            h1 = jnp.maximum(_causal_conv(a, w1, b1[...], dilation, K), 0.0)
            h2 = jnp.maximum(_causal_conv(h1, w2, b2[...], dilation, K), 0.0)
            if has_ds:                                      # 1x1 conv residual path
                wd, bd = wrefs[i], wrefs[i + 1]
                i += 2
                res = jnp.dot(a, wd[...],
                              preferred_element_type=jnp.float32) + bd[...]
            else:                                           # identity residual path
                res = a
            a = jnp.maximum(h2 + res, 0.0)                  # (L, H) f32, stays in VMEM
        # hidden2dbs (bias=False): f32 activations, bf16 weight stream, f32 acc.
        w_tile = wlin_ref[...].astype(jnp.float32)          # (H, TO)
        o_ref[...] = jnp.dot(a, w_tile, preferred_element_type=jnp.float32)
    return kernel


# ---------------------------------------------------------------------------
# Fused forward: one pallas_call, grid over the output-column tiles only
# ---------------------------------------------------------------------------
def dbs_tcn_forward(pose_beta_seq, packed, *, kernel_size):
    """pose_beta_seq: (num_frames, input_size) -> dbs: (num_frames, 6890, 3)."""
    L, cin = pose_beta_seq.shape
    x = pose_beta_seq.astype(jnp.float32)
    w_lin = packed["w_lin"]                                 # (T, H, TO) bf16, contiguous tiles
    num_tiles, H, TO = w_lin.shape
    out_cols = _SMPL_VERTS * 3

    block_meta = []
    args = [x]
    in_specs = [pl.BlockSpec((L, cin), lambda j: (0, 0))]   # resident activations
    for i, blk in enumerate(packed["blocks"]):
        block_meta.append((2 ** i, "wd" in blk))
        names = ("w1", "b1", "w2", "b2") + (("wd", "bd") if "wd" in blk else ())
        for name in names:                                  # resident conv weights
            arr = blk[name]
            args.append(arr)
            in_specs.append(
                pl.BlockSpec(arr.shape, lambda j, n=arr.ndim: (0,) * n))
    args.append(w_lin)
    # Streamed, contiguous bf16 weight tile per grid step (double-buffered).
    in_specs.append(pl.BlockSpec((None, H, TO), lambda j: (j, 0, 0)))

    kernel = _make_fused_kernel(tuple(block_meta), kernel_size)
    dbs_flat = pl.pallas_call(
        kernel,
        out_shape=jax.ShapeDtypeStruct((L, out_cols), jnp.float32),
        grid=(num_tiles,),
        in_specs=in_specs,
        out_specs=pl.BlockSpec((L, TO), lambda j: (0, j)),  # lane-dense, 128-aligned
        compiler_params=pltpu.CompilerParams(
            dimension_semantics=("parallel",)),             # 1 tile per TC on v7x/v4
    )(*args)
    return dbs_flat.reshape(L, _SMPL_VERTS, 3)              # free reshape


# ---------------------------------------------------------------------------
# Tile-count selection + one-time weight packing (outside the forward)
# ---------------------------------------------------------------------------
def _num_out_tiles():
    try:
        kind = jax.devices()[0].device_kind.lower()
    except Exception:
        kind = ""
    # v7x has 2 TensorCores / chip, v4 is megacore: give each core one tile.
    # v5e / v6e: a single grid step minimizes fixed per-step overhead.
    return 2 if ("v7" in kind or "v4" in kind) else 1


def pack_params(params, output_size, num_out_tiles):
    """One-time packing: conv weights to (K, Cin, Cout); w_lin transposed,
    128*tiles-padded, split into contiguous (T, H, TO) bf16 tiles."""
    packed = {"blocks": []}
    for blk in params["blocks"]:
        pb = {
            "w1": jnp.transpose(blk["w1"], (2, 1, 0)),      # (K, Cin, Cout)
            "b1": blk["b1"][None, :],                       # (1, Cout)
            "w2": jnp.transpose(blk["w2"], (2, 1, 0)),      # (K, Cout, Cout)
            "b2": blk["b2"][None, :],
        }
        if "wd" in blk:
            pb["wd"] = jnp.transpose(blk["wd"], (1, 0))     # (Cin, Cout)
            pb["bd"] = blk["bd"][None, :]
        packed["blocks"].append(pb)

    H = params["w_lin"].shape[1]
    align = 128 * num_out_tiles
    o_pad = ((output_size + align - 1) // align) * align
    to = o_pad // num_out_tiles
    w_t = jnp.transpose(params["w_lin"], (1, 0))            # (H, O)
    w_t = jnp.pad(w_t, ((0, 0), (0, o_pad - output_size)))  # (H, O_pad)
    packed["w_lin"] = (w_t.reshape(H, num_out_tiles, to)
                       .transpose(1, 0, 2)                  # (T, H, TO): tile j contiguous
                       .astype(jnp.bfloat16))
    return packed


# ---------------------------------------------------------------------------
# Parameters (PyTorch layout, weight_norm folded into effective weights)
# ---------------------------------------------------------------------------
def init_params(key, input_size, num_channels, output_size, kernel_size):
    params = {"blocks": []}
    cin = input_size
    for cout in num_channels:
        key, k1, k2, k3, k4, k5, k6 = jax.random.split(key, 7)
        blk = {
            "w1": 0.1 * jax.random.normal(k1, (cout, cin, kernel_size), jnp.float32),
            "b1": 0.1 * jax.random.normal(k2, (cout,), jnp.float32),
            "w2": 0.1 * jax.random.normal(k3, (cout, cout, kernel_size), jnp.float32),
            "b2": 0.1 * jax.random.normal(k4, (cout,), jnp.float32),
        }
        if cin != cout:   # downsample conv only exists when n_inputs != n_outputs
            blk["wd"] = 0.1 * jax.random.normal(k5, (cout, cin), jnp.float32)
            blk["bd"] = 0.1 * jax.random.normal(k6, (cout,), jnp.float32)
        params["blocks"].append(blk)
        cin = cout
    key, kl = jax.random.split(key)
    params["w_lin"] = 0.05 * jax.random.normal(kl, (output_size, cin), jnp.float32)
    return params


# ---------------------------------------------------------------------------
# Pure-JAX reference (sanity check of the Pallas path)
# ---------------------------------------------------------------------------
def _ref_causal_conv(x, w, b, d):
    Co, Ci, K = w.shape
    L = x.shape[1]
    p = (K - 1) * d
    xp = jnp.pad(x, ((0, 0), (p, 0)))
    out = jnp.zeros((Co, L), jnp.float32)
    for k in range(K):
        out = out + w[:, :, k] @ xp[:, k * d:k * d + L]
    return out + b[:, None]


def ref_forward(pose_beta_seq, params):
    x = jnp.transpose(pose_beta_seq).astype(jnp.float32)     # (C_in, L)
    for i, blk in enumerate(params["blocks"]):
        d = 2 ** i
        h1 = jnp.maximum(_ref_causal_conv(x, blk["w1"], blk["b1"], d), 0.0)
        h2 = jnp.maximum(_ref_causal_conv(h1, blk["w2"], blk["b2"], d), 0.0)
        res = blk["wd"] @ x + blk["bd"][:, None] if "wd" in blk else x
        x = jnp.maximum(h2 + res, 0.0)
    tcn_out = jnp.transpose(x)                               # (L, H)
    return (tcn_out @ params["w_lin"].T).reshape(
        pose_beta_seq.shape[0], _SMPL_VERTS, 3)


# ---------------------------------------------------------------------------
if __name__ == "__main__":
    num_frames = 8            # L (sequence length)
    input_size = 16           # C_in
    num_channels = [32, 32]   # TCN channel sizes (dilations 1, 2)
    kernel_size = 3
    output_size = _SMPL_VERTS * 3   # forced by .view(num_frames, 6890, 3)

    key = jax.random.PRNGKey(0)
    key, kx = jax.random.split(key)
    pose_beta_seq = jax.random.normal(kx, (num_frames, input_size), jnp.float32)
    params = init_params(key, input_size, num_channels, output_size, kernel_size)
    packed = pack_params(params, output_size, _num_out_tiles())

    fwd = jax.jit(functools.partial(dbs_tcn_forward, kernel_size=kernel_size))
    dbs = jax.block_until_ready(fwd(pose_beta_seq, packed))
    assert dbs.shape == (num_frames, _SMPL_VERTS, 3), dbs.shape

    with jax.default_matmul_precision("float32"):            # accurate reference
        ref = jax.block_until_ready(ref_forward(pose_beta_seq, params))
    max_err = float(jnp.max(jnp.abs(dbs - ref)))
    assert max_err < 2e-2, f"mismatch vs reference: max_err={max_err}"

    print("KERNEL_OK")
</pallas_src>

<mosaic_0001>
module attributes {stable_mosaic.version = 11 : i64} {
  func.func @kernel(%arg0: i32, %arg1: memref<8x16xf32, #tpu.memory_space<vmem>>, %arg2: memref<3x16x32xf32, #tpu.memory_space<vmem>>, %arg3: memref<1x32xf32, #tpu.memory_space<vmem>>, %arg4: memref<3x32x32xf32, #tpu.memory_space<vmem>>, %arg5: memref<1x32xf32, #tpu.memory_space<vmem>>, %arg6: memref<16x32xf32, #tpu.memory_space<vmem>>, %arg7: memref<1x32xf32, #tpu.memory_space<vmem>>, %arg8: memref<3x32x32xf32, #tpu.memory_space<vmem>>, %arg9: memref<1x32xf32, #tpu.memory_space<vmem>>, %arg10: memref<3x32x32xf32, #tpu.memory_space<vmem>>, %arg11: memref<1x32xf32, #tpu.memory_space<vmem>>, %arg12: memref<1x32x20736xbf16, #tpu.memory_space<vmem>>, %arg13: memref<8x20736xf32, #tpu.memory_space<vmem>>) attributes {dimension_semantics = [#tpu.dimension_semantics<parallel>], iteration_bounds = array<i64: 1>, scalar_prefetch = 0 : i64, scratch_operands = 0 : i64, tpu.core_type = #tpu.core_type<tc>, window_params = [{pipeline_mode = #tpu.pipeline_mode<synchronous>, transform_indices = @transform_0, window_bounds = array<i64: 8, 16>}, {pipeline_mode = #tpu.pipeline_mode<synchronous>, transform_indices = @transform_1, window_bounds = array<i64: 3, 16, 32>}, {pipeline_mode = #tpu.pipeline_mode<synchronous>, transform_indices = @transform_2, window_bounds = array<i64: 1, 32>}, {pipeline_mode = #tpu.pipeline_mode<synchronous>, transform_indices = @transform_3, window_bounds = array<i64: 3, 32, 32>}, {pipeline_mode = #tpu.pipeline_mode<synchronous>, transform_indices = @transform_4, window_bounds = array<i64: 1, 32>}, {pipeline_mode = #tpu.pipeline_mode<synchronous>, transform_indices = @transform_5, window_bounds = array<i64: 16, 32>}, {pipeline_mode = #tpu.pipeline_mode<synchronous>, transform_indices = @transform_6, window_bounds = array<i64: 1, 32>}, {pipeline_mode = #tpu.pipeline_mode<synchronous>, transform_indices = @transform_7, window_bounds = array<i64: 3, 32, 32>}, {pipeline_mode = #tpu.pipeline_mode<synchronous>, transform_indices = @transform_8, window_bounds = array<i64: 1, 32>}, {pipeline_mode = #tpu.pipeline_mode<synchronous>, transform_indices = @transform_9, window_bounds = array<i64: 3, 32, 32>}, {pipeline_mode = #tpu.pipeline_mode<synchronous>, transform_indices = @transform_10, window_bounds = array<i64: 1, 32>}, {transform_indices = @transform_11, window_bounds = array<i64: 1, 32, 20736>}, {transform_indices = @transform_12, window_bounds = array<i64: 8, 20736>}]} {
    %c0 = arith.constant 0 : index
    %c0_0 = arith.constant 0 : index
    %0 = vector.load %arg1[%c0, %c0_0] : memref<8x16xf32, #tpu.memory_space<vmem>>, vector<8x16xf32>
    %c0_1 = arith.constant 0 : index
    %c0_2 = arith.constant 0 : index
    %1 = vector.load %arg3[%c0_1, %c0_2] : memref<1x32xf32, #tpu.memory_space<vmem>>, vector<1x32xf32>
    %cst = arith.constant 0.000000e+00 : f32
    %2 = vector.broadcast %cst : f32 to vector<8x32xf32>
    %cst_3 = arith.constant 0.000000e+00 : f32
    %3 = vector.broadcast %cst_3 : f32 to vector<2x16xf32>
    %4 = vector.extract_strided_slice %0 {offsets = [0, 0], sizes = [6, 16], strides = [1, 1]} : vector<8x16xf32> to vector<6x16xf32>
    %5 = tpu.concatenate %3, %4 in 0 : vector<2x16xf32>, vector<6x16xf32> -> vector<8x16xf32>
    %c0_4 = arith.constant 0 : index
    %c0_5 = arith.constant 0 : index
    %c0_6 = arith.constant 0 : index
    %6 = vector.load %arg2[%c0_4, %c0_5, %c0_6] : memref<3x16x32xf32, #tpu.memory_space<vmem>>, vector<1x16x32xf32>
    %7 = vector.shape_cast %6 : vector<1x16x32xf32> to vector<16x32xf32>
    %cst_7 = arith.constant dense<0.000000e+00> : vector<8x32xf32>
    %8 = tpu.matmul %5, %7, %cst_7 {dimension_numbers = #tpu.dot_dimension_numbers<[1], [0], [0], [1], [0, 0, 1, 1], [], []>} : vector<8x16xf32>, vector<16x32xf32>, vector<8x32xf32> -> vector<8x32xf32>
    %9 = arith.addf %2, %8 : vector<8x32xf32>
    %cst_8 = arith.constant 0.000000e+00 : f32
    %10 = vector.broadcast %cst_8 : f32 to vector<1x16xf32>
    %11 = vector.extract_strided_slice %0 {offsets = [0, 0], sizes = [7, 16], strides = [1, 1]} : vector<8x16xf32> to vector<7x16xf32>
    %12 = tpu.concatenate %10, %11 in 0 : vector<1x16xf32>, vector<7x16xf32> -> vector<8x16xf32>
    %c1 = arith.constant 1 : index
    %c0_9 = arith.constant 0 : index
    %c0_10 = arith.constant 0 : index
    %13 = vector.load %arg2[%c1, %c0_9, %c0_10] : memref<3x16x32xf32, #tpu.memory_space<vmem>>, vector<1x16x32xf32>
    %14 = vector.shape_cast %13 : vector<1x16x32xf32> to vector<16x32xf32>
    %cst_11 = arith.constant dense<0.000000e+00> : vector<8x32xf32>
    %15 = tpu.matmul %12, %14, %cst_11 {dimension_numbers = #tpu.dot_dimension_numbers<[1], [0], [0], [1], [0, 0, 1, 1], [], []>} : vector<8x16xf32>, vector<16x32xf32>, vector<8x32xf32> -> vector<8x32xf32>
    %16 = arith.addf %9, %15 : vector<8x32xf32>
    %c2 = arith.constant 2 : index
    %c0_12 = arith.constant 0 : index
    %c0_13 = arith.constant 0 : index
    %17 = vector.load %arg2[%c2, %c0_12, %c0_13] : memref<3x16x32xf32, #tpu.memory_space<vmem>>, vector<1x16x32xf32>
    %18 = vector.shape_cast %17 : vector<1x16x32xf32> to vector<16x32xf32>
    %cst_14 = arith.constant dense<0.000000e+00> : vector<8x32xf32>
    %19 = tpu.matmul %0, %18, %cst_14 {dimension_numbers = #tpu.dot_dimension_numbers<[1], [0], [0], [1], [0, 0, 1, 1], [], []>} : vector<8x16xf32>, vector<16x32xf32>, vector<8x32xf32> -> vector<8x32xf32>
    %20 = arith.addf %16, %19 : vector<8x32xf32>
    %21 = vector.broadcast %1 : vector<1x32xf32> to vector<8x32xf32>
    %22 = arith.addf %20, %21 : vector<8x32xf32>
    %cst_15 = arith.constant 0.000000e+00 : f32
    %23 = vector.broadcast %cst_15 : f32 to vector<8x32xf32>
    %24 = arith.maximumf %22, %23 : vector<8x32xf32>
    %c0_16 = arith.constant 0 : index
    %c0_17 = arith.constant 0 : index
    %25 = vector.load %arg5[%c0_16, %c0_17] : memref<1x32xf32, #tpu.memory_space<vmem>>, vector<1x32xf32>
    %cst_18 = arith.constant 0.000000e+00 : f32
    %26 = vector.broadcast %cst_18 : f32 to vector<8x32xf32>
    %cst_19 = arith.constant 0.000000e+00 : f32
    %27 = vector.broadcast %cst_19 : f32 to vector<2x32xf32>
    %28 = vector.extract_strided_slice %24 {offsets = [0, 0], sizes = [6, 32], strides = [1, 1]} : vector<8x32xf32> to vector<6x32xf32>
    %29 = tpu.concatenate %27, %28 in 0 : vector<2x32xf32>, vector<6x32xf32> -> vector<8x32xf32>
    %c0_20 = arith.constant 0 : index
    %c0_21 = arith.constant 0 : index
    %c0_22 = arith.constant 0 : index
    %30 = vector.load %arg4[%c0_20, %c0_21, %c0_22] : memref<3x32x32xf32, #tpu.memory_space<vmem>>, vector<1x32x32xf32>
    %31 = vector.shape_cast %30 : vector<1x32x32xf32> to vector<32x32xf32>
    %cst_23 = arith.constant dense<0.000000e+00> : vector<8x32xf32>
    %32 = tpu.matmul %29, %31, %cst_23 {dimension_numbers = #tpu.dot_dimension_numbers<[1], [0], [0], [1], [0, 0, 1, 1], [], []>} : vector<8x32xf32>, vector<32x32xf32>, vector<8x32xf32> -> vector<8x32xf32>
    %33 = arith.addf %26, %32 : vector<8x32xf32>
    %cst_24 = arith.constant 0.000000e+00 : f32
    %34 = vector.broadcast %cst_24 : f32 to vector<1x32xf32>
    %35 = vector.extract_strided_slice %24 {offsets = [0, 0], sizes = [7, 32], strides = [1, 1]} : vector<8x32xf32> to vector<7x32xf32>
    %36 = tpu.concatenate %34, %35 in 0 : vector<1x32xf32>, vector<7x32xf32> -> vector<8x32xf32>
    %c1_25 = arith.constant 1 : index
    %c0_26 = arith.constant 0 : index
    %c0_27 = arith.constant 0 : index
    %37 = vector.load %arg4[%c1_25, %c0_26, %c0_27] : memref<3x32x32xf32, #tpu.memory_space<vmem>>, vector<1x32x32xf32>
    %38 = vector.shape_cast %37 : vector<1x32x32xf32> to vector<32x32xf32>
    %cst_28 = arith.constant dense<0.000000e+00> : vector<8x32xf32>
    %39 = tpu.matmul %36, %38, %cst_28 {dimension_numbers = #tpu.dot_dimension_numbers<[1], [0], [0], [1], [0, 0, 1, 1], [], []>} : vector<8x32xf32>, vector<32x32xf32>, vector<8x32xf32> -> vector<8x32xf32>
    %40 = arith.addf %33, %39 : vector<8x32xf32>
    %c2_29 = arith.constant 2 : index
    %c0_30 = arith.constant 0 : index
    %c0_31 = arith.constant 0 : index
    %41 = vector.load %arg4[%c2_29, %c0_30, %c0_31] : memref<3x32x32xf32, #tpu.memory_space<vmem>>, vector<1x32x32xf32>
    %42 = vector.shape_cast %41 : vector<1x32x32xf32> to vector<32x32xf32>
    %cst_32 = arith.constant dense<0.000000e+00> : vector<8x32xf32>
    %43 = tpu.matmul %24, %42, %cst_32 {dimension_numbers = #tpu.dot_dimension_numbers<[1], [0], [0], [1], [0, 0, 1, 1], [], []>} : vector<8x32xf32>, vector<32x32xf32>, vector<8x32xf32> -> vector<8x32xf32>
    %44 = arith.addf %40, %43 : vector<8x32xf32>
    %45 = vector.broadcast %25 : vector<1x32xf32> to vector<8x32xf32>
    %46 = arith.addf %44, %45 : vector<8x32xf32>
    %cst_33 = arith.constant 0.000000e+00 : f32
    %47 = vector.broadcast %cst_33 : f32 to vector<8x32xf32>
    %48 = arith.maximumf %46, %47 : vector<8x32xf32>
    %c0_34 = arith.constant 0 : index
    %c0_35 = arith.constant 0 : index
    %49 = vector.load %arg6[%c0_34, %c0_35] : memref<16x32xf32, #tpu.memory_space<vmem>>, vector<16x32xf32>
    %cst_36 = arith.constant dense<0.000000e+00> : vector<8x32xf32>
    %50 = tpu.matmul %0, %49, %cst_36 {dimension_numbers = #tpu.dot_dimension_numbers<[1], [0], [0], [1], [0, 0, 1, 1], [], []>} : vector<8x16xf32>, vector<16x32xf32>, vector<8x32xf32> -> vector<8x32xf32>
    %c0_37 = arith.constant 0 : index
    %c0_38 = arith.constant 0 : index
    %51 = vector.load %arg7[%c0_37, %c0_38] : memref<1x32xf32, #tpu.memory_space<vmem>>, vector<1x32xf32>
    %52 = vector.broadcast %51 : vector<1x32xf32> to vector<8x32xf32>
    %53 = arith.addf %50, %52 : vector<8x32xf32>
    %54 = arith.addf %48, %53 : vector<8x32xf32>
    %cst_39 = arith.constant 0.000000e+00 : f32
    %55 = vector.broadcast %cst_39 : f32 to vector<8x32xf32>
    %56 = arith.maximumf %54, %55 : vector<8x32xf32>
    %c0_40 = arith.constant 0 : index
    %c0_41 = arith.constant 0 : index
    %57 = vector.load %arg9[%c0_40, %c0_41] : memref<1x32xf32, #tpu.memory_space<vmem>>, vector<1x32xf32>
    %cst_42 = arith.constant 0.000000e+00 : f32
    %58 = vector.broadcast %cst_42 : f32 to vector<8x32xf32>
    %cst_43 = arith.constant 0.000000e+00 : f32
    %59 = vector.broadcast %cst_43 : f32 to vector<4x32xf32>
    %60 = vector.extract_strided_slice %56 {offsets = [0, 0], sizes = [4, 32], strides = [1, 1]} : vector<8x32xf32> to vector<4x32xf32>
    %61 = tpu.concatenate %59, %60 in 0 : vector<4x32xf32>, vector<4x32xf32> -> vector<8x32xf32>
    %c0_44 = arith.constant 0 : index
    %c0_45 = arith.constant 0 : index
    %c0_46 = arith.constant 0 : index
    %62 = vector.load %arg8[%c0_44, %c0_45, %c0_46] : memref<3x32x32xf32, #tpu.memory_space<vmem>>, vector<1x32x32xf32>
    %63 = vector.shape_cast %62 : vector<1x32x32xf32> to vector<32x32xf32>
    %cst_47 = arith.constant dense<0.000000e+00> : vector<8x32xf32>
    %64 = tpu.matmul %61, %63, %cst_47 {dimension_numbers = #tpu.dot_dimension_numbers<[1], [0], [0], [1], [0, 0, 1, 1], [], []>} : vector<8x32xf32>, vector<32x32xf32>, vector<8x32xf32> -> vector<8x32xf32>
    %65 = arith.addf %58, %64 : vector<8x32xf32>
    %cst_48 = arith.constant 0.000000e+00 : f32
    %66 = vector.broadcast %cst_48 : f32 to vector<2x32xf32>
    %67 = vector.extract_strided_slice %56 {offsets = [0, 0], sizes = [6, 32], strides = [1, 1]} : vector<8x32xf32> to vector<6x32xf32>
    %68 = tpu.concatenate %66, %67 in 0 : vector<2x32xf32>, vector<6x32xf32> -> vector<8x32xf32>
    %c1_49 = arith.constant 1 : index
    %c0_50 = arith.constant 0 : index
    %c0_51 = arith.constant 0 : index
    %69 = vector.load %arg8[%c1_49, %c0_50, %c0_51] : memref<3x32x32xf32, #tpu.memory_space<vmem>>, vector<1x32x32xf32>
    %70 = vector.shape_cast %69 : vector<1x32x32xf32> to vector<32x32xf32>
    %cst_52 = arith.constant dense<0.000000e+00> : vector<8x32xf32>
    %71 = tpu.matmul %68, %70, %cst_52 {dimension_numbers = #tpu.dot_dimension_numbers<[1], [0], [0], [1], [0, 0, 1, 1], [], []>} : vector<8x32xf32>, vector<32x32xf32>, vector<8x32xf32> -> vector<8x32xf32>
    %72 = arith.addf %65, %71 : vector<8x32xf32>
    %c2_53 = arith.constant 2 : index
    %c0_54 = arith.constant 0 : index
    %c0_55 = arith.constant 0 : index
    %73 = vector.load %arg8[%c2_53, %c0_54, %c0_55] : memref<3x32x32xf32, #tpu.memory_space<vmem>>, vector<1x32x32xf32>
    %74 = vector.shape_cast %73 : vector<1x32x32xf32> to vector<32x32xf32>
    %cst_56 = arith.constant dense<0.000000e+00> : vector<8x32xf32>
    %75 = tpu.matmul %56, %74, %cst_56 {dimension_numbers = #tpu.dot_dimension_numbers<[1], [0], [0], [1], [0, 0, 1, 1], [], []>} : vector<8x32xf32>, vector<32x32xf32>, vector<8x32xf32> -> vector<8x32xf32>
    %76 = arith.addf %72, %75 : vector<8x32xf32>
    %77 = vector.broadcast %57 : vector<1x32xf32> to vector<8x32xf32>
    %78 = arith.addf %76, %77 : vector<8x32xf32>
    %cst_57 = arith.constant 0.000000e+00 : f32
    %79 = vector.broadcast %cst_57 : f32 to vector<8x32xf32>
    %80 = arith.maximumf %78, %79 : vector<8x32xf32>
    %c0_58 = arith.constant 0 : index
    %c0_59 = arith.constant 0 : index
    %81 = vector.load %arg11[%c0_58, %c0_59] : memref<1x32xf32, #tpu.memory_space<vmem>>, vector<1x32xf32>
    %cst_60 = arith.constant 0.000000e+00 : f32
    %82 = vector.broadcast %cst_60 : f32 to vector<8x32xf32>
    %cst_61 = arith.constant 0.000000e+00 : f32
    %83 = vector.broadcast %cst_61 : f32 to vector<4x32xf32>
    %84 = vector.extract_strided_slice %80 {offsets = [0, 0], sizes = [4, 32], strides = [1, 1]} : vector<8x32xf32> to vector<4x32xf32>
    %85 = tpu.concatenate %83, %84 in 0 : vector<4x32xf32>, vector<4x32xf32> -> vector<8x32xf32>
    %c0_62 = arith.constant 0 : index
    %c0_63 = arith.constant 0 : index
    %c0_64 = arith.constant 0 : index
    %86 = vector.load %arg10[%c0_62, %c0_63, %c0_64] : memref<3x32x32xf32, #tpu.memory_space<vmem>>, vector<1x32x32xf32>
    %87 = vector.shape_cast %86 : vector<1x32x32xf32> to vector<32x32xf32>
    %cst_65 = arith.constant dense<0.000000e+00> : vector<8x32xf32>
    %88 = tpu.matmul %85, %87, %cst_65 {dimension_numbers = #tpu.dot_dimension_numbers<[1], [0], [0], [1], [0, 0, 1, 1], [], []>} : vector<8x32xf32>, vector<32x32xf32>, vector<8x32xf32> -> vector<8x32xf32>
    %89 = arith.addf %82, %88 : vector<8x32xf32>
    %cst_66 = arith.constant 0.000000e+00 : f32
    %90 = vector.broadcast %cst_66 : f32 to vector<2x32xf32>
    %91 = vector.extract_strided_slice %80 {offsets = [0, 0], sizes = [6, 32], strides = [1, 1]} : vector<8x32xf32> to vector<6x32xf32>
    %92 = tpu.concatenate %90, %91 in 0 : vector<2x32xf32>, vector<6x32xf32> -> vector<8x32xf32>
    %c1_67 = arith.constant 1 : index
    %c0_68 = arith.constant 0 : index
    %c0_69 = arith.constant 0 : index
    %93 = vector.load %arg10[%c1_67, %c0_68, %c0_69] : memref<3x32x32xf32, #tpu.memory_space<vmem>>, vector<1x32x32xf32>
    %94 = vector.shape_cast %93 : vector<1x32x32xf32> to vector<32x32xf32>
    %cst_70 = arith.constant dense<0.000000e+00> : vector<8x32xf32>
    %95 = tpu.matmul %92, %94, %cst_70 {dimension_numbers = #tpu.dot_dimension_numbers<[1], [0], [0], [1], [0, 0, 1, 1], [], []>} : vector<8x32xf32>, vector<32x32xf32>, vector<8x32xf32> -> vector<8x32xf32>
    %96 = arith.addf %89, %95 : vector<8x32xf32>
    %c2_71 = arith.constant 2 : index
    %c0_72 = arith.constant 0 : index
    %c0_73 = arith.constant 0 : index
    %97 = vector.load %arg10[%c2_71, %c0_72, %c0_73] : memref<3x32x32xf32, #tpu.memory_space<vmem>>, vector<1x32x32xf32>
    %98 = vector.shape_cast %97 : vector<1x32x32xf32> to vector<32x32xf32>
    %cst_74 = arith.constant dense<0.000000e+00> : vector<8x32xf32>
    %99 = tpu.matmul %80, %98, %cst_74 {dimension_numbers = #tpu.dot_dimension_numbers<[1], [0], [0], [1], [0, 0, 1, 1], [], []>} : vector<8x32xf32>, vector<32x32xf32>, vector<8x32xf32> -> vector<8x32xf32>
    %100 = arith.addf %96, %99 : vector<8x32xf32>
    %101 = vector.broadcast %81 : vector<1x32xf32> to vector<8x32xf32>
    %102 = arith.addf %100, %101 : vector<8x32xf32>
    %cst_75 = arith.constant 0.000000e+00 : f32
    %103 = vector.broadcast %cst_75 : f32 to vector<8x32xf32>
    %104 = arith.maximumf %102, %103 : vector<8x32xf32>
    %105 = arith.addf %104, %56 : vector<8x32xf32>
    %cst_76 = arith.constant 0.000000e+00 : f32
    %106 = vector.broadcast %cst_76 : f32 to vector<8x32xf32>
    %107 = arith.maximumf %105, %106 : vector<8x32xf32>
    %c0_77 = arith.constant 0 : index
    %c0_78 = arith.constant 0 : index
    %c0_79 = arith.constant 0 : index
    %108 = vector.load %arg12[%c0_77, %c0_78, %c0_79] : memref<1x32x20736xbf16, #tpu.memory_space<vmem>>, vector<1x32x20736xbf16>
    %109 = vector.shape_cast %108 : vector<1x32x20736xbf16> to vector<32x20736xbf16>
    %110 = arith.extf %109 : vector<32x20736xbf16> to vector<32x20736xf32>
    %cst_80 = arith.constant dense<0.000000e+00> : vector<8x20736xf32>
    %111 = tpu.matmul %107, %110, %cst_80 {dimension_numbers = #tpu.dot_dimension_numbers<[1], [0], [0], [1], [0, 0, 1, 1], [], []>} : vector<8x32xf32>, vector<32x20736xf32>, vector<8x20736xf32> -> vector<8x20736xf32>
    %c0_81 = arith.constant 0 : index
    %c0_82 = arith.constant 0 : index
    %112 = vector.load %arg13[%c0_81, %c0_82] : memref<8x20736xf32, #tpu.memory_space<vmem>>, vector<8x20736xf32>
    tpu.vector_store %arg13[%c0_81, %c0_82], %111 {strides = array<i32>} : memref<8x20736xf32, #tpu.memory_space<vmem>>, vector<8x20736xf32>,
    return
  }
  func.func @transform_0(%arg0: i32) -> (i32, i32) {
    %c0_i32 = arith.constant 0 : i32
    %c0_i32_0 = arith.constant 0 : i32
    %c0_i32_1 = arith.constant 0 : i32
    return %c0_i32, %c0_i32_0 : i32, i32
  }
  func.func @transform_1(%arg0: i32) -> (i32, i32, i32) {
    %c0_i32 = arith.constant 0 : i32
    %c0_i32_0 = arith.constant 0 : i32
    %c0_i32_1 = arith.constant 0 : i32
    %c0_i32_2 = arith.constant 0 : i32
    return %c0_i32, %c0_i32_0, %c0_i32_1 : i32, i32, i32
  }
  func.func @transform_2(%arg0: i32) -> (i32, i32) {
    %c0_i32 = arith.constant 0 : i32
    %c0_i32_0 = arith.constant 0 : i32
    %c0_i32_1 = arith.constant 0 : i32
    return %c0_i32, %c0_i32_0 : i32, i32
  }
  func.func @transform_3(%arg0: i32) -> (i32, i32, i32) {
    %c0_i32 = arith.constant 0 : i32
    %c0_i32_0 = arith.constant 0 : i32
    %c0_i32_1 = arith.constant 0 : i32
    %c0_i32_2 = arith.constant 0 : i32
    return %c0_i32, %c0_i32_0, %c0_i32_1 : i32, i32, i32
  }
  func.func @transform_4(%arg0: i32) -> (i32, i32) {
    %c0_i32 = arith.constant 0 : i32
    %c0_i32_0 = arith.constant 0 : i32
    %c0_i32_1 = arith.constant 0 : i32
    return %c0_i32, %c0_i32_0 : i32, i32
  }
  func.func @transform_5(%arg0: i32) -> (i32, i32) {
    %c0_i32 = arith.constant 0 : i32
    %c0_i32_0 = arith.constant 0 : i32
    %c0_i32_1 = arith.constant 0 : i32
    return %c0_i32, %c0_i32_0 : i32, i32
  }
  func.func @transform_6(%arg0: i32) -> (i32, i32) {
    %c0_i32 = arith.constant 0 : i32
    %c0_i32_0 = arith.constant 0 : i32
    %c0_i32_1 = arith.constant 0 : i32
    return %c0_i32, %c0_i32_0 : i32, i32
  }
  func.func @transform_7(%arg0: i32) -> (i32, i32, i32) {
    %c0_i32 = arith.constant 0 : i32
    %c0_i32_0 = arith.constant 0 : i32
    %c0_i32_1 = arith.constant 0 : i32
    %c0_i32_2 = arith.constant 0 : i32
    return %c0_i32, %c0_i32_0, %c0_i32_1 : i32, i32, i32
  }
  func.func @transform_8(%arg0: i32) -> (i32, i32) {
    %c0_i32 = arith.constant 0 : i32
    %c0_i32_0 = arith.constant 0 : i32
    %c0_i32_1 = arith.constant 0 : i32
    return %c0_i32, %c0_i32_0 : i32, i32
  }
  func.func @transform_9(%arg0: i32) -> (i32, i32, i32) {
    %c0_i32 = arith.constant 0 : i32
    %c0_i32_0 = arith.constant 0 : i32
    %c0_i32_1 = arith.constant 0 : i32
    %c0_i32_2 = arith.constant 0 : i32
    return %c0_i32, %c0_i32_0, %c0_i32_1 : i32, i32, i32
  }
  func.func @transform_10(%arg0: i32) -> (i32, i32) {
    %c0_i32 = arith.constant 0 : i32
    %c0_i32_0 = arith.constant 0 : i32
    %c0_i32_1 = arith.constant 0 : i32
    return %c0_i32, %c0_i32_0 : i32, i32
  }
  func.func @transform_11(%arg0: i32) -> (i32, i32, i32) {
    %c0_i32 = arith.constant 0 : i32
    %c0_i32_0 = arith.constant 0 : i32
    %c0_i32_1 = arith.constant 0 : i32
    return %arg0, %c0_i32, %c0_i32_0 : i32, i32, i32
  }
  func.func @transform_12(%arg0: i32) -> (i32, i32) {
    %c0_i32 = arith.constant 0 : i32
    %c0_i32_0 = arith.constant 0 : i32
    return %c0_i32, %arg0 : i32, i32
  }
}

</mosaic_0001>

<bundles_post_ra>
// kernel: dbs_tcn_forward.1
= control target key start
LH: loop header
LB: loop body
LE: loop exit
PB: predicated region body
PF: predicated region fallthrough
CT: control target
= control target key end

     0   :  { %17 = vsyncpa [#allocation3], 0  ;;  %s6487_s0 = inlined_call_operand.hbm [shape: f32[8,16], index: 0, kind: input, shape index: {}]   ;;  %s6488_s1 = inlined_call_operand.hbm [shape: f32[3,16,32], index: 1, kind: input, shape index: {}]   ;;  %s6489_s2 = inlined_call_operand.hbm [shape: f32[1,32], index: 2, kind: input, shape index: {}]   ;;  %s6490_s3 = inlined_call_operand.hbm [shape: f32[3,32,32], index: 3, kind: input, shape index: {}]   ;;  %s6491_s4 = inlined_call_operand.hbm [shape: f32[1,32], index: 4, kind: input, shape index: {}]   ;;  %s6492_s5 = inlined_call_operand.hbm [shape: f32[16,32], index: 5, kind: input, shape index: {}]   ;;  %s6493_s6 = inlined_call_operand.hbm [shape: f32[1,32], index: 6, kind: input, shape index: {}]   ;;  %s6494_s7 = inlined_call_operand.hbm [shape: f32[3,32,32], index: 7, kind: input, shape index: {}]   ;;  %s6495_s8 = inlined_call_operand.hbm [shape: f32[1,32], index: 8, kind: input, shape index: {}]   ;;  %s6496_s9 = inlined_call_operand.hbm [shape: f32[3,32,32], index: 9, kind: input, shape index: {}]   ;;  %s6497_s10 = inlined_call_operand.hbm [shape: f32[1,32], index: 10, kind: input, shape index: {}]   ;;  %s6498_s11 = inlined_call_operand.hbm [shape: bf16[1,32,20736], index: 11, kind: input, shape index: {}]   ;;  %s6499_s12 = inlined_call_operand.vmem [shape: f32[8,20670], index: 12, kind: output, shape index: {}]  }
   0x1   :  { %18 = vsyncpa [#allocation5], 0 }
   0x2   :  { %19 = vsyncpa [#allocation8], 0 }
   0x3   :  { %20 = vsyncpa [#allocation11], 0 }
   0x4   :  { %21 = vsyncpa [#allocation14], 0 }
   0x5   :  { %22 = vsyncpa [#allocation17], 0  ;;  %s39_s23 = sshll.u32 %s6488_s1, 4  ;;  %s40_s23 = int_to_ptr.hbm [resolvable:$true] %s39_s23 }
   0x6   :  { %23 = vsyncpa [#allocation20], 0  ;;  %s5516_s24 = smov [#allocation4]   ;;  %s63_s28 = sshll.u32 %s6490_s3, 4  ;;  %s64_s28 = int_to_ptr.hbm [resolvable:$true] %s63_s28 }
   0x7   :  { %s41_s25 = sshll.u32 %s5516_s24, 4  ;;  %s5517_s29 = smov 128   ;;  %s42_s25 = int_to_ptr.vmem [resolvable:$true] %s41_s25 }
   0x8   :  { %s5518_s30 = smov 8   ;;  %s5519_s13 = smov [#allocation7]  }
   0x9   :  { %47 = dma.hbm_to_vmem [thread:$0]  %s40_s23, 768, %s42_s25, [#allocation5], %s5517_s29, %s5517_s29, %s5518_s30  }
   0xa   :  { %s65_s14 = sshll.u32 %s5519_s13, 4  ;;  %s87_s16 = sshll.u32 %s6492_s5, 4  ;;  %s66_s14 = int_to_ptr.vmem [resolvable:$true] %s65_s14  ;;  %s88_s16 = int_to_ptr.hbm [resolvable:$true] %s87_s16 }
   0xb   :  { %71 = dma.hbm_to_vmem [thread:$0]  %s64_s28, 1536, %s66_s14, [#allocation8], %s5517_s29, %s5517_s29, %s5518_s30  }
   0xc   :  { %s111_s18 = sshll.u32 %s6494_s7, 4  ;;  %s5520_s19 = smov [#allocation10]   ;;  %s112_s18 = int_to_ptr.hbm [resolvable:$true] %s111_s18 }
   0xd   :  { %s89_s20 = sshll.u32 %s5520_s19, 4  ;;  %s5521_s21 = smov [#allocation13]   ;;  %s90_s20 = int_to_ptr.vmem [resolvable:$true] %s89_s20 }
   0xe   :  { %95 = dma.hbm_to_vmem [thread:$0]  %s88_s16, 256, %s90_s20, [#allocation11], %s5517_s29, %s5517_s29, %s5518_s30  }
   0xf   :  { %s113_s5 = sshll.u32 %s5521_s21, 4  ;;  %s135_s24 = sshll.u32 %s6496_s9, 4  ;;  %s114_s5 = int_to_ptr.vmem [resolvable:$true] %s113_s5  ;;  %s136_s24 = int_to_ptr.hbm [resolvable:$true] %s135_s24 }
  0x10   :  { %119 = dma.hbm_to_vmem [thread:$0]  %s112_s18, 1536, %s114_s5, [#allocation14], %s5517_s29, %s5517_s29, %s5518_s30  }
  0x11   :  { %s29_s26 = sshll.u32 %s6487_s0, 4  ;;  %s5522_s27 = smov [#allocation16]   ;;  %s30_s26 = int_to_ptr.hbm [resolvable:$true] %s29_s26 }
  0x12   :  { %s137_s28 = sshll.u32 %s5522_s27, 4  ;;  %s5523_s13 = smov [#allocation2]   ;;  %s138_s28 = int_to_ptr.vmem [resolvable:$true] %s137_s28 }
  0x13   :  { %143 = dma.hbm_to_vmem [thread:$0]  %s136_s24, 1536, %s138_s28, [#allocation17], %s5517_s29, %s5517_s29, %s5518_s30  }
  0x14   :  { %s31_s9 = sshll.u32 %s5523_s13, 4  ;;  %s53_s1 = sshll.u32 %s6489_s2, 4  ;;  %s32_s9 = int_to_ptr.vmem [resolvable:$true] %s31_s9  ;;  %s54_s1 = int_to_ptr.hbm [resolvable:$true] %s53_s1 }
  0x15   :  { %34 = dma.hbm_to_vmem [thread:$0]  %s30_s26, 128, %s32_s9, [#allocation3]  }
  0x16   :  { %s77_s0 = sshll.u32 %s6491_s4, 4  ;;  %s5524_s17 = smov [#allocation6]   ;;  %s78_s0 = int_to_ptr.hbm [resolvable:$true] %s77_s0 }
  0x17   :  { %s55_s18 = sshll.u32 %s5524_s17, 4  ;;  %s5525_s19 = smov [#allocation9]   ;;  %s56_s18 = int_to_ptr.vmem [resolvable:$true] %s55_s18 }
  0x18   :  { %58 = dma.hbm_to_vmem [thread:$0]  %s54_s1, 16, %s56_s18, [#allocation5]  }
  0x19   :  { %s79_s29 = sshll.u32 %s5525_s19, 4  ;;  %s101_s21 = sshll.u32 %s6493_s6, 4  ;;  %s80_s29 = int_to_ptr.vmem [resolvable:$true] %s79_s29  ;;  %s102_s21 = int_to_ptr.hbm [resolvable:$true] %s101_s21 }
  0x1a   :  { %82 = dma.hbm_to_vmem [thread:$0]  %s78_s0, 16, %s80_s29, [#allocation8]  }
  0x1b   :  { %s125_s22 = sshll.u32 %s6495_s8, 4  ;;  %s5526_s23 = smov [#allocation12]   ;;  %s126_s22 = int_to_ptr.hbm [resolvable:$true] %s125_s22 }
  0x1c   :  { %s103_s4 = sshll.u32 %s5526_s23, 4  ;;  %s5527_s24 = smov [#allocation15]   ;;  %s104_s4 = int_to_ptr.vmem [resolvable:$true] %s103_s4 }
  0x1d   :  { %106 = dma.hbm_to_vmem [thread:$0]  %s102_s21, 16, %s104_s4, [#allocation11]  }
  0x1e   :  { %s127_s7 = sshll.u32 %s5527_s24, 4  ;;  %s149_s27 = sshll.u32 %s6497_s10, 4  ;;  %s128_s7 = int_to_ptr.vmem [resolvable:$true] %s127_s7  ;;  %s150_s27 = int_to_ptr.hbm [resolvable:$true] %s149_s27 }
  0x1f   :  { %130 = dma.hbm_to_vmem [thread:$0]  %s126_s22, 16, %s128_s7, [#allocation14]  }
  0x20   :  { %s159_s13 = sshll.u32 %s6498_s11, 4  ;;  %s5528_s9 = smov [#allocation18]   ;;  %s160_s13 = int_to_ptr.hbm [resolvable:$true] %s159_s13 }
  0x21   :  { %s151_s8 = sshll.u32 %s5528_s9, 4  ;;  %s5529_s14 = smov [#allocation19]   ;;  %s152_s8 = int_to_ptr.vmem [resolvable:$true] %s151_s8 }
  0x22   :  { %154 = dma.hbm_to_vmem [thread:$0]  %s150_s27, 16, %s152_s8, [#allocation17]  }
  0x23   :  { %s161_s15 = sshll.u32 %s5529_s14, 4  ;;  %s5530_s1 = smov 10368   ;;  %s162_s15 = int_to_ptr.vmem [resolvable:$true] %s161_s15 }
  0x24   :  { %s5531_s16 = smov 648  }
  0x25   :  { %167 = dma.hbm_to_vmem [thread:$0]  %s160_s13, 41472, %s162_s15, [#allocation20], %s5530_s1, %s5530_s1, %s5531_s16  }
  0x26   :  { %5502 = dma.done.wait [#allocation3], 128  }
  0x27   :  { %5503 = vsyncadd [#allocation3], 4294967168 }
  0x28   :  { %5504 = dma.done.wait [#allocation5], 784  }
  0x29   :  { %5505 = vsyncadd [#allocation5], 4294966512 }
  0x2a   :  { %5506 = dma.done.wait [#allocation8], 1552  }
  0x2b   :  { %5507 = vsyncadd [#allocation8], 4294965744 }
  0x2c   :  { %5508 = dma.done.wait [#allocation11], 272  }
  0x2d   :  { %5509 = vsyncadd [#allocation11], 4294967024 }
  0x2e   :  { %5510 = dma.done.wait [#allocation14], 1552  }
  0x2f   :  { %5511 = vsyncadd [#allocation14], 4294965744 }
  0x30   :  { %5512 = dma.done.wait [#allocation17], 1552  }
  0x31   :  { %5513 = vsyncadd [#allocation17], 4294965744 }
  0x32   :  { %5514 = dma.done.wait [#allocation20], 41472  }
  0x33   :  { %5515 = vsyncadd [#allocation20], 4294925824  ;;  %v281_v0 = vld [vmem:[#allocation4 + $0x28] sm:$0xff]  ;;  %v280_v1 = vld [vmem:[#allocation4 + $0x20] sm:$0xff]  ;;  %vm227_vm0 = vcmask 1040384   ;;  %vm221_vm1 = vcmask 1041408  }
  0x34   :  { %v216_v2 = vld [vmem:[#allocation2] sm:$0xff]  ;;  %298 = vmatpush.msra.mxu2 %v281_v0  ;;  %vm232_vm2 = vcmask 130048   ;;  %v224_v4 = vld [vmem:[#allocation4 + $0x8] sm:$0xff]  ;;  %v230_v5 = vld [vmem:[#allocation4 + $0x10] sm:$0xff]  ;;  %vm327_vm3 = vcmask 261120   ;;  %vm439_vm4 = vcmask 1043456  }
  0x35   :  { %v231_v3 = vld [vmem:[#allocation4 + $0x18] sm:$0xff]  ;;  %v225_v6 = vrot.slane %v216_v2, 7  ;;  %v219_v7 = vrot.slane %v216_v2, 6  ;;  %273 = vmatpush.msra.mxu1 %v224_v4  ;;  %v223_v8 = vld [vmem:[#allocation4] sm:$0xff]  ;;  %v378_v11 = vld [vmem:[#allocation7 + $0x58] sm:$0xff] }
  0x36   :  { %250 = vmatpush.msra.mxu0 %v231_v3  ;;  %299 = vmatpush.msra.mxu2 %v280_v1  ;;  %v377_v12 = vld [vmem:[#allocation7 + $0x50] sm:$0xff]  ;;  %v326_v13 = vld [vmem:[#allocation7 + $0x38] sm:$0xff]  ;;  %v376_v15 = vld [vmem:[#allocation7 + $0x48] sm:$0xff] }
  0x37   :  { %v228_v9 = vsel %vm227_vm0, 0.0, %v225_v6  ;;  %v222_v10 = vsel %vm221_vm1, 0.0, %v219_v7  ;;  %5020 = vmatmul.msk.f32.vlgmr.msra.gmra.mxu2 %vm232_vm2, %v216_v2  ;;  %274 = vmatpush.msra.mxu1 %v223_v8  ;;  %v318_v14 = vld [vmem:[#allocation7 + $0x18] sm:$0xff]  ;;  %v325_v16 = vld [vmem:[#allocation7 + $0x30] sm:$0xff]  ;;  %v375_v18 = vld [vmem:[#allocation7 + $0x40] sm:$0xff] }
  0x38   :  { %251 = vmatpush.msra.mxu0 %v230_v5  ;;  %5019 = vmatmul.msk.f32.vlgmr.msra.gmra.mxu1 %vm232_vm2, %v222_v10  ;;  %v317_v17 = vld [vmem:[#allocation7 + $0x10] sm:$0xff]  ;;  %v324_v19 = vld [vmem:[#allocation7 + $0x28] sm:$0xff]  ;;  %v323_v22 = vld [vmem:[#allocation7 + $0x20] sm:$0xff] }
  0x39   :  { %5018 = vmatmul.msk.f32.vlgmr.msra.gmra.mxu0 %vm232_vm2, %v228_v9  ;;  %393 = vmatpush.msrb.mxu1 %v378_v11  ;;  %v316_v20 = vld [vmem:[#allocation7 + $0x8] sm:$0xff]  ;;  %v315_v23 = vld [vmem:[#allocation7] sm:$0xff]  ;;  %v5209_v28 = vld [vmem:[#allocation6] ss:$0 sm:$0xff] }
  0x3a   :  { %343 = vmatpush.msra.mxu3 %v326_v13  ;;  %366 = vmatpush.msrb.mxu0 %v318_v14  ;;  %v408_v21 = vld [vmem:[#allocation10 + $0x8] sm:$0xff]  ;;  %v407_v24 = vld [vmem:[#allocation10] sm:$0xff]  ;;  %v500_v45 = vld [vmem:[#allocation13 + $0x40] sm:$0xff] }
  0x3b   :  { %394 = vmatpush.msrb.mxu1 %v377_v12  ;;  %427 = vmatpush.msrb.mxu2 %v408_v21  ;;  %v503_v37 = vld [vmem:[#allocation13 + $0x58] sm:$0xff]  ;;  %v502_v38 = vld [vmem:[#allocation13 + $0x50] sm:$0xff]  ;;  %v501_v41 = vld [vmem:[#allocation13 + $0x48] sm:$0xff] }
  0x3c   :  { %344 = vmatpush.msra.mxu3 %v325_v16  ;;  %367 = vmatpush.msrb.mxu0 %v317_v17  ;;  %v452_v39 = vld [vmem:[#allocation13 + $0x38] sm:$0xff]  ;;  %v451_v42 = vld [vmem:[#allocation13 + $0x30] sm:$0xff]  ;;  %v450_v44 = vld [vmem:[#allocation13 + $0x28] sm:$0xff] }
  0x3d   :  { %395 = vmatpush.msrb.mxu1 %v376_v15  ;;  %428 = vmatpush.msrb.mxu2 %v407_v24  ;;  %v444_v40 = vld [vmem:[#allocation13 + $0x18] sm:$0xff]  ;;  %v443_v43 = vld [vmem:[#allocation13 + $0x10] sm:$0xff]  ;;  %v442_v46 = vld [vmem:[#allocation13 + $0x8] sm:$0xff] }
  0x3e   :  { %345 = vmatpush.msra.mxu3 %v324_v19  ;;  %368 = vmatpush.msrb.mxu0 %v316_v20  ;;  %v449_v47 = vld [vmem:[#allocation13 + $0x20] sm:$0xff]  ;;  %v5210_v52 = vld [vmem:[#allocation9] ss:$0 sm:$0xff]  ;;  %v5211_v53 = vld [vmem:[#allocation12] ss:$0 sm:$0xff] }
  0x3f   :  { %396 = vmatpush.msrb.mxu1 %v375_v18  ;;  %5024 = vmatmul.msk.f32.vlgmr.msrb.gmra.mxu2 %vm232_vm2, %v216_v2  ;;  %v441_v48 = vld [vmem:[#allocation13] sm:$0xff]  ;;  %v598_v3 = vld [vmem:[#allocation16 + $0x50] sm:$0xff]  ;;  %v597_v6 = vld [vmem:[#allocation16 + $0x48] sm:$0xff] }
  0x40   :  { %346 = vmatpush.msra.mxu3 %v323_v22  ;;  %369 = vmatpush.msrb.mxu0 %v315_v23  ;;  %v599_v2 = vld [vmem:[#allocation16 + $0x58] sm:$0xff]  ;;  %v547_v7 = vld [vmem:[#allocation16 + $0x30] sm:$0xff]  ;;  %v546_v9 = vld [vmem:[#allocation16 + $0x28] sm:$0xff] }
  0x41   :  { %518 = vmatpush.msra.mxu1 %v503_v37  ;;  %v548_v4 = vld [vmem:[#allocation16 + $0x38] sm:$0xff]  ;;  %v539_v8 = vld [vmem:[#allocation16 + $0x10] sm:$0xff]  ;;  %v538_v10 = vld [vmem:[#allocation16 + $0x8] sm:$0xff] }
  0x42   :  { %468 = vmatpush.msrb.mxu3 %v452_v39  ;;  %491 = vmatpush.msra.mxu0 %v444_v40  ;;  %v540_v5 = vld [vmem:[#allocation16 + $0x18] sm:$0xff]  ;;  %v596_v11 = vld [vmem:[#allocation16 + $0x40] sm:$0xff] }
  0x43   :  { %519 = vmatpush.msra.mxu1 %v502_v38  ;;  %564 = vmatpush.msra.mxu2 %v548_v4  ;;  %v545_v12 = vld [vmem:[#allocation16 + $0x20] sm:$0xff]  ;;  %v5212_v17 = vld [vmem:[#allocation15] ss:$0 sm:$0xff]  ;;  %v711_v38 = vld [vmem:[#allocation19 + $0x288] sm:$0xff] }
  0x44   :  { %469 = vmatpush.msrb.mxu3 %v451_v42  ;;  %492 = vmatpush.msra.mxu0 %v443_v43  ;;  %v537_v13 = vld [vmem:[#allocation16] sm:$0xff]  ;;  %v712_v39 = vld [vmem:[#allocation19 + $0x290] sm:$0xff]  ;;  %v1117_v40 = vunpack.c.h.bf16 %v711_v38 }
  0x45   :  { %520 = vmatpush.msra.mxu1 %v501_v41  ;;  %565 = vmatpush.msra.mxu2 %v547_v7  ;;  %v1116_v41 = vunpack.c.l.bf16 %v711_v38  ;;  %v1118_v42 = vunpack.c.l.bf16 %v712_v39  ;;  %v1119_v43 = vunpack.c.h.bf16 %v712_v39  ;;  %v634_v38 = vld [vmem:[#allocation19 + $0x20] sm:$0xff]  ;;  %v635_v39 = vld [vmem:[#allocation19 + $0x28] sm:$0xff] }
  0x46   :  { %470 = vmatpush.msrb.mxu3 %v450_v44  ;;  %493 = vmatpush.msra.mxu0 %v442_v46  ;;  %v630_v44 = vld [vmem:[#allocation19] sm:$0xff] }
  0x47   :  { %521 = vmatpush.msra.mxu1 %v500_v45  ;;  %566 = vmatpush.msra.mxu2 %v546_v9  ;;  %v631_v45 = vld [vmem:[#allocation19 + $0x8] sm:$0xff]  ;;  %v955_v46 = vunpack.c.h.bf16 %v630_v44 }
  0x48   :  { %471 = vmatpush.msrb.mxu3 %v449_v47  ;;  %494 = vmatpush.msra.mxu0 %v441_v48  ;;  %v954_v47 = vunpack.c.l.bf16 %v630_v44  ;;  %v956_v48 = vunpack.c.l.bf16 %v631_v45  ;;  %v964_v44 = vunpack.c.l.bf16 %v635_v39 }
  0x49   :  { %567 = vmatpush.msra.mxu2 %v545_v12 }
  0xb5   :  { %v276_v26 = vpop.f32.mrf.mxu1 }
  0xb6   :  { %v253_v25 = vpop.f32.mrf.mxu0 }
  0xb7   :  { %v277_v27 = vadd.f32 %v276_v26, %v253_v25  ;;  %v873_v26 = vld [vmem:[#allocation19 + $0x798] sm:$0xff] }
  0xba   :  { %v301_v29 = vpop.f32.mrf.mxu2 }
  0xbb   :  { %v304_v30 = vadd.f32 %v301_v29, %v277_v27  ;;  %v874_v27 = vld [vmem:[#allocation19 + $0x7a0] sm:$0xff]  ;;  %v1440_v29 = vunpack.c.l.bf16 %v873_v26 }
  0xbd   :  { %v308_v31 = vadd.f32 %v5209_v28, %v304_v30  ;;  %v1441_v28 = vunpack.c.h.bf16 %v873_v26  ;;  %v1442_v30 = vunpack.c.l.bf16 %v874_v27  ;;  %v797_v26 = vld [vmem:[#allocation19 + $0x538] sm:$0xff] }
  0xbf   :  { %v309_v32 = vmax.f32 %v308_v31, 0.0  ;;  %v1443_v31 = vunpack.c.h.bf16 %v874_v27  ;;  %1637 = vmatpush.msrb.mxu2 %v1441_v28 }
  0xc1   :  { %5023 = vmatmul.msk.f32.vlgmr.msrb.gmra.mxu1 %vm327_vm3, %v309_v32  ;;  %v319_v33 = vrot.slane %v309_v32, 7  ;;  %v312_v34 = vrot.slane %v309_v32, 6  ;;  %v792_v32 = vld [vmem:[#allocation19 + $0x510] sm:$0xff] }
  0xc2   :  { %v430_v55 = vpop.f32.mrf.mxu2  ;;  %1617 = vmatpush.msrb.mxu1 %v1440_v29  ;;  %v715_v29 = vld [vmem:[#allocation19 + $0x2a8] sm:$0xff] }
  0xc3   :  { %v321_v35 = vsel %vm227_vm0, 0.0, %v319_v33  ;;  %v314_v36 = vsel %vm221_vm1, 0.0, %v312_v34  ;;  %v431_v58 = vadd.f32 %v5211_v53, %v430_v55  ;;  %v793_v33 = vld [vmem:[#allocation19 + $0x518] sm:$0xff]  ;;  %v1279_v34 = vunpack.c.h.bf16 %v792_v32 }
  0xc4   :  { %5021 = vmatmul.msk.f32.vlgmr.msra.gmra.mxu3 %vm327_vm3, %v321_v35  ;;  %5022 = vmatmul.msk.f32.vlgmr.msrb.gmra.mxu0 %vm327_vm3, %v314_v36  ;;  %v1278_v35 = vunpack.c.l.bf16 %v792_v32  ;;  %v1280_v36 = vunpack.c.l.bf16 %v793_v33  ;;  %v1281_v37 = vunpack.c.h.bf16 %v793_v33  ;;  %v716_v32 = vld [vmem:[#allocation19 + $0x2b0] sm:$0xff]  ;;  %v1289_v33 = vunpack.c.h.bf16 %v797_v26 }
  0xc5   :  { %614 = vmatpush.msrb.mxu0 %v599_v2  ;;  %587 = vmatpush.msra.mxu3 %v540_v5  ;;  %v633_v2 = vld [vmem:[#allocation19 + $0x18] sm:$0xff] }
  0xc6   :  { %1638 = vmatpush.msrb.mxu2 %v1279_v34  ;;  %1618 = vmatpush.msrb.mxu1 %v1278_v35  ;;  %v960_v9 = vunpack.c.l.bf16 %v633_v2  ;;  %v1125_v34 = vunpack.c.h.bf16 %v715_v29  ;;  %v1124_v35 = vunpack.c.l.bf16 %v715_v29 }
  0xc7   :  { %615 = vmatpush.msrb.mxu0 %v598_v3  ;;  %588 = vmatpush.msra.mxu3 %v539_v8 }
  0xc8   :  { %1639 = vmatpush.msrb.mxu2 %v1117_v40  ;;  %1619 = vmatpush.msrb.mxu1 %v1116_v41  ;;  %v879_v40 = vld [vmem:[#allocation19 + $0x7c8] sm:$0xff]  ;;  %v963_v41 = vunpack.c.h.bf16 %v634_v38 }
  0xc9   :  { %616 = vmatpush.msrb.mxu0 %v597_v6  ;;  %589 = vmatpush.msra.mxu3 %v538_v10  ;;  %v961_v10 = vunpack.c.h.bf16 %v633_v2 }
  0xca   :  { %1640 = vmatpush.msrb.mxu2 %v955_v46  ;;  %1620 = vmatpush.msrb.mxu1 %v954_v47  ;;  %v798_v46 = vld [vmem:[#allocation19 + $0x540] sm:$0xff]  ;;  %v1453_v47 = vunpack.c.h.bf16 %v879_v40 }
  0xcb   :  { %617 = vmatpush.msrb.mxu0 %v596_v11  ;;  %590 = vmatpush.msra.mxu3 %v537_v13 }
 0x13e   :  { %v398_v54 = vpop.f32.mrf.mxu1 }
 0x141   :  { %v371_v49 = vpop.f32.mrf.mxu0 }
 0x147   :  { %v348_v50 = vpop.f32.mrf.mxu3 }
 0x148   :  { %v372_v51 = vadd.f32 %v371_v49, %v348_v50  ;;  %v957_v49 = vunpack.c.h.bf16 %v631_v45  ;;  %v875_v50 = vld [vmem:[#allocation19 + $0x7a8] sm:$0xff]  ;;  %v965_v45 = vunpack.c.h.bf16 %v635_v39 }
 0x149   :  { %v1444_v53 = vunpack.c.l.bf16 %v875_v50 }
 0x14a   :  { %v401_v56 = vadd.f32 %v398_v54, %v372_v51  ;;  %v876_v51 = vld [vmem:[#allocation19 + $0x7b0] sm:$0xff] }
 0x14b   :  { %v1446_v54 = vunpack.c.l.bf16 %v876_v51  ;;  %v1447_v55 = vunpack.c.h.bf16 %v876_v51 }
 0x14c   :  { %v405_v57 = vadd.f32 %v5210_v52, %v401_v56  ;;  %v1445_v52 = vunpack.c.h.bf16 %v875_v50  ;;  %v794_v56 = vld [vmem:[#allocation19 + $0x520] sm:$0xff] }
 0x14e   :  { %v406_v59 = vmax.f32 %v405_v57, 0.0  ;;  %v795_v57 = vld [vmem:[#allocation19 + $0x528] sm:$0xff] }
 0x150   :  { %v433_v60 = vadd.f32 %v431_v58, %v406_v59  ;;  %v713_v58 = vld [vmem:[#allocation19 + $0x298] sm:$0xff]  ;;  %v1283_v59 = vunpack.c.h.bf16 %v794_v56 }
 0x151   :  { %v1121_v3 = vunpack.c.h.bf16 %v713_v58  ;;  %v1120_v4 = vunpack.c.l.bf16 %v713_v58  ;;  %v636_v58 = vld [vmem:[#allocation19 + $0x30] sm:$0xff] }
 0x152   :  { %v5659_v61 = vmax.f32 %v433_v60, 0.0  ;;  %v1282_v60 = vunpack.c.l.bf16 %v794_v56  ;;  %v717_v56 = vld [vmem:[#allocation19 + $0x2b8] sm:$0xff]  ;;  %v967_v2 = vunpack.c.h.bf16 %v636_v58 }
 0x154   :  { %5027 = vmatmul.msk.f32.vlgmr.msra.gmra.mxu1 %vm327_vm3, %v5659_v61  ;;  %v445_v62 = vrot.slane %v5659_v61, 6  ;;  %v437_v63 = vrot.slane %v5659_v61, 4 }
 0x155   :  { %1697 = vmatpush.msra.mxu1 %v1444_v53  ;;  %v1290_v53 = vunpack.c.l.bf16 %v798_v46 }
 0x156   :  { %v447_v0 = vsel %vm221_vm1, 0.0, %v445_v62  ;;  %v440_v1 = vsel %vm439_vm4, 0.0, %v437_v63  ;;  %v1284_v62 = vunpack.c.l.bf16 %v795_v57  ;;  %v1285_v63 = vunpack.c.h.bf16 %v795_v57  ;;  %v718_v57 = vld [vmem:[#allocation19 + $0x2c0] sm:$0xff] }
 0x157   :  { %5025 = vmatmul.msk.f32.vlgmr.msrb.gmra.mxu3 %vm327_vm3, %v447_v0  ;;  %5026 = vmatmul.msk.f32.vlgmr.msra.gmra.mxu0 %vm327_vm3, %v440_v1  ;;  %v714_v0 = vld [vmem:[#allocation19 + $0x2a0] sm:$0xff]  ;;  %v632_v1 = vld [vmem:[#allocation19 + $0x10] sm:$0xff] }
 0x158   :  { %1657 = vmatpush.msrb.mxu3 %v1442_v30  ;;  %1677 = vmatpush.msra.mxu0 %v1443_v31  ;;  %v1122_v5 = vunpack.c.l.bf16 %v714_v0  ;;  %v1123_v6 = vunpack.c.h.bf16 %v714_v0  ;;  %v959_v7 = vunpack.c.h.bf16 %v632_v1  ;;  %v958_v8 = vunpack.c.l.bf16 %v632_v1  ;;  %v881_v1 = vld [vmem:[#allocation19 + $0x7d8] sm:$0xff] }
 0x159   :  { %1698 = vmatpush.msra.mxu1 %v1282_v60  ;;  %v1128_v60 = vunpack.c.l.bf16 %v717_v56  ;;  %v1131_v0 = vunpack.c.h.bf16 %v718_v57 }
 0x15a   :  { %1658 = vmatpush.msrb.mxu3 %v1280_v36  ;;  %1678 = vmatpush.msra.mxu0 %v1281_v37  ;;  %v1126_v36 = vunpack.c.l.bf16 %v716_v32  ;;  %v1127_v37 = vunpack.c.h.bf16 %v716_v32  ;;  %v802_v32 = vld [vmem:[#allocation19 + $0x560] sm:$0xff] }
 0x15b   :  { %1699 = vmatpush.msra.mxu1 %v1120_v4  ;;  %v882_v4 = vld [vmem:[#allocation19 + $0x7e0] sm:$0xff]  ;;  %v1298_v39 = vunpack.c.l.bf16 %v802_v32 }
 0x15c   :  { %1659 = vmatpush.msrb.mxu3 %v1118_v42  ;;  %1679 = vmatpush.msra.mxu0 %v1119_v43  ;;  %v962_v42 = vunpack.c.l.bf16 %v634_v38  ;;  %v880_v43 = vld [vmem:[#allocation19 + $0x7d0] sm:$0xff]  ;;  %v1299_v38 = vunpack.c.h.bf16 %v802_v32  ;;  %v645_v32 = vld [vmem:[#allocation19 + $0x78] sm:$0xff] }
 0x15d   :  { %1700 = vmatpush.msra.mxu1 %v958_v8  ;;  %v1454_v50 = vunpack.c.l.bf16 %v880_v43  ;;  %v1455_v51 = vunpack.c.h.bf16 %v880_v43  ;;  %v1456_v8 = vunpack.c.l.bf16 %v881_v1  ;;  %v640_v43 = vld [vmem:[#allocation19 + $0x50] sm:$0xff] }
 0x15e   :  { %1660 = vmatpush.msrb.mxu3 %v956_v48  ;;  %1680 = vmatpush.msra.mxu0 %v957_v49  ;;  %v1452_v48 = vunpack.c.l.bf16 %v879_v40  ;;  %v799_v49 = vld [vmem:[#allocation19 + $0x548] sm:$0xff]  ;;  %v722_v40 = vld [vmem:[#allocation19 + $0x2e0] sm:$0xff] }
 0x1d1   :  { %v523_v18 = vpop.f32.mrf.mxu1 }
 0x1d4   :  { %v496_v14 = vpop.f32.mrf.mxu0 }
 0x1da   :  { %v473_v15 = vpop.f32.mrf.mxu3 }
 0x1db   :  { %v497_v16 = vadd.f32 %v496_v14, %v473_v15  ;;  %v5213_v14 = vld [vmem:[#allocation18] ss:$0 sm:$0xff] }
 0x1dd   :  { %v526_v19 = vadd.f32 %v523_v18, %v497_v16 }
 0x1df   :  { %v530_v20 = vadd.f32 %v5212_v17, %v526_v19  ;;  %v877_v19 = vld [vmem:[#allocation19 + $0x7b8] sm:$0xff] }
 0x1e1   :  { %v531_v21 = vmax.f32 %v530_v20, 0.0 }
 0x1e3   :  { %5030 = vmatmul.msk.f32.vlgmr.msrb.gmra.mxu0 %vm327_vm3, %v531_v21  ;;  %v541_v22 = vrot.slane %v531_v21, 6  ;;  %v534_v23 = vrot.slane %v531_v21, 4  ;;  %v878_v21 = vld [vmem:[#allocation19 + $0x7c0] sm:$0xff] }
 0x1e4   :  { %1757 = vmatpush.msrb.mxu0 %v1447_v55  ;;  %v1450_v27 = vunpack.c.l.bf16 %v878_v21  ;;  %v1451_v28 = vunpack.c.h.bf16 %v878_v21  ;;  %v1293_v55 = vunpack.c.h.bf16 %v799_v49 }
 0x1e5   :  { %v543_v24 = vsel %vm221_vm1, 0.0, %v541_v22  ;;  %v536_v25 = vsel %vm439_vm4, 0.0, %v534_v23  ;;  %v796_v22 = vld [vmem:[#allocation19 + $0x530] sm:$0xff] }
 0x1e6   :  { %5028 = vmatmul.msk.f32.vlgmr.msra.gmra.mxu2 %vm327_vm3, %v543_v24  ;;  %5029 = vmatmul.msk.f32.vlgmr.msra.gmra.mxu3 %vm327_vm3, %v536_v25  ;;  %v1449_v24 = vunpack.c.h.bf16 %v877_v19  ;;  %v1448_v25 = vunpack.c.l.bf16 %v877_v19  ;;  %v1287_v30 = vunpack.c.h.bf16 %v796_v22  ;;  %v1286_v31 = vunpack.c.l.bf16 %v796_v22  ;;  %v638_v19 = vld [vmem:[#allocation19 + $0x40] sm:$0xff]  ;;  %v639_v22 = vld [vmem:[#allocation19 + $0x48] sm:$0xff] }
 0x1e7   :  { %1717 = vmatpush.msra.mxu2 %v1445_v52  ;;  %1737 = vmatpush.msra.mxu3 %v1446_v54  ;;  %v1291_v52 = vunpack.c.h.bf16 %v798_v46  ;;  %v1292_v54 = vunpack.c.l.bf16 %v799_v49  ;;  %v973_v29 = vunpack.c.h.bf16 %v639_v22  ;;  %v641_v46 = vld [vmem:[#allocation19 + $0x58] sm:$0xff]  ;;  %v975_v49 = vunpack.c.h.bf16 %v640_v43 }
 0x1e8   :  { %1758 = vmatpush.msrb.mxu0 %v1285_v63  ;;  %v1130_v63 = vunpack.c.l.bf16 %v718_v57 }
 0x1e9   :  { %1718 = vmatpush.msra.mxu2 %v1283_v59  ;;  %1738 = vmatpush.msra.mxu3 %v1284_v62  ;;  %v1129_v59 = vunpack.c.h.bf16 %v717_v56  ;;  %v637_v62 = vld [vmem:[#allocation19 + $0x38] sm:$0xff] }
 0x1ea   :  { %1759 = vmatpush.msrb.mxu0 %v1123_v6  ;;  %v969_v6 = vunpack.c.h.bf16 %v637_v62 }
 0x1eb   :  { %1719 = vmatpush.msra.mxu2 %v1121_v3  ;;  %1739 = vmatpush.msra.mxu3 %v1122_v5  ;;  %v966_v3 = vunpack.c.l.bf16 %v636_v58  ;;  %v968_v5 = vunpack.c.l.bf16 %v637_v62  ;;  %v805_v58 = vld [vmem:[#allocation19 + $0x578] sm:$0xff]  ;;  %v723_v62 = vld [vmem:[#allocation19 + $0x2e8] sm:$0xff] }
 0x1ec   :  { %1760 = vmatpush.msrb.mxu0 %v961_v10  ;;  %v1459_v10 = vunpack.c.h.bf16 %v882_v4 }
 0x1ed   :  { %1720 = vmatpush.msra.mxu2 %v959_v7  ;;  %1740 = vmatpush.msra.mxu3 %v960_v9  ;;  %v1457_v7 = vunpack.c.h.bf16 %v881_v1  ;;  %v1458_v9 = vunpack.c.l.bf16 %v882_v4  ;;  %v724_v1 = vld [vmem:[#allocation19 + $0x2f0] sm:$0xff]  ;;  %v642_v4 = vld [vmem:[#allocation19 + $0x60] sm:$0xff] }
 0x260   :  { %v619_v15 = vpop.f32.mrf.mxu0 }
 0x269   :  { %v569_v11 = vpop.f32.mrf.mxu2  ;;  %v592_v12 = vpop.f32.mrf.mxu3 }
 0x26a   :  { %v593_v13 = vadd.f32 %v592_v12, %v569_v11  ;;  %v800_v11 = vld [vmem:[#allocation19 + $0x550] sm:$0xff]  ;;  %v801_v12 = vld [vmem:[#allocation19 + $0x558] sm:$0xff] }
 0x26c   :  { %v622_v16 = vadd.f32 %v619_v15, %v593_v13  ;;  %v719_v13 = vld [vmem:[#allocation19 + $0x2c8] sm:$0xff]  ;;  %v1294_v15 = vunpack.c.l.bf16 %v800_v11 }
 0x26d   :  { %v1132_v21 = vunpack.c.l.bf16 %v719_v13 }
 0x26e   :  { %v626_v17 = vadd.f32 %v5213_v14, %v622_v16  ;;  %v1295_v14 = vunpack.c.h.bf16 %v800_v11  ;;  %v720_v16 = vld [vmem:[#allocation19 + $0x2d0] sm:$0xff]  ;;  %v978_v11 = vunpack.c.l.bf16 %v642_v4 }
 0x270   :  { %v627_v18 = vmax.f32 %v626_v17, 0.0  ;;  %v1296_v17 = vunpack.c.l.bf16 %v801_v12 }
 0x272   :  { %v628_v20 = vadd.f32 %v627_v18, %v5659_v61  ;;  %v1288_v61 = vunpack.c.l.bf16 %v797_v26  ;;  %v1297_v18 = vunpack.c.h.bf16 %v801_v12  ;;  %v971_v26 = vunpack.c.h.bf16 %v638_v19 }
 0x274   :  { %v5675_v23 = vmax.f32 %v628_v20, 0.0  ;;  %v1133_v20 = vunpack.c.h.bf16 %v719_v13 }
 0x276   :  { %5031 = vmatmul.msk.f32.vlgmr.msrb.gmra.mxu1 %vm327_vm3, %v5675_v23  ;;  %5032 = vmatmul.msk.f32.vlgmr.msrb.gmra.mxu2 %vm327_vm3, %v5675_v23 }
 0x277   :  { %5033 = vmatmul.msk.f32.vlgmr.msrb.gmra.mxu3 %vm327_vm3, %v5675_v23  ;;  %5034 = vmatmul.msk.f32.vlgmr.msra.gmra.mxu0 %vm327_vm3, %v5675_v23 }
 0x278   :  { %1797 = vmatpush.msrb.mxu2 %v1449_v24  ;;  %1777 = vmatpush.msrb.mxu1 %v1448_v25  ;;  %v1134_v24 = vunpack.c.l.bf16 %v720_v16  ;;  %v1135_v25 = vunpack.c.h.bf16 %v720_v16  ;;  %v806_v16 = vld [vmem:[#allocation19 + $0x580] sm:$0xff] }
 0x279   :  { %1817 = vmatpush.msrb.mxu3 %v1450_v27  ;;  %1837 = vmatpush.msra.mxu0 %v1451_v28  ;;  %v970_v27 = vunpack.c.l.bf16 %v638_v19  ;;  %v972_v28 = vunpack.c.l.bf16 %v639_v22  ;;  %v807_v19 = vld [vmem:[#allocation19 + $0x588] sm:$0xff]  ;;  %v725_v22 = vld [vmem:[#allocation19 + $0x2f8] sm:$0xff] }
 0x27a   :  { %1798 = vmatpush.msrb.mxu2 %v1287_v30  ;;  %1778 = vmatpush.msrb.mxu1 %v1286_v31  ;;  %v883_v30 = vld [vmem:[#allocation19 + $0x7e8] sm:$0xff]  ;;  %v884_v31 = vld [vmem:[#allocation19 + $0x7f0] sm:$0xff] }
 0x27b   :  { %1818 = vmatpush.msrb.mxu3 %v1288_v61  ;;  %1838 = vmatpush.msra.mxu0 %v1289_v33  ;;  %v1461_v61 = vunpack.c.h.bf16 %v883_v30  ;;  %v1460_v33 = vunpack.c.l.bf16 %v883_v30  ;;  %v1145_v30 = vunpack.c.h.bf16 %v725_v22 }
 0x27c   :  { %1799 = vmatpush.msrb.mxu2 %v1125_v34  ;;  %1779 = vmatpush.msrb.mxu1 %v1124_v35  ;;  %v803_v34 = vld [vmem:[#allocation19 + $0x568] sm:$0xff]  ;;  %v1462_v35 = vunpack.c.l.bf16 %v884_v31 }
 0x27d   :  { %1819 = vmatpush.msrb.mxu3 %v1126_v36  ;;  %1839 = vmatpush.msra.mxu0 %v1127_v37  ;;  %v1463_v36 = vunpack.c.h.bf16 %v884_v31  ;;  %v721_v37 = vld [vmem:[#allocation19 + $0x2d8] sm:$0xff]  ;;  %v1144_v31 = vunpack.c.l.bf16 %v725_v22 }
 0x27e   :  { %5035 = vmatmul.msk.f32.vlgmr.msra.gmra.mxu1 %vm327_vm3, %v5675_v23  ;;  %5036 = vmatmul.msk.f32.vlgmr.msra.gmra.mxu2 %vm327_vm3, %v5675_v23 }
 0x27f   :  { %5037 = vmatmul.msk.f32.vlgmr.msra.gmra.mxu3 %vm327_vm3, %v5675_v23  ;;  %5038 = vmatmul.msk.f32.vlgmr.msrb.gmra.mxu0 %vm327_vm3, %v5675_v23 }
 0x280   :  { %1800 = vmatpush.msrb.mxu2 %v963_v41  ;;  %1780 = vmatpush.msrb.mxu1 %v962_v42  ;;  %v1300_v41 = vunpack.c.l.bf16 %v803_v34  ;;  %v1301_v42 = vunpack.c.h.bf16 %v803_v34 }
 0x281   :  { %1820 = vmatpush.msrb.mxu3 %v964_v44  ;;  %1840 = vmatpush.msra.mxu0 %v965_v45  ;;  %v1137_v44 = vunpack.c.h.bf16 %v721_v37  ;;  %v1136_v45 = vunpack.c.l.bf16 %v721_v37  ;;  %v985_v37 = vunpack.c.h.bf16 %v645_v32 }
 0x282   :  { %1877 = vmatpush.msra.mxu2 %v1453_v47  ;;  %1857 = vmatpush.msra.mxu1 %v1452_v48  ;;  %v1138_v47 = vunpack.c.l.bf16 %v722_v40  ;;  %v1139_v48 = vunpack.c.h.bf16 %v722_v40  ;;  %v808_v40 = vld [vmem:[#allocation19 + $0x590] sm:$0xff] }
 0x283   :  { %1897 = vmatpush.msra.mxu3 %v1454_v50  ;;  %1917 = vmatpush.msrb.mxu0 %v1455_v51  ;;  %v974_v50 = vunpack.c.l.bf16 %v640_v43  ;;  %v976_v51 = vunpack.c.l.bf16 %v641_v46  ;;  %v809_v43 = vld [vmem:[#allocation19 + $0x598] sm:$0xff] }
 0x284   :  { %1878 = vmatpush.msra.mxu2 %v1291_v52  ;;  %1858 = vmatpush.msra.mxu1 %v1290_v53  ;;  %v977_v52 = vunpack.c.h.bf16 %v641_v46  ;;  %v885_v53 = vld [vmem:[#allocation19 + $0x7f8] sm:$0xff]  ;;  %v727_v46 = vld [vmem:[#allocation19 + $0x308] sm:$0xff] }
 0x285   :  { %1898 = vmatpush.msra.mxu3 %v1292_v54  ;;  %1918 = vmatpush.msrb.mxu0 %v1293_v55  ;;  %v886_v54 = vld [vmem:[#allocation19 + $0x800] sm:$0xff]  ;;  %v804_v55 = vld [vmem:[#allocation19 + $0x570] sm:$0xff]  ;;  %v1465_v56 = vunpack.c.h.bf16 %v885_v53  ;;  %v1464_v57 = vunpack.c.l.bf16 %v885_v53  ;;  %v1149_v53 = vunpack.c.h.bf16 %v727_v46 }
 0x286   :  { %5039 = vmatmul.msk.f32.vlgmr.msrb.gmra.mxu1 %vm327_vm3, %v5675_v23  ;;  %5040 = vmatmul.msk.f32.vlgmr.msrb.gmra.mxu2 %vm327_vm3, %v5675_v23 }
 0x287   :  { %5041 = vmatmul.msk.f32.vlgmr.msrb.gmra.mxu3 %vm327_vm3, %v5675_v23  ;;  %5042 = vmatmul.msk.f32.vlgmr.msra.gmra.mxu0 %vm327_vm3, %v5675_v23 }
 0x288   :  { %1879 = vmatpush.msra.mxu2 %v1129_v59  ;;  %1859 = vmatpush.msra.mxu1 %v1128_v60  ;;  %v1466_v59 = vunpack.c.l.bf16 %v886_v54  ;;  %v1467_v60 = vunpack.c.h.bf16 %v886_v54  ;;  %v1148_v54 = vunpack.c.l.bf16 %v727_v46 }
 0x289   :  { %1899 = vmatpush.msra.mxu3 %v1130_v63  ;;  %1919 = vmatpush.msrb.mxu0 %v1131_v0  ;;  %v1303_v63 = vunpack.c.h.bf16 %v804_v55  ;;  %v1302_v0 = vunpack.c.l.bf16 %v804_v55  ;;  %v647_v55 = vld [vmem:[#allocation19 + $0x88] sm:$0xff] }
 0x28a   :  { %1880 = vmatpush.msra.mxu2 %v967_v2  ;;  %1860 = vmatpush.msra.mxu1 %v966_v3  ;;  %v1304_v2 = vunpack.c.l.bf16 %v805_v58  ;;  %v1305_v3 = vunpack.c.h.bf16 %v805_v58 }
 0x28b   :  { %1900 = vmatpush.msra.mxu3 %v968_v5  ;;  %1920 = vmatpush.msrb.mxu0 %v969_v6  ;;  %v1141_v5 = vunpack.c.h.bf16 %v723_v62  ;;  %v1140_v6 = vunpack.c.l.bf16 %v723_v62  ;;  %v989_v62 = vunpack.c.h.bf16 %v647_v55 }
 0x28c   :  { %1957 = vmatpush.msrb.mxu2 %v1457_v7  ;;  %1937 = vmatpush.msrb.mxu1 %v1456_v8  ;;  %v643_v7 = vld [vmem:[#allocation19 + $0x68] sm:$0xff]  ;;  %v1142_v8 = vunpack.c.l.bf16 %v724_v1 }
 0x28d   :  { %1977 = vmatpush.msrb.mxu3 %v1458_v9  ;;  %1997 = vmatpush.msra.mxu0 %v1459_v10  ;;  %v1143_v9 = vunpack.c.h.bf16 %v724_v1  ;;  %v979_v10 = vunpack.c.h.bf16 %v642_v4  ;;  %v980_v12 = vunpack.c.l.bf16 %v643_v7  ;;  %v981_v13 = vunpack.c.h.bf16 %v643_v7  ;;  %v810_v1 = vld [vmem:[#allocation19 + $0x5a0] sm:$0xff]  ;;  %v811_v4 = vld [vmem:[#allocation19 + $0x5a8] sm:$0xff]  ;;  %v729_v7 = vld [vmem:[#allocation19 + $0x318] sm:$0xff] }
 0x28e   :  { %5043 = vmatmul.msk.f32.vlgmr.msra.gmra.mxu1 %vm327_vm3, %v5675_v23  ;;  %5044 = vmatmul.msk.f32.vlgmr.msra.gmra.mxu2 %vm327_vm3, %v5675_v23 }
 0x28f   :  { %5045 = vmatmul.msk.f32.vlgmr.msra.gmra.mxu3 %vm327_vm3, %v5675_v23  ;;  %5046 = vmatmul.msk.f32.vlgmr.msrb.gmra.mxu0 %vm327_vm3, %v5675_v23 }
 0x290   :  { %1958 = vmatpush.msrb.mxu2 %v1295_v14  ;;  %1938 = vmatpush.msrb.mxu1 %v1294_v15  ;;  %v887_v14 = vld [vmem:[#allocation19 + $0x808] sm:$0xff]  ;;  %v888_v15 = vld [vmem:[#allocation19 + $0x810] sm:$0xff] }
 0x291   :  { %1978 = vmatpush.msrb.mxu3 %v1296_v17  ;;  %1998 = vmatpush.msra.mxu0 %v1297_v18  ;;  %v1469_v17 = vunpack.c.h.bf16 %v887_v14  ;;  %v1468_v18 = vunpack.c.l.bf16 %v887_v14  ;;  %v1153_v14 = vunpack.c.h.bf16 %v729_v7 }
 0x292   :  { %1959 = vmatpush.msrb.mxu2 %v1133_v20  ;;  %1939 = vmatpush.msrb.mxu1 %v1132_v21  ;;  %v1470_v20 = vunpack.c.l.bf16 %v888_v15  ;;  %v1471_v21 = vunpack.c.h.bf16 %v888_v15  ;;  %v1152_v15 = vunpack.c.l.bf16 %v729_v7 }
 0x293   :  { %1979 = vmatpush.msrb.mxu3 %v1134_v24  ;;  %1999 = vmatpush.msra.mxu0 %v1135_v25  ;;  %v1307_v24 = vunpack.c.h.bf16 %v806_v16  ;;  %v1306_v25 = vunpack.c.l.bf16 %v806_v16  ;;  %v649_v16 = vld [vmem:[#allocation19 + $0x98] sm:$0xff] }
 0x294   :  { %1960 = vmatpush.msrb.mxu2 %v971_v26  ;;  %1940 = vmatpush.msrb.mxu1 %v970_v27  ;;  %v726_v26 = vld [vmem:[#allocation19 + $0x300] sm:$0xff]  ;;  %v1308_v27 = vunpack.c.l.bf16 %v807_v19  ;;  %v993_v22 = vunpack.c.h.bf16 %v649_v16 }
 0x295   :  { %1980 = vmatpush.msrb.mxu3 %v972_v28  ;;  %2000 = vmatpush.msra.mxu0 %v973_v29  ;;  %v1309_v28 = vunpack.c.h.bf16 %v807_v19  ;;  %v644_v29 = vld [vmem:[#allocation19 + $0x70] sm:$0xff] }
 0x296   :  { %5047 = vmatmul.msk.f32.vlgmr.msrb.gmra.mxu1 %vm327_vm3, %v5675_v23  ;;  %5048 = vmatmul.msk.f32.vlgmr.msrb.gmra.mxu2 %vm327_vm3, %v5675_v23  ;;  %v983_v34 = vunpack.c.h.bf16 %v644_v29 }
 0x297   :  { %5049 = vmatmul.msk.f32.vlgmr.msrb.gmra.mxu3 %vm327_vm3, %v5675_v23  ;;  %5050 = vmatmul.msk.f32.vlgmr.msra.gmra.mxu0 %vm327_vm3, %v5675_v23 }
 0x298   :  { %2037 = vmatpush.msra.mxu2 %v1461_v61  ;;  %2017 = vmatpush.msra.mxu1 %v1460_v33  ;;  %v1146_v61 = vunpack.c.l.bf16 %v726_v26  ;;  %v1147_v33 = vunpack.c.h.bf16 %v726_v26  ;;  %v812_v26 = vld [vmem:[#allocation19 + $0x5b0] sm:$0xff] }
 0x299   :  { %2057 = vmatpush.msra.mxu3 %v1462_v35  ;;  %2077 = vmatpush.msrb.mxu0 %v1463_v36  ;;  %v982_v35 = vunpack.c.l.bf16 %v644_v29  ;;  %v984_v36 = vunpack.c.l.bf16 %v645_v32  ;;  %v813_v29 = vld [vmem:[#allocation19 + $0x5b8] sm:$0xff]  ;;  %v731_v32 = vld [vmem:[#allocation19 + $0x328] sm:$0xff] }
 0x29a   :  { %2038 = vmatpush.msra.mxu2 %v1299_v38  ;;  %2018 = vmatpush.msra.mxu1 %v1298_v39  ;;  %v889_v38 = vld [vmem:[#allocation19 + $0x818] sm:$0xff]  ;;  %v890_v39 = vld [vmem:[#allocation19 + $0x820] sm:$0xff] }
 0x29b   :  { %2058 = vmatpush.msra.mxu3 %v1300_v41  ;;  %2078 = vmatpush.msrb.mxu0 %v1301_v42  ;;  %v1473_v41 = vunpack.c.h.bf16 %v889_v38  ;;  %v1472_v42 = vunpack.c.l.bf16 %v889_v38  ;;  %v1157_v38 = vunpack.c.h.bf16 %v731_v32 }
 0x29c   :  { %2039 = vmatpush.msra.mxu2 %v1137_v44  ;;  %2019 = vmatpush.msra.mxu1 %v1136_v45  ;;  %v1474_v44 = vunpack.c.l.bf16 %v890_v39  ;;  %v1475_v45 = vunpack.c.h.bf16 %v890_v39  ;;  %v1156_v39 = vunpack.c.l.bf16 %v731_v32 }
 0x29d   :  { %2059 = vmatpush.msra.mxu3 %v1138_v47  ;;  %2079 = vmatpush.msrb.mxu0 %v1139_v48  ;;  %v1311_v47 = vunpack.c.h.bf16 %v808_v40  ;;  %v1310_v48 = vunpack.c.l.bf16 %v808_v40  ;;  %v651_v40 = vld [vmem:[#allocation19 + $0xa8] sm:$0xff] }
 0x29e   :  { %2040 = vmatpush.msra.mxu2 %v975_v49  ;;  %2020 = vmatpush.msra.mxu1 %v974_v50  ;;  %v728_v49 = vld [vmem:[#allocation19 + $0x310] sm:$0xff]  ;;  %v1312_v50 = vunpack.c.l.bf16 %v809_v43  ;;  %v997_v46 = vunpack.c.h.bf16 %v651_v40 }
 0x29f   :  { %2060 = vmatpush.msra.mxu3 %v976_v51  ;;  %2080 = vmatpush.msrb.mxu0 %v977_v52  ;;  %v1313_v51 = vunpack.c.h.bf16 %v809_v43  ;;  %v646_v52 = vld [vmem:[#allocation19 + $0x80] sm:$0xff] }
 0x2a0   :  { %5051 = vmatmul.msk.f32.vlgmr.msra.gmra.mxu1 %vm327_vm3, %v5675_v23  ;;  %5052 = vmatmul.msk.f32.vlgmr.msra.gmra.mxu2 %vm327_vm3, %v5675_v23  ;;  %v987_v58 = vunpack.c.h.bf16 %v646_v52 }
 0x2a1   :  { %5053 = vmatmul.msk.f32.vlgmr.msra.gmra.mxu3 %vm327_vm3, %v5675_v23  ;;  %5054 = vmatmul.msk.f32.vlgmr.msrb.gmra.mxu0 %vm327_vm3, %v5675_v23 }
 0x2a2   :  { %2117 = vmatpush.msrb.mxu2 %v1465_v56  ;;  %2097 = vmatpush.msrb.mxu1 %v1464_v57  ;;  %v1150_v56 = vunpack.c.l.bf16 %v728_v49  ;;  %v1151_v57 = vunpack.c.h.bf16 %v728_v49  ;;  %v814_v49 = vld [vmem:[#allocation19 + $0x5c0] sm:$0xff] }
 0x2a3   :  { %2137 = vmatpush.msrb.mxu3 %v1466_v59  ;;  %2157 = vmatpush.msra.mxu0 %v1467_v60  ;;  %v986_v59 = vunpack.c.l.bf16 %v646_v52  ;;  %v988_v60 = vunpack.c.l.bf16 %v647_v55  ;;  %v815_v52 = vld [vmem:[#allocation19 + $0x5c8] sm:$0xff]  ;;  %v733_v55 = vld [vmem:[#allocation19 + $0x338] sm:$0xff] }
 0x2a4   :  { %2118 = vmatpush.msrb.mxu2 %v1303_v63  ;;  %2098 = vmatpush.msrb.mxu1 %v1302_v0  ;;  %v891_v63 = vld [vmem:[#allocation19 + $0x828] sm:$0xff]  ;;  %v892_v0 = vld [vmem:[#allocation19 + $0x830] sm:$0xff] }
 0x2a5   :  { %2138 = vmatpush.msrb.mxu3 %v1304_v2  ;;  %2158 = vmatpush.msra.mxu0 %v1305_v3  ;;  %v1477_v2 = vunpack.c.h.bf16 %v891_v63  ;;  %v1476_v3 = vunpack.c.l.bf16 %v891_v63  ;;  %v1161_v63 = vunpack.c.h.bf16 %v733_v55 }
 0x2a6   :  { %2119 = vmatpush.msrb.mxu2 %v1141_v5  ;;  %2099 = vmatpush.msrb.mxu1 %v1140_v6  ;;  %v1478_v5 = vunpack.c.l.bf16 %v892_v0  ;;  %v1479_v6 = vunpack.c.h.bf16 %v892_v0  ;;  %v1160_v0 = vunpack.c.l.bf16 %v733_v55 }
 0x2a7   :  { %2139 = vmatpush.msrb.mxu3 %v1142_v8  ;;  %2159 = vmatpush.msra.mxu0 %v1143_v9  ;;  %v1315_v8 = vunpack.c.h.bf16 %v810_v1  ;;  %v1314_v9 = vunpack.c.l.bf16 %v810_v1  ;;  %v653_v1 = vld [vmem:[#allocation19 + $0xb8] sm:$0xff] }
 0x2a8   :  { %2120 = vmatpush.msrb.mxu2 %v979_v10  ;;  %2100 = vmatpush.msrb.mxu1 %v978_v11  ;;  %v730_v10 = vld [vmem:[#allocation19 + $0x320] sm:$0xff]  ;;  %v1316_v11 = vunpack.c.l.bf16 %v811_v4  ;;  %v1001_v7 = vunpack.c.h.bf16 %v653_v1 }
 0x2a9   :  { %2140 = vmatpush.msrb.mxu3 %v980_v12  ;;  %2160 = vmatpush.msra.mxu0 %v981_v13  ;;  %v1317_v12 = vunpack.c.h.bf16 %v811_v4  ;;  %v648_v13 = vld [vmem:[#allocation19 + $0x90] sm:$0xff] }
 0x2aa   :  { %5055 = vmatmul.msk.f32.vlgmr.msrb.gmra.mxu1 %vm327_vm3, %v5675_v23  ;;  %5056 = vmatmul.msk.f32.vlgmr.msrb.gmra.mxu2 %vm327_vm3, %v5675_v23  ;;  %v991_v19 = vunpack.c.h.bf16 %v648_v13 }
 0x2ab   :  { %5057 = vmatmul.msk.f32.vlgmr.msrb.gmra.mxu3 %vm327_vm3, %v5675_v23  ;;  %5058 = vmatmul.msk.f32.vlgmr.msra.gmra.mxu0 %vm327_vm3, %v5675_v23 }
 0x2ac   :  { %2197 = vmatpush.msra.mxu2 %v1469_v17  ;;  %2177 = vmatpush.msra.mxu1 %v1468_v18  ;;  %v1154_v17 = vunpack.c.l.bf16 %v730_v10  ;;  %v1155_v18 = vunpack.c.h.bf16 %v730_v10  ;;  %v816_v10 = vld [vmem:[#allocation19 + $0x5d0] sm:$0xff] }
 0x2ad   :  { %2217 = vmatpush.msra.mxu3 %v1470_v20  ;;  %2237 = vmatpush.msrb.mxu0 %v1471_v21  ;;  %v990_v20 = vunpack.c.l.bf16 %v648_v13  ;;  %v992_v21 = vunpack.c.l.bf16 %v649_v16  ;;  %v817_v13 = vld [vmem:[#allocation19 + $0x5d8] sm:$0xff]  ;;  %v735_v16 = vld [vmem:[#allocation19 + $0x348] sm:$0xff] }
 0x2ae   :  { %2198 = vmatpush.msra.mxu2 %v1307_v24  ;;  %2178 = vmatpush.msra.mxu1 %v1306_v25  ;;  %v893_v24 = vld [vmem:[#allocation19 + $0x838] sm:$0xff]  ;;  %v894_v25 = vld [vmem:[#allocation19 + $0x840] sm:$0xff] }
 0x2af   :  { %2218 = vmatpush.msra.mxu3 %v1308_v27  ;;  %2238 = vmatpush.msrb.mxu0 %v1309_v28  ;;  %v1481_v27 = vunpack.c.h.bf16 %v893_v24  ;;  %v1480_v28 = vunpack.c.l.bf16 %v893_v24  ;;  %v1165_v24 = vunpack.c.h.bf16 %v735_v16 }
 0x2b0   :  { %2199 = vmatpush.msra.mxu2 %v1145_v30  ;;  %2179 = vmatpush.msra.mxu1 %v1144_v31  ;;  %v1482_v30 = vunpack.c.l.bf16 %v894_v25  ;;  %v1483_v31 = vunpack.c.h.bf16 %v894_v25  ;;  %v1164_v25 = vunpack.c.l.bf16 %v735_v16 }
 0x2b1   :  { %2219 = vmatpush.msra.mxu3 %v1146_v61  ;;  %2239 = vmatpush.msrb.mxu0 %v1147_v33  ;;  %v1319_v61 = vunpack.c.h.bf16 %v812_v26  ;;  %v1318_v33 = vunpack.c.l.bf16 %v812_v26  ;;  %v655_v26 = vld [vmem:[#allocation19 + $0xc8] sm:$0xff] }
 0x2b2   :  { %2200 = vmatpush.msra.mxu2 %v983_v34  ;;  %2180 = vmatpush.msra.mxu1 %v982_v35  ;;  %v732_v34 = vld [vmem:[#allocation19 + $0x330] sm:$0xff]  ;;  %v1320_v35 = vunpack.c.l.bf16 %v813_v29  ;;  %v1005_v32 = vunpack.c.h.bf16 %v655_v26 }
 0x2b3   :  { %2220 = vmatpush.msra.mxu3 %v984_v36  ;;  %2240 = vmatpush.msrb.mxu0 %v985_v37  ;;  %v1321_v36 = vunpack.c.h.bf16 %v813_v29  ;;  %v650_v37 = vld [vmem:[#allocation19 + $0xa0] sm:$0xff] }
 0x2b4   :  { %5059 = vmatmul.msk.f32.vlgmr.msra.gmra.mxu1 %vm327_vm3, %v5675_v23  ;;  %5060 = vmatmul.msk.f32.vlgmr.msra.gmra.mxu2 %vm327_vm3, %v5675_v23  ;;  %v995_v43 = vunpack.c.h.bf16 %v650_v37 }
 0x2b5   :  { %5061 = vmatmul.msk.f32.vlgmr.msra.gmra.mxu3 %vm327_vm3, %v5675_v23  ;;  %5062 = vmatmul.msk.f32.vlgmr.msrb.gmra.mxu0 %vm327_vm3, %v5675_v23 }
 0x2b6   :  { %2277 = vmatpush.msrb.mxu2 %v1473_v41  ;;  %2257 = vmatpush.msrb.mxu1 %v1472_v42  ;;  %v1158_v41 = vunpack.c.l.bf16 %v732_v34  ;;  %v1159_v42 = vunpack.c.h.bf16 %v732_v34  ;;  %v818_v34 = vld [vmem:[#allocation19 + $0x5e0] sm:$0xff] }
 0x2b7   :  { %2297 = vmatpush.msrb.mxu3 %v1474_v44  ;;  %2317 = vmatpush.msra.mxu0 %v1475_v45  ;;  %v994_v44 = vunpack.c.l.bf16 %v650_v37  ;;  %v996_v45 = vunpack.c.l.bf16 %v651_v40  ;;  %v819_v37 = vld [vmem:[#allocation19 + $0x5e8] sm:$0xff]  ;;  %v737_v40 = vld [vmem:[#allocation19 + $0x358] sm:$0xff] }
 0x2b8   :  { %2278 = vmatpush.msrb.mxu2 %v1311_v47  ;;  %2258 = vmatpush.msrb.mxu1 %v1310_v48  ;;  %v895_v47 = vld [vmem:[#allocation19 + $0x848] sm:$0xff]  ;;  %v896_v48 = vld [vmem:[#allocation19 + $0x850] sm:$0xff] }
 0x2b9   :  { %2298 = vmatpush.msrb.mxu3 %v1312_v50  ;;  %2318 = vmatpush.msra.mxu0 %v1313_v51  ;;  %v1485_v50 = vunpack.c.h.bf16 %v895_v47  ;;  %v1484_v51 = vunpack.c.l.bf16 %v895_v47  ;;  %v1169_v47 = vunpack.c.h.bf16 %v737_v40 }
 0x2ba   :  { %2279 = vmatpush.msrb.mxu2 %v1149_v53  ;;  %2259 = vmatpush.msrb.mxu1 %v1148_v54  ;;  %v1486_v53 = vunpack.c.l.bf16 %v896_v48  ;;  %v1487_v54 = vunpack.c.h.bf16 %v896_v48  ;;  %v1168_v48 = vunpack.c.l.bf16 %v737_v40 }
 0x2bb   :  { %2299 = vmatpush.msrb.mxu3 %v1150_v56  ;;  %2319 = vmatpush.msra.mxu0 %v1151_v57  ;;  %v1323_v56 = vunpack.c.h.bf16 %v814_v49  ;;  %v1322_v57 = vunpack.c.l.bf16 %v814_v49  ;;  %v657_v49 = vld [vmem:[#allocation19 + $0xd8] sm:$0xff] }
 0x2bc   :  { %2280 = vmatpush.msrb.mxu2 %v987_v58  ;;  %2260 = vmatpush.msrb.mxu1 %v986_v59  ;;  %v734_v58 = vld [vmem:[#allocation19 + $0x340] sm:$0xff]  ;;  %v1324_v59 = vunpack.c.l.bf16 %v815_v52  ;;  %v1009_v55 = vunpack.c.h.bf16 %v657_v49 }
 0x2bd   :  { %2300 = vmatpush.msrb.mxu3 %v988_v60  ;;  %2320 = vmatpush.msra.mxu0 %v989_v62  ;;  %v1325_v60 = vunpack.c.h.bf16 %v815_v52  ;;  %v652_v62 = vld [vmem:[#allocation19 + $0xb0] sm:$0xff] }
 0x2be   :  { %5063 = vmatmul.msk.f32.vlgmr.msrb.gmra.mxu1 %vm327_vm3, %v5675_v23  ;;  %5064 = vmatmul.msk.f32.vlgmr.msrb.gmra.mxu2 %vm327_vm3, %v5675_v23  ;;  %v999_v4 = vunpack.c.h.bf16 %v652_v62 }
 0x2bf   :  { %5065 = vmatmul.msk.f32.vlgmr.msrb.gmra.mxu3 %vm327_vm3, %v5675_v23  ;;  %5066 = vmatmul.msk.f32.vlgmr.msra.gmra.mxu0 %vm327_vm3, %v5675_v23 }
 0x2c0   :  { %2357 = vmatpush.msra.mxu2 %v1477_v2  ;;  %2337 = vmatpush.msra.mxu1 %v1476_v3  ;;  %v1162_v2 = vunpack.c.l.bf16 %v734_v58  ;;  %v1163_v3 = vunpack.c.h.bf16 %v734_v58  ;;  %v820_v58 = vld [vmem:[#allocation19 + $0x5f0] sm:$0xff] }
 0x2c1   :  { %2377 = vmatpush.msra.mxu3 %v1478_v5  ;;  %2397 = vmatpush.msrb.mxu0 %v1479_v6  ;;  %v998_v5 = vunpack.c.l.bf16 %v652_v62  ;;  %v1000_v6 = vunpack.c.l.bf16 %v653_v1  ;;  %v821_v62 = vld [vmem:[#allocation19 + $0x5f8] sm:$0xff]  ;;  %v739_v1 = vld [vmem:[#allocation19 + $0x368] sm:$0xff] }
 0x2c2   :  { %2358 = vmatpush.msra.mxu2 %v1315_v8  ;;  %2338 = vmatpush.msra.mxu1 %v1314_v9  ;;  %v897_v8 = vld [vmem:[#allocation19 + $0x858] sm:$0xff]  ;;  %v898_v9 = vld [vmem:[#allocation19 + $0x860] sm:$0xff] }
 0x2c3   :  { %2378 = vmatpush.msra.mxu3 %v1316_v11  ;;  %2398 = vmatpush.msrb.mxu0 %v1317_v12  ;;  %v1489_v11 = vunpack.c.h.bf16 %v897_v8  ;;  %v1488_v12 = vunpack.c.l.bf16 %v897_v8  ;;  %v1173_v8 = vunpack.c.h.bf16 %v739_v1 }
 0x2c4   :  { %2359 = vmatpush.msra.mxu2 %v1153_v14  ;;  %2339 = vmatpush.msra.mxu1 %v1152_v15  ;;  %v1490_v14 = vunpack.c.l.bf16 %v898_v9  ;;  %v1491_v15 = vunpack.c.h.bf16 %v898_v9  ;;  %v1172_v9 = vunpack.c.l.bf16 %v739_v1 }
 0x2c5   :  { %2379 = vmatpush.msra.mxu3 %v1154_v17  ;;  %2399 = vmatpush.msrb.mxu0 %v1155_v18  ;;  %v1327_v17 = vunpack.c.h.bf16 %v816_v10  ;;  %v1326_v18 = vunpack.c.l.bf16 %v816_v10  ;;  %v659_v10 = vld [vmem:[#allocation19 + $0xe8] sm:$0xff] }
 0x2c6   :  { %2360 = vmatpush.msra.mxu2 %v991_v19  ;;  %2340 = vmatpush.msra.mxu1 %v990_v20  ;;  %v736_v19 = vld [vmem:[#allocation19 + $0x350] sm:$0xff]  ;;  %v1328_v20 = vunpack.c.l.bf16 %v817_v13 }
 0x2c7   :  { %2380 = vmatpush.msra.mxu3 %v992_v21  ;;  %2400 = vmatpush.msrb.mxu0 %v993_v22  ;;  %v1329_v21 = vunpack.c.h.bf16 %v817_v13  ;;  %v654_v22 = vld [vmem:[#allocation19 + $0xc0] sm:$0xff] }
 0x2c8   :  { %5067 = vmatmul.msk.f32.vlgmr.msra.gmra.mxu1 %vm327_vm3, %v5675_v23  ;;  %5068 = vmatmul.msk.f32.vlgmr.msra.gmra.mxu2 %vm327_vm3, %v5675_v23  ;;  %v1003_v29 = vunpack.c.h.bf16 %v654_v22 }
 0x2c9   :  { %5069 = vmatmul.msk.f32.vlgmr.msra.gmra.mxu3 %vm327_vm3, %v5675_v23  ;;  %5070 = vmatmul.msk.f32.vlgmr.msrb.gmra.mxu0 %vm327_vm3, %v5675_v23 }
 0x2ca   :  { %2437 = vmatpush.msrb.mxu2 %v1481_v27  ;;  %2417 = vmatpush.msrb.mxu1 %v1480_v28  ;;  %v1166_v27 = vunpack.c.l.bf16 %v736_v19  ;;  %v1167_v28 = vunpack.c.h.bf16 %v736_v19  ;;  %v903_v19 = vld [vmem:[#allocation19 + $0x888] sm:$0xff] }
 0x2cb   :  { %2457 = vmatpush.msrb.mxu3 %v1482_v30  ;;  %2477 = vmatpush.msra.mxu0 %v1483_v31  ;;  %v1002_v30 = vunpack.c.l.bf16 %v654_v22  ;;  %v1004_v31 = vunpack.c.l.bf16 %v655_v26  ;;  %v1501_v22 = vunpack.c.h.bf16 %v903_v19 }
 0x2cc   :  { %2438 = vmatpush.msrb.mxu2 %v1319_v61  ;;  %2418 = vmatpush.msrb.mxu1 %v1318_v33  ;;  %v899_v61 = vld [vmem:[#allocation19 + $0x868] sm:$0xff]  ;;  %v900_v33 = vld [vmem:[#allocation19 + $0x870] sm:$0xff] }
 0x2cd   :  { %2458 = vmatpush.msrb.mxu3 %v1320_v35  ;;  %2478 = vmatpush.msra.mxu0 %v1321_v36  ;;  %v1493_v35 = vunpack.c.h.bf16 %v899_v61  ;;  %v1492_v36 = vunpack.c.l.bf16 %v899_v61 }
 0x2ce   :  { %2439 = vmatpush.msrb.mxu2 %v1157_v38  ;;  %2419 = vmatpush.msrb.mxu1 %v1156_v39  ;;  %v1494_v38 = vunpack.c.l.bf16 %v900_v33  ;;  %v1495_v39 = vunpack.c.h.bf16 %v900_v33 }
 0x2cf   :  { %2459 = vmatpush.msrb.mxu3 %v1158_v41  ;;  %2479 = vmatpush.msra.mxu0 %v1159_v42  ;;  %v1331_v41 = vunpack.c.h.bf16 %v818_v34  ;;  %v1330_v42 = vunpack.c.l.bf16 %v818_v34 }
 0x2d0   :  { %2440 = vmatpush.msrb.mxu2 %v995_v43  ;;  %2420 = vmatpush.msrb.mxu1 %v994_v44  ;;  %v738_v43 = vld [vmem:[#allocation19 + $0x360] sm:$0xff]  ;;  %v1332_v44 = vunpack.c.l.bf16 %v819_v37 }
 0x2d1   :  { %2460 = vmatpush.msrb.mxu3 %v996_v45  ;;  %2480 = vmatpush.msra.mxu0 %v997_v46  ;;  %v1333_v45 = vunpack.c.h.bf16 %v819_v37  ;;  %v656_v46 = vld [vmem:[#allocation19 + $0xd0] sm:$0xff] }
 0x2d2   :  { %5071 = vmatmul.msk.f32.vlgmr.msrb.gmra.mxu1 %vm327_vm3, %v5675_v23  ;;  %5072 = vmatmul.msk.f32.vlgmr.msrb.gmra.mxu2 %vm327_vm3, %v5675_v23  ;;  %v1007_v52 = vunpack.c.h.bf16 %v656_v46 }
 0x2d3   :  { %5073 = vmatmul.msk.f32.vlgmr.msrb.gmra.mxu3 %vm327_vm3, %v5675_v23  ;;  %5074 = vmatmul.msk.f32.vlgmr.msra.gmra.mxu0 %vm327_vm3, %v5675_v23 }
 0x2d4   :  { %2517 = vmatpush.msra.mxu2 %v1485_v50  ;;  %2497 = vmatpush.msra.mxu1 %v1484_v51  ;;  %v1170_v50 = vunpack.c.l.bf16 %v738_v43  ;;  %v1171_v51 = vunpack.c.h.bf16 %v738_v43 }
 0x2d5   :  { %2537 = vmatpush.msra.mxu3 %v1486_v53  ;;  %2557 = vmatpush.msrb.mxu0 %v1487_v54  ;;  %v1006_v53 = vunpack.c.l.bf16 %v656_v46  ;;  %v1008_v54 = vunpack.c.l.bf16 %v657_v49  ;;  %v824_v49 = vld [vmem:[#allocation19 + $0x610] sm:$0xff] }
 0x2d6   :  { %2518 = vmatpush.msra.mxu2 %v1323_v56  ;;  %2498 = vmatpush.msra.mxu1 %v1322_v57  ;;  %v901_v56 = vld [vmem:[#allocation19 + $0x878] sm:$0xff]  ;;  %v902_v57 = vld [vmem:[#allocation19 + $0x880] sm:$0xff] }
 0x2d7   :  { %2538 = vmatpush.msra.mxu3 %v1324_v59  ;;  %2558 = vmatpush.msrb.mxu0 %v1325_v60  ;;  %v1497_v59 = vunpack.c.h.bf16 %v901_v56  ;;  %v1496_v60 = vunpack.c.l.bf16 %v901_v56 }
 0x2d8   :  { %2519 = vmatpush.msra.mxu2 %v1161_v63  ;;  %2499 = vmatpush.msra.mxu1 %v1160_v0  ;;  %v1498_v63 = vunpack.c.l.bf16 %v902_v57  ;;  %v1499_v0 = vunpack.c.h.bf16 %v902_v57  ;;  %v743_v57 = vld [vmem:[#allocation19 + $0x388] sm:$0xff] }
 0x2d9   :  { %2539 = vmatpush.msra.mxu3 %v1162_v2  ;;  %2559 = vmatpush.msrb.mxu0 %v1163_v3  ;;  %v1335_v2 = vunpack.c.h.bf16 %v820_v58  ;;  %v1334_v3 = vunpack.c.l.bf16 %v820_v58 }
 0x2da   :  { %2520 = vmatpush.msra.mxu2 %v999_v4  ;;  %2500 = vmatpush.msra.mxu1 %v998_v5  ;;  %v740_v4 = vld [vmem:[#allocation19 + $0x370] sm:$0xff]  ;;  %v1336_v5 = vunpack.c.l.bf16 %v821_v62 }
 0x2db   :  { %2540 = vmatpush.msra.mxu3 %v1000_v6  ;;  %2560 = vmatpush.msrb.mxu0 %v1001_v7  ;;  %v1337_v6 = vunpack.c.h.bf16 %v821_v62  ;;  %v658_v7 = vld [vmem:[#allocation19 + $0xe0] sm:$0xff]  ;;  %v744_v62 = vld [vmem:[#allocation19 + $0x390] sm:$0xff] }
 0x2dc   :  { %5075 = vmatmul.msk.f32.vlgmr.msra.gmra.mxu1 %vm327_vm3, %v5675_v23  ;;  %5076 = vmatmul.msk.f32.vlgmr.msra.gmra.mxu2 %vm327_vm3, %v5675_v23 }
 0x2dd   :  { %5077 = vmatmul.msk.f32.vlgmr.msra.gmra.mxu3 %vm327_vm3, %v5675_v23  ;;  %5078 = vmatmul.msk.f32.vlgmr.msrb.gmra.mxu0 %vm327_vm3, %v5675_v23 }
 0x2de   :  { %2597 = vmatpush.msrb.mxu2 %v1489_v11  ;;  %2577 = vmatpush.msrb.mxu1 %v1488_v12  ;;  %v1174_v11 = vunpack.c.l.bf16 %v740_v4  ;;  %v1175_v12 = vunpack.c.h.bf16 %v740_v4  ;;  %v1180_v4 = vunpack.c.l.bf16 %v743_v57 }
 0x2df   :  { %2617 = vmatpush.msrb.mxu3 %v1490_v14  ;;  %2637 = vmatpush.msra.mxu0 %v1491_v15  ;;  %v1011_v14 = vunpack.c.h.bf16 %v658_v7  ;;  %v1010_v15 = vunpack.c.l.bf16 %v658_v7  ;;  %v1183_v7 = vunpack.c.h.bf16 %v744_v62 }
 0x2e0   :  { %2598 = vmatpush.msrb.mxu2 %v1327_v17  ;;  %2578 = vmatpush.msrb.mxu1 %v1326_v18  ;;  %v1012_v17 = vunpack.c.l.bf16 %v659_v10  ;;  %v1013_v18 = vunpack.c.h.bf16 %v659_v10 }
 0x2e1   :  { %2618 = vmatpush.msrb.mxu3 %v1328_v20  ;;  %2638 = vmatpush.msra.mxu0 %v1329_v21  ;;  %v904_v20 = vld [vmem:[#allocation19 + $0x890] sm:$0xff]  ;;  %v822_v21 = vld [vmem:[#allocation19 + $0x600] sm:$0xff] }
 0x2e2   :  { %2599 = vmatpush.msrb.mxu2 %v1165_v24  ;;  %2579 = vmatpush.msrb.mxu1 %v1164_v25  ;;  %v1500_v24 = vunpack.c.l.bf16 %v903_v19  ;;  %v823_v25 = vld [vmem:[#allocation19 + $0x608] sm:$0xff]  ;;  %v1502_v26 = vunpack.c.l.bf16 %v904_v20 }
 0x2e3   :  { %2619 = vmatpush.msrb.mxu3 %v1166_v27  ;;  %2639 = vmatpush.msra.mxu0 %v1167_v28  ;;  %v1503_v27 = vunpack.c.h.bf16 %v904_v20  ;;  %v741_v28 = vld [vmem:[#allocation19 + $0x378] sm:$0xff]  ;;  %v1340_v33 = vunpack.c.l.bf16 %v823_v25  ;;  %v1341_v34 = vunpack.c.h.bf16 %v823_v25  ;;  %v827_v20 = vld [vmem:[#allocation19 + $0x628] sm:$0xff] }
 0x2e4   :  { %2600 = vmatpush.msrb.mxu2 %v1003_v29  ;;  %2580 = vmatpush.msrb.mxu1 %v1002_v30  ;;  %v1339_v30 = vunpack.c.h.bf16 %v822_v21  ;;  %v1177_v37 = vunpack.c.h.bf16 %v741_v28  ;;  %v745_v25 = vld [vmem:[#allocation19 + $0x398] sm:$0xff] }
 0x2e5   :  { %2620 = vmatpush.msrb.mxu3 %v1004_v31  ;;  %2640 = vmatpush.msra.mxu0 %v1005_v32  ;;  %v1338_v31 = vunpack.c.l.bf16 %v822_v21  ;;  %v742_v32 = vld [vmem:[#allocation19 + $0x380] sm:$0xff] }
 0x2e6   :  { %5079 = vmatmul.msk.f32.vlgmr.msrb.gmra.mxu1 %vm327_vm3, %v5675_v23  ;;  %5080 = vmatmul.msk.f32.vlgmr.msrb.gmra.mxu2 %vm327_vm3, %v5675_v23 }
 0x2e7   :  { %5081 = vmatmul.msk.f32.vlgmr.msrb.gmra.mxu3 %vm327_vm3, %v5675_v23  ;;  %5082 = vmatmul.msk.f32.vlgmr.msra.gmra.mxu0 %vm327_vm3, %v5675_v23 }
 0x2e8   :  { %2677 = vmatpush.msra.mxu2 %v1493_v35  ;;  %2657 = vmatpush.msra.mxu1 %v1492_v36  ;;  %v660_v35 = vld [vmem:[#allocation19 + $0xf0] sm:$0xff] }
 0x2e9   :  { %2697 = vmatpush.msra.mxu3 %v1494_v38  ;;  %2717 = vmatpush.msrb.mxu0 %v1495_v39  ;;  %v1176_v38 = vunpack.c.l.bf16 %v741_v28  ;;  %v661_v39 = vld [vmem:[#allocation19 + $0xf8] sm:$0xff]  ;;  %v1015_v43 = vunpack.c.h.bf16 %v660_v35  ;;  %v746_v28 = vld [vmem:[#allocation19 + $0x3a0] sm:$0xff] }
 0x2ea   :  { %2678 = vmatpush.msra.mxu2 %v1331_v41  ;;  %2658 = vmatpush.msra.mxu1 %v1330_v42  ;;  %v1178_v41 = vunpack.c.l.bf16 %v742_v32  ;;  %v1179_v42 = vunpack.c.h.bf16 %v742_v32  ;;  %v1017_v46 = vunpack.c.h.bf16 %v661_v39  ;;  %v1185_v32 = vunpack.c.h.bf16 %v745_v25 }
 0x2eb   :  { %2698 = vmatpush.msra.mxu3 %v1332_v44  ;;  %2718 = vmatpush.msrb.mxu0 %v1333_v45  ;;  %v1014_v44 = vunpack.c.l.bf16 %v660_v35  ;;  %v1016_v45 = vunpack.c.l.bf16 %v661_v39  ;;  %v1187_v35 = vunpack.c.h.bf16 %v746_v28 }
 0x2ec   :  { %2679 = vmatpush.msra.mxu2 %v1169_v47  ;;  %2659 = vmatpush.msra.mxu1 %v1168_v48  ;;  %v905_v47 = vld [vmem:[#allocation19 + $0x898] sm:$0xff]  ;;  %v906_v48 = vld [vmem:[#allocation19 + $0x8a0] sm:$0xff] }
 0x2ed   :  { %2699 = vmatpush.msra.mxu3 %v1170_v50  ;;  %2719 = vmatpush.msrb.mxu0 %v1171_v51  ;;  %v1505_v51 = vunpack.c.h.bf16 %v905_v47  ;;  %v1507_v56 = vunpack.c.h.bf16 %v906_v48 }
 0x2ee   :  { %2680 = vmatpush.msra.mxu2 %v1007_v52  ;;  %2660 = vmatpush.msra.mxu1 %v1006_v53  ;;  %v1504_v52 = vunpack.c.l.bf16 %v905_v47  ;;  %v825_v53 = vld [vmem:[#allocation19 + $0x618] sm:$0xff] }
 0x2ef   :  { %2700 = vmatpush.msra.mxu3 %v1008_v54  ;;  %2720 = vmatpush.msrb.mxu0 %v1009_v55  ;;  %v1506_v55 = vunpack.c.l.bf16 %v906_v48  ;;  %v1345_v1 = vunpack.c.h.bf16 %v825_v53 }
 0x2f0   :  { %5083 = vmatmul.msk.f32.vlgmr.msra.gmra.mxu1 %vm327_vm3, %v5675_v23  ;;  %5084 = vmatmul.msk.f32.vlgmr.msra.gmra.mxu2 %vm327_vm3, %v5675_v23 }
 0x2f1   :  { %5085 = vmatmul.msk.f32.vlgmr.msra.gmra.mxu3 %vm327_vm3, %v5675_v23  ;;  %5086 = vmatmul.msk.f32.vlgmr.msrb.gmra.mxu0 %vm327_vm3, %v5675_v23 }
 0x2f2   :  { %2757 = vmatpush.msrb.mxu2 %v1497_v59  ;;  %2737 = vmatpush.msrb.mxu1 %v1496_v60  ;;  %v1343_v59 = vunpack.c.h.bf16 %v824_v49  ;;  %v1342_v60 = vunpack.c.l.bf16 %v824_v49  ;;  %v829_v49 = vld [vmem:[#allocation19 + $0x638] sm:$0xff] }
 0x2f3   :  { %2777 = vmatpush.msrb.mxu3 %v1498_v63  ;;  %2797 = vmatpush.msra.mxu0 %v1499_v0  ;;  %v1622_v13 = vpop.f32.mrf.mxu1  ;;  %v1344_v0 = vunpack.c.l.bf16 %v825_v53 }
 0x2f4   :  { %2758 = vmatpush.msrb.mxu2 %v1335_v2  ;;  %2738 = vmatpush.msrb.mxu1 %v1334_v3  ;;  %4845 = vst [vmem:[%s6499_s12] sm:$0xff] %v1622_v13  ;;  %v1682_v16 = vpop.f32.mrf.mxu0  ;;  %v662_v2 = vld [vmem:[#allocation19 + $0x100] sm:$0xff]  ;;  %v1181_v3 = vunpack.c.h.bf16 %v743_v57  ;;  %v1353_v57 = vunpack.c.h.bf16 %v829_v49 }
 0x2f5   :  { %2778 = vmatpush.msrb.mxu3 %v1336_v5  ;;  %2798 = vmatpush.msra.mxu0 %v1337_v6  ;;  %4848 = vst [vmem:[%s6499_s12 + $0x18] sm:$0xff] %v1682_v16  ;;  %v663_v5 = vld [vmem:[#allocation19 + $0x108] sm:$0xff]  ;;  %v1182_v6 = vunpack.c.l.bf16 %v744_v62  ;;  %v826_v16 = vld [vmem:[#allocation19 + $0x620] sm:$0xff] }
 0x2f6   :  { %2759 = vmatpush.msrb.mxu2 %v1173_v8  ;;  %2739 = vmatpush.msrb.mxu1 %v1172_v9  ;;  %v1019_v8 = vunpack.c.h.bf16 %v662_v2  ;;  %v1018_v9 = vunpack.c.l.bf16 %v662_v2  ;;  %v1020_v10 = vunpack.c.l.bf16 %v663_v5  ;;  %v667_v62 = vld [vmem:[#allocation19 + $0x128] sm:$0xff] }
 0x2f7   :  { %2779 = vmatpush.msrb.mxu3 %v1174_v11  ;;  %2799 = vmatpush.msra.mxu0 %v1175_v12  ;;  %v1021_v11 = vunpack.c.h.bf16 %v663_v5  ;;  %v907_v12 = vld [vmem:[#allocation19 + $0x8a8] sm:$0xff]  ;;  %v1028_v5 = vunpack.c.l.bf16 %v667_v62 }
 0x2f8   :  { %2760 = vmatpush.msrb.mxu2 %v1011_v14  ;;  %2740 = vmatpush.msrb.mxu1 %v1010_v15  ;;  %v908_v14 = vld [vmem:[#allocation19 + $0x8b0] sm:$0xff]  ;;  %v1508_v19 = vunpack.c.l.bf16 %v907_v12 }
 0x2f9   :  { %2780 = vmatpush.msrb.mxu3 %v1012_v17  ;;  %2800 = vmatpush.msra.mxu0 %v1013_v18  ;;  %v1642_v29 = vpop.f32.mrf.mxu2  ;;  %v1509_v18 = vunpack.c.h.bf16 %v907_v12 }
 0x2fa   :  { %5087 = vmatmul.msk.f32.vlgmr.msrb.gmra.mxu1 %vm327_vm3, %v5675_v23  ;;  %5088 = vmatmul.msk.f32.vlgmr.msrb.gmra.mxu2 %vm327_vm3, %v5675_v23  ;;  %4846 = vst [vmem:[%s6499_s12 + $0x8] sm:$0xff] %v1642_v29  ;;  %v1662_v61 = vpop.f32.mrf.mxu3  ;;  %v1348_v29 = vunpack.c.l.bf16 %v827_v20 }
 0x2fb   :  { %5089 = vmatmul.msk.f32.vlgmr.msrb.gmra.mxu3 %vm327_vm3, %v5675_v23  ;;  %5090 = vmatmul.msk.f32.vlgmr.msra.gmra.mxu0 %vm327_vm3, %v5675_v23  ;;  %4847 = vst [vmem:[%s6499_s12 + $0x10] sm:$0xff] %v1662_v61  ;;  %v1702_v36 = vpop.f32.mrf.mxu1  ;;  %v1184_v61 = vunpack.c.l.bf16 %v745_v25 }
 0x2fc   :  { %2837 = vmatpush.msra.mxu2 %v1501_v22  ;;  %2817 = vmatpush.msra.mxu1 %v1500_v24  ;;  %4849 = vst [vmem:[%s6499_s12 + $0x20] sm:$0xff] %v1702_v36  ;;  %v1762_v40 = vpop.f32.mrf.mxu0  ;;  %v1510_v22 = vunpack.c.l.bf16 %v908_v14  ;;  %v1511_v24 = vunpack.c.h.bf16 %v908_v14  ;;  %v831_v14 = vld [vmem:[#allocation19 + $0x648] sm:$0xff] }
 0x2fd   :  { %2857 = vmatpush.msra.mxu3 %v1502_v26  ;;  %2877 = vmatpush.msrb.mxu0 %v1503_v27  ;;  %4852 = vst [vmem:[%s6499_s12 + $0x38] sm:$0xff] %v1762_v40  ;;  %v1347_v26 = vunpack.c.h.bf16 %v826_v16  ;;  %v1346_v27 = vunpack.c.l.bf16 %v826_v16 }
 0x2fe   :  { %2838 = vmatpush.msra.mxu2 %v1339_v30  ;;  %2818 = vmatpush.msra.mxu1 %v1338_v31  ;;  %v1349_v30 = vunpack.c.h.bf16 %v827_v20  ;;  %v664_v31 = vld [vmem:[#allocation19 + $0x110] sm:$0xff]  ;;  %v750_v20 = vld [vmem:[#allocation19 + $0x3c0] sm:$0xff] }
 0x2ff   :  { %2858 = vmatpush.msra.mxu3 %v1340_v33  ;;  %2878 = vmatpush.msrb.mxu0 %v1341_v34  ;;  %v665_v33 = vld [vmem:[#allocation19 + $0x118] sm:$0xff]  ;;  %v1186_v34 = vunpack.c.l.bf16 %v746_v28 }
 0x300   :  { %2839 = vmatpush.msra.mxu2 %v1177_v37  ;;  %2819 = vmatpush.msra.mxu1 %v1176_v38  ;;  %v1023_v37 = vunpack.c.h.bf16 %v664_v31  ;;  %v1022_v38 = vunpack.c.l.bf16 %v664_v31  ;;  %v1024_v40 = vunpack.c.l.bf16 %v665_v33  ;;  %v1195_v31 = vunpack.c.h.bf16 %v750_v20 }
 0x301   :  { %2859 = vmatpush.msra.mxu3 %v1178_v41  ;;  %2879 = vmatpush.msrb.mxu0 %v1179_v42  ;;  %v1722_v50 = vpop.f32.mrf.mxu2  ;;  %v1025_v41 = vunpack.c.h.bf16 %v665_v33  ;;  %v909_v42 = vld [vmem:[#allocation19 + $0x8b8] sm:$0xff] }
 0x302   :  { %2840 = vmatpush.msra.mxu2 %v1015_v43  ;;  %2820 = vmatpush.msra.mxu1 %v1014_v44  ;;  %4850 = vst [vmem:[%s6499_s12 + $0x28] sm:$0xff] %v1722_v50  ;;  %v1742_v54 = vpop.f32.mrf.mxu3  ;;  %v910_v44 = vld [vmem:[#allocation19 + $0x8c0] sm:$0xff]  ;;  %v1513_v47 = vunpack.c.h.bf16 %v909_v42  ;;  %v1512_v48 = vunpack.c.l.bf16 %v909_v42  ;;  %v833_v42 = vld [vmem:[#allocation19 + $0x658] sm:$0xff] }
 0x303   :  { %2860 = vmatpush.msra.mxu3 %v1016_v45  ;;  %2880 = vmatpush.msrb.mxu0 %v1017_v46  ;;  %4851 = vst [vmem:[%s6499_s12 + $0x30] sm:$0xff] %v1742_v54  ;;  %v1782_v58 = vpop.f32.mrf.mxu1  ;;  %v828_v46 = vld [vmem:[#allocation19 + $0x630] sm:$0xff]  ;;  %v1514_v50 = vunpack.c.l.bf16 %v910_v44 }
 0x304   :  { %5091 = vmatmul.msk.f32.vlgmr.msra.gmra.mxu1 %vm327_vm3, %v5675_v23  ;;  %5092 = vmatmul.msk.f32.vlgmr.msra.gmra.mxu2 %vm327_vm3, %v5675_v23  ;;  %4853 = vst [vmem:[%s6499_s12 + $0x40] sm:$0xff] %v1782_v58  ;;  %v1842_v63 = vpop.f32.mrf.mxu0  ;;  %v1351_v53 = vunpack.c.h.bf16 %v828_v46  ;;  %v1350_v54 = vunpack.c.l.bf16 %v828_v46  ;;  %v666_v58 = vld [vmem:[#allocation19 + $0x120] sm:$0xff] }
 0x305   :  { %5093 = vmatmul.msk.f32.vlgmr.msra.gmra.mxu3 %vm327_vm3, %v5675_v23  ;;  %5094 = vmatmul.msk.f32.vlgmr.msrb.gmra.mxu0 %vm327_vm3, %v5675_v23  ;;  %4856 = vst [vmem:[%s6499_s12 + $0x58] sm:$0xff] %v1842_v63 }
 0x306   :  { %2917 = vmatpush.msrb.mxu2 %v1505_v51  ;;  %2897 = vmatpush.msrb.mxu1 %v1504_v52  ;;  %v1515_v51 = vunpack.c.h.bf16 %v910_v44  ;;  %v747_v52 = vld [vmem:[#allocation19 + $0x3a8] sm:$0xff] }
 0x307   :  { %2937 = vmatpush.msrb.mxu3 %v1506_v55  ;;  %2957 = vmatpush.msra.mxu0 %v1507_v56  ;;  %v748_v55 = vld [vmem:[#allocation19 + $0x3b0] sm:$0xff]  ;;  %v1352_v56 = vunpack.c.l.bf16 %v829_v49  ;;  %v1360_v49 = vunpack.c.l.bf16 %v833_v42 }
 0x308   :  { %2918 = vmatpush.msrb.mxu2 %v1343_v59  ;;  %2898 = vmatpush.msrb.mxu1 %v1342_v60  ;;  %v1189_v59 = vunpack.c.h.bf16 %v747_v52  ;;  %v1188_v60 = vunpack.c.l.bf16 %v747_v52  ;;  %v1191_v2 = vunpack.c.h.bf16 %v748_v55 }
 0x309   :  { %2938 = vmatpush.msrb.mxu3 %v1344_v0  ;;  %2958 = vmatpush.msra.mxu0 %v1345_v1  ;;  %v1802_v13 = vpop.f32.mrf.mxu2  ;;  %v1190_v1 = vunpack.c.l.bf16 %v748_v55 }
 0x30a   :  { %2919 = vmatpush.msrb.mxu2 %v1181_v3  ;;  %2899 = vmatpush.msrb.mxu1 %v1180_v4  ;;  %4854 = vst [vmem:[%s6499_s12 + $0x48] sm:$0xff] %v1802_v13  ;;  %v1822_v15 = vpop.f32.mrf.mxu3  ;;  %v1027_v3 = vunpack.c.h.bf16 %v666_v58  ;;  %v1026_v4 = vunpack.c.l.bf16 %v666_v58 }
 0x30b   :  { %2939 = vmatpush.msrb.mxu3 %v1182_v6  ;;  %2959 = vmatpush.msra.mxu0 %v1183_v7  ;;  %4855 = vst [vmem:[%s6499_s12 + $0x50] sm:$0xff] %v1822_v15  ;;  %v1862_v17 = vpop.f32.mrf.mxu1  ;;  %v1029_v6 = vunpack.c.h.bf16 %v667_v62  ;;  %v911_v7 = vld [vmem:[#allocation19 + $0x8c8] sm:$0xff] }
 0x30c   :  { %2920 = vmatpush.msrb.mxu2 %v1019_v8  ;;  %2900 = vmatpush.msrb.mxu1 %v1018_v9  ;;  %4857 = vst [vmem:[%s6499_s12 + $0x60] sm:$0xff] %v1862_v17  ;;  %v1922_v21 = vpop.f32.mrf.mxu0  ;;  %v912_v9 = vld [vmem:[#allocation19 + $0x8d0] sm:$0xff]  ;;  %v1517_v12 = vunpack.c.h.bf16 %v911_v7  ;;  %v1516_v13 = vunpack.c.l.bf16 %v911_v7  ;;  %v749_v17 = vld [vmem:[#allocation19 + $0x3b8] sm:$0xff]  ;;  %v835_v7 = vld [vmem:[#allocation19 + $0x668] sm:$0xff] }
 0x30d   :  { %2940 = vmatpush.msrb.mxu3 %v1020_v10  ;;  %2960 = vmatpush.msra.mxu0 %v1021_v11  ;;  %4860 = vst [vmem:[%s6499_s12 + $0x78] sm:$0xff] %v1922_v21  ;;  %v830_v11 = vld [vmem:[#allocation19 + $0x640] sm:$0xff]  ;;  %v1518_v15 = vunpack.c.l.bf16 %v912_v9  ;;  %v1519_v16 = vunpack.c.h.bf16 %v912_v9  ;;  %v1356_v21 = vunpack.c.l.bf16 %v831_v14  ;;  %v1193_v25 = vunpack.c.h.bf16 %v749_v17 }
 0x30e   :  { %5095 = vmatmul.msk.f32.vlgmr.msrb.gmra.mxu1 %vm327_vm3, %v5675_v23  ;;  %5096 = vmatmul.msk.f32.vlgmr.msrb.gmra.mxu2 %vm327_vm3, %v5675_v23 }
 0x30f   :  { %5097 = vmatmul.msk.f32.vlgmr.msrb.gmra.mxu3 %vm327_vm3, %v5675_v23  ;;  %5098 = vmatmul.msk.f32.vlgmr.msra.gmra.mxu0 %vm327_vm3, %v5675_v23 }
 0x310   :  { %2997 = vmatpush.msra.mxu2 %v1509_v18  ;;  %2977 = vmatpush.msra.mxu1 %v1508_v19  ;;  %v1355_v18 = vunpack.c.h.bf16 %v830_v11  ;;  %v1354_v19 = vunpack.c.l.bf16 %v830_v11 }
 0x311   :  { %3017 = vmatpush.msra.mxu3 %v1510_v22  ;;  %3037 = vmatpush.msrb.mxu0 %v1511_v24  ;;  %v1882_v36 = vpop.f32.mrf.mxu2  ;;  %v1357_v22 = vunpack.c.h.bf16 %v831_v14  ;;  %v668_v24 = vld [vmem:[#allocation19 + $0x130] sm:$0xff]  ;;  %v1364_v14 = vunpack.c.l.bf16 %v835_v7 }
 0x312   :  { %2998 = vmatpush.msra.mxu2 %v1347_v26  ;;  %2978 = vmatpush.msra.mxu1 %v1346_v27  ;;  %4858 = vst [vmem:[%s6499_s12 + $0x68] sm:$0xff] %v1882_v36  ;;  %v1902_v39 = vpop.f32.mrf.mxu3  ;;  %v1192_v26 = vunpack.c.l.bf16 %v749_v17  ;;  %v669_v27 = vld [vmem:[#allocation19 + $0x138] sm:$0xff] }
 0x313   :  { %3018 = vmatpush.msra.mxu3 %v1348_v29  ;;  %3038 = vmatpush.msrb.mxu0 %v1349_v30  ;;  %4859 = vst [vmem:[%s6499_s12 + $0x70] sm:$0xff] %v1902_v39  ;;  %v1942_v43 = vpop.f32.mrf.mxu1  ;;  %v1194_v30 = vunpack.c.l.bf16 %v750_v20  ;;  %v1032_v33 = vunpack.c.l.bf16 %v669_v27  ;;  %v832_v39 = vld [vmem:[#allocation19 + $0x650] sm:$0xff] }
 0x314   :  { %2999 = vmatpush.msra.mxu2 %v1185_v32  ;;  %2979 = vmatpush.msra.mxu1 %v1184_v61  ;;  %4861 = vst [vmem:[%s6499_s12 + $0x80] sm:$0xff] %v1942_v43  ;;  %v2002_v45 = vpop.f32.mrf.mxu0  ;;  %v1031_v32 = vunpack.c.h.bf16 %v668_v24  ;;  %v1030_v61 = vunpack.c.l.bf16 %v668_v24  ;;  %v1359_v46 = vunpack.c.h.bf16 %v832_v39 }
 0x315   :  { %3019 = vmatpush.msra.mxu3 %v1186_v34  ;;  %3039 = vmatpush.msrb.mxu0 %v1187_v35  ;;  %4864 = vst [vmem:[%s6499_s12 + $0x98] sm:$0xff] %v2002_v45  ;;  %v1033_v34 = vunpack.c.h.bf16 %v669_v27  ;;  %v913_v35 = vld [vmem:[#allocation19 + $0x8d8] sm:$0xff]  ;;  %v751_v45 = vld [vmem:[#allocation19 + $0x3c8] sm:$0xff] }
 0x316   :  { %3000 = vmatpush.msra.mxu2 %v1023_v37  ;;  %2980 = vmatpush.msra.mxu1 %v1022_v38  ;;  %v914_v37 = vld [vmem:[#allocation19 + $0x8e0] sm:$0xff]  ;;  %v1197_v52 = vunpack.c.h.bf16 %v751_v45 }
 0x317   :  { %3020 = vmatpush.msra.mxu3 %v1024_v40  ;;  %3040 = vmatpush.msrb.mxu0 %v1025_v41  ;;  %v1521_v40 = vunpack.c.h.bf16 %v913_v35  ;;  %v1520_v41 = vunpack.c.l.bf16 %v913_v35  ;;  %v1522_v43 = vunpack.c.l.bf16 %v914_v37  ;;  %v1523_v44 = vunpack.c.h.bf16 %v914_v37  ;;  %v837_v35 = vld [vmem:[#allocation19 + $0x678] sm:$0xff] }
 0x318   :  { %5099 = vmatmul.msk.f32.vlgmr.msra.gmra.mxu1 %vm327_vm3, %v5675_v23  ;;  %5100 = vmatmul.msk.f32.vlgmr.msra.gmra.mxu2 %vm327_vm3, %v5675_v23 }
 0x319   :  { %5101 = vmatmul.msk.f32.vlgmr.msra.gmra.mxu3 %vm327_vm3, %v5675_v23  ;;  %5102 = vmatmul.msk.f32.vlgmr.msrb.gmra.mxu0 %vm327_vm3, %v5675_v23  ;;  %v1962_v63 = vpop.f32.mrf.mxu2 }
 0x31a   :  { %3077 = vmatpush.msrb.mxu2 %v1513_v47  ;;  %3057 = vmatpush.msrb.mxu1 %v1512_v48  ;;  %v1982_v0 = vpop.f32.mrf.mxu3  ;;  %4862 = vst [vmem:[%s6499_s12 + $0x88] sm:$0xff] %v1962_v63  ;;  %v1358_v47 = vunpack.c.l.bf16 %v832_v39  ;;  %v752_v48 = vld [vmem:[#allocation19 + $0x3d0] sm:$0xff] }
 0x31b   :  { %3097 = vmatpush.msrb.mxu3 %v1514_v50  ;;  %3117 = vmatpush.msra.mxu0 %v1515_v51  ;;  %4863 = vst [vmem:[%s6499_s12 + $0x90] sm:$0xff] %v1982_v0  ;;  %v1361_v50 = vunpack.c.h.bf16 %v833_v42  ;;  %v670_v51 = vld [vmem:[#allocation19 + $0x140] sm:$0xff]  ;;  %v1199_v58 = vunpack.c.h.bf16 %v752_v48  ;;  %v915_v0 = vld [vmem:[#allocation19 + $0x8e8] sm:$0xff]  ;;  %v1368_v42 = vunpack.c.l.bf16 %v837_v35 }
 0x31c   :  { %3078 = vmatpush.msrb.mxu2 %v1351_v53  ;;  %3058 = vmatpush.msrb.mxu1 %v1350_v54  ;;  %v1196_v53 = vunpack.c.l.bf16 %v751_v45  ;;  %v671_v54 = vld [vmem:[#allocation19 + $0x148] sm:$0xff] }
 0x31d   :  { %3098 = vmatpush.msrb.mxu3 %v1352_v56  ;;  %3118 = vmatpush.msra.mxu0 %v1353_v57  ;;  %v2022_v8 = vpop.f32.mrf.mxu1  ;;  %v1198_v57 = vunpack.c.l.bf16 %v752_v48  ;;  %v1036_v62 = vunpack.c.l.bf16 %v671_v54  ;;  %v1037_v63 = vunpack.c.h.bf16 %v671_v54 }
 0x31e   :  { %3079 = vmatpush.msrb.mxu2 %v1189_v59  ;;  %3059 = vmatpush.msrb.mxu1 %v1188_v60  ;;  %4865 = vst [vmem:[%s6499_s12 + $0xa0] sm:$0xff] %v2022_v8  ;;  %v2082_v10 = vpop.f32.mrf.mxu0  ;;  %v1035_v59 = vunpack.c.h.bf16 %v670_v51  ;;  %v1034_v60 = vunpack.c.l.bf16 %v670_v51 }
 0x31f   :  { %3099 = vmatpush.msrb.mxu3 %v1190_v1  ;;  %3119 = vmatpush.msra.mxu0 %v1191_v2  ;;  %4868 = vst [vmem:[%s6499_s12 + $0xb8] sm:$0xff] %v2082_v10  ;;  %v916_v2 = vld [vmem:[#allocation19 + $0x8f0] sm:$0xff]  ;;  %v753_v10 = vld [vmem:[#allocation19 + $0x3d8] sm:$0xff] }
 0x320   :  { %3080 = vmatpush.msrb.mxu2 %v1027_v3  ;;  %3060 = vmatpush.msrb.mxu1 %v1026_v4  ;;  %v834_v4 = vld [vmem:[#allocation19 + $0x660] sm:$0xff]  ;;  %v1526_v8 = vunpack.c.l.bf16 %v916_v2  ;;  %v1527_v9 = vunpack.c.h.bf16 %v916_v2  ;;  %v1201_v17 = vunpack.c.h.bf16 %v753_v10 }
 0x321   :  { %3100 = vmatpush.msrb.mxu3 %v1028_v5  ;;  %3120 = vmatpush.msra.mxu0 %v1029_v6  ;;  %v1525_v5 = vunpack.c.h.bf16 %v915_v0  ;;  %v1524_v6 = vunpack.c.l.bf16 %v915_v0  ;;  %v1363_v11 = vunpack.c.h.bf16 %v834_v4  ;;  %v839_v0 = vld [vmem:[#allocation19 + $0x688] sm:$0xff] }
 0x322   :  { %5103 = vmatmul.msk.f32.vlgmr.msrb.gmra.mxu1 %vm327_vm3, %v5675_v23  ;;  %5104 = vmatmul.msk.f32.vlgmr.msrb.gmra.mxu2 %vm327_vm3, %v5675_v23 }
 0x323   :  { %5105 = vmatmul.msk.f32.vlgmr.msrb.gmra.mxu3 %vm327_vm3, %v5675_v23  ;;  %5106 = vmatmul.msk.f32.vlgmr.msra.gmra.mxu0 %vm327_vm3, %v5675_v23  ;;  %v2042_v28 = vpop.f32.mrf.mxu2 }
 0x324   :  { %3157 = vmatpush.msra.mxu2 %v1517_v12  ;;  %3137 = vmatpush.msra.mxu1 %v1516_v13  ;;  %v2062_v29 = vpop.f32.mrf.mxu3  ;;  %4866 = vst [vmem:[%s6499_s12 + $0xa8] sm:$0xff] %v2042_v28  ;;  %v1362_v12 = vunpack.c.l.bf16 %v834_v4  ;;  %v754_v13 = vld [vmem:[#allocation19 + $0x3e0] sm:$0xff] }
 0x325   :  { %3177 = vmatpush.msra.mxu3 %v1518_v15  ;;  %3197 = vmatpush.msrb.mxu0 %v1519_v16  ;;  %4867 = vst [vmem:[%s6499_s12 + $0xb0] sm:$0xff] %v2062_v29  ;;  %v1365_v15 = vunpack.c.h.bf16 %v835_v7  ;;  %v672_v16 = vld [vmem:[#allocation19 + $0x150] sm:$0xff]  ;;  %v1203_v24 = vunpack.c.h.bf16 %v754_v13  ;;  %v917_v29 = vld [vmem:[#allocation19 + $0x8f8] sm:$0xff]  ;;  %v1372_v7 = vunpack.c.l.bf16 %v839_v0 }
 0x326   :  { %3158 = vmatpush.msra.mxu2 %v1355_v18  ;;  %3138 = vmatpush.msra.mxu1 %v1354_v19  ;;  %v1200_v18 = vunpack.c.l.bf16 %v753_v10  ;;  %v673_v19 = vld [vmem:[#allocation19 + $0x158] sm:$0xff] }
 0x327   :  { %3178 = vmatpush.msra.mxu3 %v1356_v21  ;;  %3198 = vmatpush.msrb.mxu0 %v1357_v22  ;;  %v2102_v36 = vpop.f32.mrf.mxu1  ;;  %v1202_v22 = vunpack.c.l.bf16 %v754_v13  ;;  %v1040_v27 = vunpack.c.l.bf16 %v673_v19  ;;  %v1041_v28 = vunpack.c.h.bf16 %v673_v19 }
 0x328   :  { %3159 = vmatpush.msra.mxu2 %v1193_v25  ;;  %3139 = vmatpush.msra.mxu1 %v1192_v26  ;;  %4869 = vst [vmem:[%s6499_s12 + $0xc0] sm:$0xff] %v2102_v36  ;;  %v2162_v38 = vpop.f32.mrf.mxu0  ;;  %v1039_v25 = vunpack.c.h.bf16 %v672_v16  ;;  %v1038_v26 = vunpack.c.l.bf16 %v672_v16 }
 0x329   :  { %3179 = vmatpush.msra.mxu3 %v1194_v30  ;;  %3199 = vmatpush.msrb.mxu0 %v1195_v31  ;;  %4872 = vst [vmem:[%s6499_s12 + $0xd8] sm:$0xff] %v2162_v38  ;;  %v918_v31 = vld [vmem:[#allocation19 + $0x900] sm:$0xff]  ;;  %v755_v38 = vld [vmem:[#allocation19 + $0x3e8] sm:$0xff] }
 0x32a   :  { %3160 = vmatpush.msra.mxu2 %v1031_v32  ;;  %3140 = vmatpush.msra.mxu1 %v1030_v61  ;;  %v836_v61 = vld [vmem:[#allocation19 + $0x670] sm:$0xff]  ;;  %v1530_v36 = vunpack.c.l.bf16 %v918_v31  ;;  %v1531_v37 = vunpack.c.h.bf16 %v918_v31  ;;  %v1205_v45 = vunpack.c.h.bf16 %v755_v38 }
 0x32b   :  { %3180 = vmatpush.msra.mxu3 %v1032_v33  ;;  %3200 = vmatpush.msrb.mxu0 %v1033_v34  ;;  %v1529_v33 = vunpack.c.h.bf16 %v917_v29  ;;  %v1528_v34 = vunpack.c.l.bf16 %v917_v29  ;;  %v1367_v39 = vunpack.c.h.bf16 %v836_v61  ;;  %v841_v29 = vld [vmem:[#allocation19 + $0x698] sm:$0xff] }
 0x32c   :  { %5107 = vmatmul.msk.f32.vlgmr.msra.gmra.mxu1 %vm327_vm3, %v5675_v23  ;;  %5108 = vmatmul.msk.f32.vlgmr.msra.gmra.mxu2 %vm327_vm3, %v5675_v23 }
 0x32d   :  { %5109 = vmatmul.msk.f32.vlgmr.msra.gmra.mxu3 %vm327_vm3, %v5675_v23  ;;  %5110 = vmatmul.msk.f32.vlgmr.msrb.gmra.mxu0 %vm327_vm3, %v5675_v23  ;;  %v2122_v55 = vpop.f32.mrf.mxu2 }
 0x32e   :  { %3237 = vmatpush.msrb.mxu2 %v1521_v40  ;;  %3217 = vmatpush.msrb.mxu1 %v1520_v41  ;;  %v2142_v56 = vpop.f32.mrf.mxu3  ;;  %4870 = vst [vmem:[%s6499_s12 + $0xc8] sm:$0xff] %v2122_v55  ;;  %v1366_v40 = vunpack.c.l.bf16 %v836_v61  ;;  %v756_v41 = vld [vmem:[#allocation19 + $0x3f0] sm:$0xff] }
 0x32f   :  { %3257 = vmatpush.msrb.mxu3 %v1522_v43  ;;  %3277 = vmatpush.msra.mxu0 %v1523_v44  ;;  %4871 = vst [vmem:[%s6499_s12 + $0xd0] sm:$0xff] %v2142_v56  ;;  %v1369_v43 = vunpack.c.h.bf16 %v837_v35  ;;  %v674_v44 = vld [vmem:[#allocation19 + $0x160] sm:$0xff]  ;;  %v1207_v51 = vunpack.c.h.bf16 %v756_v41  ;;  %v919_v56 = vld [vmem:[#allocation19 + $0x908] sm:$0xff]  ;;  %v1376_v35 = vunpack.c.l.bf16 %v841_v29 }
 0x330   :  { %3238 = vmatpush.msrb.mxu2 %v1359_v46  ;;  %3218 = vmatpush.msrb.mxu1 %v1358_v47  ;;  %v1204_v46 = vunpack.c.l.bf16 %v755_v38  ;;  %v675_v47 = vld [vmem:[#allocation19 + $0x168] sm:$0xff] }
 0x331   :  { %3258 = vmatpush.msrb.mxu3 %v1360_v49  ;;  %3278 = vmatpush.msra.mxu0 %v1361_v50  ;;  %v2182_v1 = vpop.f32.mrf.mxu1  ;;  %v1206_v50 = vunpack.c.l.bf16 %v756_v41  ;;  %v1044_v54 = vunpack.c.l.bf16 %v675_v47  ;;  %v1045_v55 = vunpack.c.h.bf16 %v675_v47 }
 0x332   :  { %3239 = vmatpush.msrb.mxu2 %v1197_v52  ;;  %3219 = vmatpush.msrb.mxu1 %v1196_v53  ;;  %4873 = vst [vmem:[%s6499_s12 + $0xe0] sm:$0xff] %v2182_v1  ;;  %v2242_v3 = vpop.f32.mrf.mxu0  ;;  %v1043_v52 = vunpack.c.h.bf16 %v674_v44  ;;  %v1042_v53 = vunpack.c.l.bf16 %v674_v44 }
 0x333   :  { %3259 = vmatpush.msrb.mxu3 %v1198_v57  ;;  %3279 = vmatpush.msra.mxu0 %v1199_v58  ;;  %4876 = vst [vmem:[%s6499_s12 + $0xf8] sm:$0xff] %v2242_v3  ;;  %v920_v58 = vld [vmem:[#allocation19 + $0x910] sm:$0xff]  ;;  %v757_v3 = vld [vmem:[#allocation19 + $0x3f8] sm:$0xff] }
 0x334   :  { %3240 = vmatpush.msrb.mxu2 %v1035_v59  ;;  %3220 = vmatpush.msrb.mxu1 %v1034_v60  ;;  %v838_v60 = vld [vmem:[#allocation19 + $0x680] sm:$0xff]  ;;  %v1534_v1 = vunpack.c.l.bf16 %v920_v58  ;;  %v1535_v2 = vunpack.c.h.bf16 %v920_v58  ;;  %v1209_v10 = vunpack.c.h.bf16 %v757_v3 }
 0x335   :  { %3260 = vmatpush.msrb.mxu3 %v1036_v62  ;;  %3280 = vmatpush.msra.mxu0 %v1037_v63  ;;  %v1533_v62 = vunpack.c.h.bf16 %v919_v56  ;;  %v1532_v63 = vunpack.c.l.bf16 %v919_v56  ;;  %v1371_v4 = vunpack.c.h.bf16 %v838_v60  ;;  %v843_v56 = vld [vmem:[#allocation19 + $0x6a8] sm:$0xff] }
 0x336   :  { %5111 = vmatmul.msk.f32.vlgmr.msrb.gmra.mxu1 %vm327_vm3, %v5675_v23  ;;  %5112 = vmatmul.msk.f32.vlgmr.msrb.gmra.mxu2 %vm327_vm3, %v5675_v23 }
 0x337   :  { %5113 = vmatmul.msk.f32.vlgmr.msrb.gmra.mxu3 %vm327_vm3, %v5675_v23  ;;  %5114 = vmatmul.msk.f32.vlgmr.msra.gmra.mxu0 %vm327_vm3, %v5675_v23  ;;  %v2202_v20 = vpop.f32.mrf.mxu2 }
 0x338   :  { %3317 = vmatpush.msra.mxu2 %v1525_v5  ;;  %3297 = vmatpush.msra.mxu1 %v1524_v6  ;;  %v2222_v21 = vpop.f32.mrf.mxu3  ;;  %4874 = vst [vmem:[%s6499_s12 + $0xe8] sm:$0xff] %v2202_v20  ;;  %v1370_v5 = vunpack.c.l.bf16 %v838_v60  ;;  %v758_v6 = vld [vmem:[#allocation19 + $0x400] sm:$0xff] }
 0x339   :  { %3337 = vmatpush.msra.mxu3 %v1526_v8  ;;  %3357 = vmatpush.msrb.mxu0 %v1527_v9  ;;  %4875 = vst [vmem:[%s6499_s12 + $0xf0] sm:$0xff] %v2222_v21  ;;  %v1373_v8 = vunpack.c.h.bf16 %v839_v0  ;;  %v676_v9 = vld [vmem:[#allocation19 + $0x170] sm:$0xff]  ;;  %v1211_v16 = vunpack.c.h.bf16 %v758_v6  ;;  %v921_v21 = vld [vmem:[#allocation19 + $0x918] sm:$0xff]  ;;  %v1380_v0 = vunpack.c.l.bf16 %v843_v56 }
 0x33a   :  { %3318 = vmatpush.msra.mxu2 %v1363_v11  ;;  %3298 = vmatpush.msra.mxu1 %v1362_v12  ;;  %v1208_v11 = vunpack.c.l.bf16 %v757_v3  ;;  %v677_v12 = vld [vmem:[#allocation19 + $0x178] sm:$0xff] }
 0x33b   :  { %3338 = vmatpush.msra.mxu3 %v1364_v14  ;;  %3358 = vmatpush.msrb.mxu0 %v1365_v15  ;;  %v2262_v30 = vpop.f32.mrf.mxu1  ;;  %v1210_v15 = vunpack.c.l.bf16 %v758_v6  ;;  %v1048_v19 = vunpack.c.l.bf16 %v677_v12  ;;  %v1049_v20 = vunpack.c.h.bf16 %v677_v12 }
 0x33c   :  { %3319 = vmatpush.msra.mxu2 %v1201_v17  ;;  %3299 = vmatpush.msra.mxu1 %v1200_v18  ;;  %4877 = vst [vmem:[%s6499_s12 + $0x100] sm:$0xff] %v2262_v30  ;;  %v2322_v32 = vpop.f32.mrf.mxu0  ;;  %v1047_v17 = vunpack.c.h.bf16 %v676_v9  ;;  %v1046_v18 = vunpack.c.l.bf16 %v676_v9 }
 0x33d   :  { %3339 = vmatpush.msra.mxu3 %v1202_v22  ;;  %3359 = vmatpush.msrb.mxu0 %v1203_v24  ;;  %4880 = vst [vmem:[%s6499_s12 + $0x118] sm:$0xff] %v2322_v32  ;;  %v922_v24 = vld [vmem:[#allocation19 + $0x920] sm:$0xff]  ;;  %v759_v32 = vld [vmem:[#allocation19 + $0x408] sm:$0xff] }
 0x33e   :  { %3320 = vmatpush.msra.mxu2 %v1039_v25  ;;  %3300 = vmatpush.msra.mxu1 %v1038_v26  ;;  %v840_v26 = vld [vmem:[#allocation19 + $0x690] sm:$0xff]  ;;  %v1538_v30 = vunpack.c.l.bf16 %v922_v24  ;;  %v1539_v31 = vunpack.c.h.bf16 %v922_v24  ;;  %v1213_v38 = vunpack.c.h.bf16 %v759_v32 }
 0x33f   :  { %3340 = vmatpush.msra.mxu3 %v1040_v27  ;;  %3360 = vmatpush.msrb.mxu0 %v1041_v28  ;;  %v1537_v27 = vunpack.c.h.bf16 %v921_v21  ;;  %v1536_v28 = vunpack.c.l.bf16 %v921_v21  ;;  %v1375_v61 = vunpack.c.h.bf16 %v840_v26  ;;  %v845_v21 = vld [vmem:[#allocation19 + $0x6b8] sm:$0xff] }
 0x340   :  { %5115 = vmatmul.msk.f32.vlgmr.msra.gmra.mxu1 %vm327_vm3, %v5675_v23  ;;  %5116 = vmatmul.msk.f32.vlgmr.msra.gmra.mxu2 %vm327_vm3, %v5675_v23 }
 0x341   :  { %5117 = vmatmul.msk.f32.vlgmr.msra.gmra.mxu3 %vm327_vm3, %v5675_v23  ;;  %5118 = vmatmul.msk.f32.vlgmr.msrb.gmra.mxu0 %vm327_vm3, %v5675_v23  ;;  %v2282_v48 = vpop.f32.mrf.mxu2 }
 0x342   :  { %3397 = vmatpush.msrb.mxu2 %v1529_v33  ;;  %3377 = vmatpush.msrb.mxu1 %v1528_v34  ;;  %v2302_v49 = vpop.f32.mrf.mxu3  ;;  %4878 = vst [vmem:[%s6499_s12 + $0x108] sm:$0xff] %v2282_v48  ;;  %v1374_v33 = vunpack.c.l.bf16 %v840_v26  ;;  %v760_v34 = vld [vmem:[#allocation19 + $0x410] sm:$0xff] }
 0x343   :  { %3417 = vmatpush.msrb.mxu3 %v1530_v36  ;;  %3437 = vmatpush.msra.mxu0 %v1531_v37  ;;  %4879 = vst [vmem:[%s6499_s12 + $0x110] sm:$0xff] %v2302_v49  ;;  %v1377_v36 = vunpack.c.h.bf16 %v841_v29  ;;  %v678_v37 = vld [vmem:[#allocation19 + $0x180] sm:$0xff]  ;;  %v1215_v44 = vunpack.c.h.bf16 %v760_v34  ;;  %v923_v49 = vld [vmem:[#allocation19 + $0x928] sm:$0xff]  ;;  %v1384_v29 = vunpack.c.l.bf16 %v845_v21 }
 0x344   :  { %3398 = vmatpush.msrb.mxu2 %v1367_v39  ;;  %3378 = vmatpush.msrb.mxu1 %v1366_v40  ;;  %v1212_v39 = vunpack.c.l.bf16 %v759_v32  ;;  %v679_v40 = vld [vmem:[#allocation19 + $0x188] sm:$0xff] }
 0x345   :  { %3418 = vmatpush.msrb.mxu3 %v1368_v42  ;;  %3438 = vmatpush.msra.mxu0 %v1369_v43  ;;  %v2342_v57 = vpop.f32.mrf.mxu1  ;;  %v1214_v43 = vunpack.c.l.bf16 %v760_v34  ;;  %v1052_v47 = vunpack.c.l.bf16 %v679_v40  ;;  %v1053_v48 = vunpack.c.h.bf16 %v679_v40 }
 0x346   :  { %3399 = vmatpush.msrb.mxu2 %v1205_v45  ;;  %3379 = vmatpush.msrb.mxu1 %v1204_v46  ;;  %4881 = vst [vmem:[%s6499_s12 + $0x120] sm:$0xff] %v2342_v57  ;;  %v2402_v59 = vpop.f32.mrf.mxu0  ;;  %v1051_v45 = vunpack.c.h.bf16 %v678_v37  ;;  %v1050_v46 = vunpack.c.l.bf16 %v678_v37 }
 0x347   :  { %3419 = vmatpush.msrb.mxu3 %v1206_v50  ;;  %3439 = vmatpush.msra.mxu0 %v1207_v51  ;;  %4884 = vst [vmem:[%s6499_s12 + $0x138] sm:$0xff] %v2402_v59  ;;  %v924_v51 = vld [vmem:[#allocation19 + $0x930] sm:$0xff]  ;;  %v761_v59 = vld [vmem:[#allocation19 + $0x418] sm:$0xff] }
 0x348   :  { %3400 = vmatpush.msrb.mxu2 %v1043_v52  ;;  %3380 = vmatpush.msrb.mxu1 %v1042_v53  ;;  %v842_v53 = vld [vmem:[#allocation19 + $0x6a0] sm:$0xff]  ;;  %v1542_v57 = vunpack.c.l.bf16 %v924_v51  ;;  %v1543_v58 = vunpack.c.h.bf16 %v924_v51  ;;  %v1217_v3 = vunpack.c.h.bf16 %v761_v59 }
 0x349   :  { %3420 = vmatpush.msrb.mxu3 %v1044_v54  ;;  %3440 = vmatpush.msra.mxu0 %v1045_v55  ;;  %v1541_v54 = vunpack.c.h.bf16 %v923_v49  ;;  %v1540_v55 = vunpack.c.l.bf16 %v923_v49  ;;  %v1379_v60 = vunpack.c.h.bf16 %v842_v53  ;;  %v847_v49 = vld [vmem:[#allocation19 + $0x6c8] sm:$0xff] }
 0x34a   :  { %5119 = vmatmul.msk.f32.vlgmr.msrb.gmra.mxu1 %vm327_vm3, %v5675_v23  ;;  %5120 = vmatmul.msk.f32.vlgmr.msrb.gmra.mxu2 %vm327_vm3, %v5675_v23 }
 0x34b   :  { %5121 = vmatmul.msk.f32.vlgmr.msrb.gmra.mxu3 %vm327_vm3, %v5675_v23  ;;  %5122 = vmatmul.msk.f32.vlgmr.msra.gmra.mxu0 %vm327_vm3, %v5675_v23  ;;  %v2362_v13 = vpop.f32.mrf.mxu2 }
 0x34c   :  { %3477 = vmatpush.msra.mxu2 %v1533_v62  ;;  %3457 = vmatpush.msra.mxu1 %v1532_v63  ;;  %v2382_v14 = vpop.f32.mrf.mxu3  ;;  %4882 = vst [vmem:[%s6499_s12 + $0x128] sm:$0xff] %v2362_v13  ;;  %v1378_v62 = vunpack.c.l.bf16 %v842_v53  ;;  %v762_v63 = vld [vmem:[#allocation19 + $0x420] sm:$0xff] }
 0x34d   :  { %3497 = vmatpush.msra.mxu3 %v1534_v1  ;;  %3517 = vmatpush.msrb.mxu0 %v1535_v2  ;;  %4883 = vst [vmem:[%s6499_s12 + $0x130] sm:$0xff] %v2382_v14  ;;  %v1381_v1 = vunpack.c.h.bf16 %v843_v56  ;;  %v680_v2 = vld [vmem:[#allocation19 + $0x190] sm:$0xff]  ;;  %v1219_v9 = vunpack.c.h.bf16 %v762_v63  ;;  %v925_v14 = vld [vmem:[#allocation19 + $0x938] sm:$0xff]  ;;  %v1388_v56 = vunpack.c.l.bf16 %v847_v49 }
 0x34e   :  { %3478 = vmatpush.msra.mxu2 %v1371_v4  ;;  %3458 = vmatpush.msra.mxu1 %v1370_v5  ;;  %v1216_v4 = vunpack.c.l.bf16 %v761_v59  ;;  %v681_v5 = vld [vmem:[#allocation19 + $0x198] sm:$0xff] }
 0x34f   :  { %3498 = vmatpush.msra.mxu3 %v1372_v7  ;;  %3518 = vmatpush.msrb.mxu0 %v1373_v8  ;;  %v2422_v22 = vpop.f32.mrf.mxu1  ;;  %v1218_v8 = vunpack.c.l.bf16 %v762_v63  ;;  %v1056_v12 = vunpack.c.l.bf16 %v681_v5  ;;  %v1057_v13 = vunpack.c.h.bf16 %v681_v5 }
 0x350   :  { %3479 = vmatpush.msra.mxu2 %v1209_v10  ;;  %3459 = vmatpush.msra.mxu1 %v1208_v11  ;;  %4885 = vst [vmem:[%s6499_s12 + $0x140] sm:$0xff] %v2422_v22  ;;  %v2482_v25 = vpop.f32.mrf.mxu0  ;;  %v1055_v10 = vunpack.c.h.bf16 %v680_v2  ;;  %v1054_v11 = vunpack.c.l.bf16 %v680_v2 }
 0x351   :  { %3499 = vmatpush.msra.mxu3 %v1210_v15  ;;  %3519 = vmatpush.msrb.mxu0 %v1211_v16  ;;  %4888 = vst [vmem:[%s6499_s12 + $0x158] sm:$0xff] %v2482_v25  ;;  %v926_v16 = vld [vmem:[#allocation19 + $0x940] sm:$0xff]  ;;  %v763_v25 = vld [vmem:[#allocation19 + $0x428] sm:$0xff] }
 0x352   :  { %3480 = vmatpush.msra.mxu2 %v1047_v17  ;;  %3460 = vmatpush.msra.mxu1 %v1046_v18  ;;  %v844_v18 = vld [vmem:[#allocation19 + $0x6b0] sm:$0xff]  ;;  %v1546_v22 = vunpack.c.l.bf16 %v926_v16  ;;  %v1547_v24 = vunpack.c.h.bf16 %v926_v16  ;;  %v1221_v32 = vunpack.c.h.bf16 %v763_v25 }
 0x353   :  { %3500 = vmatpush.msra.mxu3 %v1048_v19  ;;  %3520 = vmatpush.msrb.mxu0 %v1049_v20  ;;  %v1545_v19 = vunpack.c.h.bf16 %v925_v14  ;;  %v1544_v20 = vunpack.c.l.bf16 %v925_v14  ;;  %v1383_v26 = vunpack.c.h.bf16 %v844_v18  ;;  %v849_v14 = vld [vmem:[#allocation19 + $0x6d8] sm:$0xff] }
 0x354   :  { %5123 = vmatmul.msk.f32.vlgmr.msra.gmra.mxu1 %vm327_vm3, %v5675_v23  ;;  %5124 = vmatmul.msk.f32.vlgmr.msra.gmra.mxu2 %vm327_vm3, %v5675_v23 }
 0x355   :  { %5125 = vmatmul.msk.f32.vlgmr.msra.gmra.mxu3 %vm327_vm3, %v5675_v23  ;;  %5126 = vmatmul.msk.f32.vlgmr.msrb.gmra.mxu0 %vm327_vm3, %v5675_v23  ;;  %v2442_v41 = vpop.f32.mrf.mxu2 }
 0x356   :  { %3557 = vmatpush.msrb.mxu2 %v1537_v27  ;;  %3537 = vmatpush.msrb.mxu1 %v1536_v28  ;;  %v2462_v42 = vpop.f32.mrf.mxu3  ;;  %4886 = vst [vmem:[%s6499_s12 + $0x148] sm:$0xff] %v2442_v41  ;;  %v1382_v27 = vunpack.c.l.bf16 %v844_v18  ;;  %v764_v28 = vld [vmem:[#allocation19 + $0x430] sm:$0xff] }
 0x357   :  { %3577 = vmatpush.msrb.mxu3 %v1538_v30  ;;  %3597 = vmatpush.msra.mxu0 %v1539_v31  ;;  %4887 = vst [vmem:[%s6499_s12 + $0x150] sm:$0xff] %v2462_v42  ;;  %v1385_v30 = vunpack.c.h.bf16 %v845_v21  ;;  %v682_v31 = vld [vmem:[#allocation19 + $0x1a0] sm:$0xff]  ;;  %v1223_v37 = vunpack.c.h.bf16 %v764_v28  ;;  %v927_v42 = vld [vmem:[#allocation19 + $0x948] sm:$0xff]  ;;  %v1392_v21 = vunpack.c.l.bf16 %v849_v14 }
 0x358   :  { %3558 = vmatpush.msrb.mxu2 %v1375_v61  ;;  %3538 = vmatpush.msrb.mxu1 %v1374_v33  ;;  %v1220_v61 = vunpack.c.l.bf16 %v763_v25  ;;  %v683_v33 = vld [vmem:[#allocation19 + $0x1a8] sm:$0xff] }
 0x359   :  { %3578 = vmatpush.msrb.mxu3 %v1376_v35  ;;  %3598 = vmatpush.msra.mxu0 %v1377_v36  ;;  %v2502_v50 = vpop.f32.mrf.mxu1  ;;  %v1222_v36 = vunpack.c.l.bf16 %v764_v28  ;;  %v1060_v40 = vunpack.c.l.bf16 %v683_v33  ;;  %v1061_v41 = vunpack.c.h.bf16 %v683_v33 }
 0x35a   :  { %3559 = vmatpush.msrb.mxu2 %v1213_v38  ;;  %3539 = vmatpush.msrb.mxu1 %v1212_v39  ;;  %4889 = vst [vmem:[%s6499_s12 + $0x160] sm:$0xff] %v2502_v50  ;;  %v2562_v52 = vpop.f32.mrf.mxu0  ;;  %v1059_v38 = vunpack.c.h.bf16 %v682_v31  ;;  %v1058_v39 = vunpack.c.l.bf16 %v682_v31 }
 0x35b   :  { %3579 = vmatpush.msrb.mxu3 %v1214_v43  ;;  %3599 = vmatpush.msra.mxu0 %v1215_v44  ;;  %4892 = vst [vmem:[%s6499_s12 + $0x178] sm:$0xff] %v2562_v52  ;;  %v928_v44 = vld [vmem:[#allocation19 + $0x950] sm:$0xff]  ;;  %v765_v52 = vld [vmem:[#allocation19 + $0x438] sm:$0xff] }
 0x35c   :  { %3560 = vmatpush.msrb.mxu2 %v1051_v45  ;;  %3540 = vmatpush.msrb.mxu1 %v1050_v46  ;;  %v846_v46 = vld [vmem:[#allocation19 + $0x6c0] sm:$0xff]  ;;  %v1550_v50 = vunpack.c.l.bf16 %v928_v44  ;;  %v1551_v51 = vunpack.c.h.bf16 %v928_v44  ;;  %v1225_v59 = vunpack.c.h.bf16 %v765_v52 }
 0x35d   :  { %3580 = vmatpush.msrb.mxu3 %v1052_v47  ;;  %3600 = vmatpush.msra.mxu0 %v1053_v48  ;;  %v1549_v47 = vunpack.c.h.bf16 %v927_v42  ;;  %v1548_v48 = vunpack.c.l.bf16 %v927_v42  ;;  %v1387_v53 = vunpack.c.h.bf16 %v846_v46  ;;  %v851_v42 = vld [vmem:[#allocation19 + $0x6e8] sm:$0xff] }
 0x35e   :  { %5127 = vmatmul.msk.f32.vlgmr.msrb.gmra.mxu1 %vm327_vm3, %v5675_v23  ;;  %5128 = vmatmul.msk.f32.vlgmr.msrb.gmra.mxu2 %vm327_vm3, %v5675_v23 }
 0x35f   :  { %5129 = vmatmul.msk.f32.vlgmr.msrb.gmra.mxu3 %vm327_vm3, %v5675_v23  ;;  %5130 = vmatmul.msk.f32.vlgmr.msra.gmra.mxu0 %vm327_vm3, %v5675_v23  ;;  %v2522_v6 = vpop.f32.mrf.mxu2 }
 0x360   :  { %3637 = vmatpush.msra.mxu2 %v1541_v54  ;;  %3617 = vmatpush.msra.mxu1 %v1540_v55  ;;  %v2542_v7 = vpop.f32.mrf.mxu3  ;;  %4890 = vst [vmem:[%s6499_s12 + $0x168] sm:$0xff] %v2522_v6  ;;  %v1386_v54 = vunpack.c.l.bf16 %v846_v46  ;;  %v766_v55 = vld [vmem:[#allocation19 + $0x440] sm:$0xff] }
 0x361   :  { %3657 = vmatpush.msra.mxu3 %v1542_v57  ;;  %3677 = vmatpush.msrb.mxu0 %v1543_v58  ;;  %4891 = vst [vmem:[%s6499_s12 + $0x170] sm:$0xff] %v2542_v7  ;;  %v1389_v57 = vunpack.c.h.bf16 %v847_v49  ;;  %v684_v58 = vld [vmem:[#allocation19 + $0x1b0] sm:$0xff]  ;;  %v1227_v2 = vunpack.c.h.bf16 %v766_v55  ;;  %v929_v7 = vld [vmem:[#allocation19 + $0x958] sm:$0xff]  ;;  %v1396_v49 = vunpack.c.l.bf16 %v851_v42 }
 0x362   :  { %3638 = vmatpush.msra.mxu2 %v1379_v60  ;;  %3618 = vmatpush.msra.mxu1 %v1378_v62  ;;  %v1224_v60 = vunpack.c.l.bf16 %v765_v52  ;;  %v685_v62 = vld [vmem:[#allocation19 + $0x1b8] sm:$0xff] }
 0x363   :  { %3658 = vmatpush.msra.mxu3 %v1380_v0  ;;  %3678 = vmatpush.msrb.mxu0 %v1381_v1  ;;  %v2582_v15 = vpop.f32.mrf.mxu1  ;;  %v1226_v1 = vunpack.c.l.bf16 %v766_v55  ;;  %v1064_v5 = vunpack.c.l.bf16 %v685_v62  ;;  %v1065_v6 = vunpack.c.h.bf16 %v685_v62 }
 0x364   :  { %3639 = vmatpush.msra.mxu2 %v1217_v3  ;;  %3619 = vmatpush.msra.mxu1 %v1216_v4  ;;  %4893 = vst [vmem:[%s6499_s12 + $0x180] sm:$0xff] %v2582_v15  ;;  %v2642_v17 = vpop.f32.mrf.mxu0  ;;  %v1063_v3 = vunpack.c.h.bf16 %v684_v58  ;;  %v1062_v4 = vunpack.c.l.bf16 %v684_v58 }
 0x365   :  { %3659 = vmatpush.msra.mxu3 %v1218_v8  ;;  %3679 = vmatpush.msrb.mxu0 %v1219_v9  ;;  %4896 = vst [vmem:[%s6499_s12 + $0x198] sm:$0xff] %v2642_v17  ;;  %v930_v9 = vld [vmem:[#allocation19 + $0x960] sm:$0xff]  ;;  %v767_v17 = vld [vmem:[#allocation19 + $0x448] sm:$0xff] }
 0x366   :  { %3640 = vmatpush.msra.mxu2 %v1055_v10  ;;  %3620 = vmatpush.msra.mxu1 %v1054_v11  ;;  %v848_v11 = vld [vmem:[#allocation19 + $0x6d0] sm:$0xff]  ;;  %v1554_v15 = vunpack.c.l.bf16 %v930_v9  ;;  %v1555_v16 = vunpack.c.h.bf16 %v930_v9  ;;  %v1229_v25 = vunpack.c.h.bf16 %v767_v17 }
 0x367   :  { %3660 = vmatpush.msra.mxu3 %v1056_v12  ;;  %3680 = vmatpush.msrb.mxu0 %v1057_v13  ;;  %v1553_v12 = vunpack.c.h.bf16 %v929_v7  ;;  %v1552_v13 = vunpack.c.l.bf16 %v929_v7  ;;  %v1391_v18 = vunpack.c.h.bf16 %v848_v11  ;;  %v853_v7 = vld [vmem:[#allocation19 + $0x6f8] sm:$0xff] }
 0x368   :  { %5131 = vmatmul.msk.f32.vlgmr.msra.gmra.mxu1 %vm327_vm3, %v5675_v23  ;;  %5132 = vmatmul.msk.f32.vlgmr.msra.gmra.mxu2 %vm327_vm3, %v5675_v23 }
 0x369   :  { %5133 = vmatmul.msk.f32.vlgmr.msra.gmra.mxu3 %vm327_vm3, %v5675_v23  ;;  %5134 = vmatmul.msk.f32.vlgmr.msrb.gmra.mxu0 %vm327_vm3, %v5675_v23  ;;  %v2602_v34 = vpop.f32.mrf.mxu2 }
 0x36a   :  { %3717 = vmatpush.msrb.mxu2 %v1545_v19  ;;  %3697 = vmatpush.msrb.mxu1 %v1544_v20  ;;  %v2622_v35 = vpop.f32.mrf.mxu3  ;;  %4894 = vst [vmem:[%s6499_s12 + $0x188] sm:$0xff] %v2602_v34  ;;  %v1390_v19 = vunpack.c.l.bf16 %v848_v11  ;;  %v768_v20 = vld [vmem:[#allocation19 + $0x450] sm:$0xff] }
 0x36b   :  { %3737 = vmatpush.msrb.mxu3 %v1546_v22  ;;  %3757 = vmatpush.msra.mxu0 %v1547_v24  ;;  %4895 = vst [vmem:[%s6499_s12 + $0x190] sm:$0xff] %v2622_v35  ;;  %v1393_v22 = vunpack.c.h.bf16 %v849_v14  ;;  %v686_v24 = vld [vmem:[#allocation19 + $0x1c0] sm:$0xff]  ;;  %v1231_v31 = vunpack.c.h.bf16 %v768_v20  ;;  %v931_v35 = vld [vmem:[#allocation19 + $0x968] sm:$0xff]  ;;  %v1400_v14 = vunpack.c.l.bf16 %v853_v7 }
 0x36c   :  { %3718 = vmatpush.msrb.mxu2 %v1383_v26  ;;  %3698 = vmatpush.msrb.mxu1 %v1382_v27  ;;  %v1228_v26 = vunpack.c.l.bf16 %v767_v17  ;;  %v687_v27 = vld [vmem:[#allocation19 + $0x1c8] sm:$0xff] }
 0x36d   :  { %3738 = vmatpush.msrb.mxu3 %v1384_v29  ;;  %3758 = vmatpush.msra.mxu0 %v1385_v30  ;;  %v2662_v43 = vpop.f32.mrf.mxu1  ;;  %v1230_v30 = vunpack.c.l.bf16 %v768_v20  ;;  %v1068_v33 = vunpack.c.l.bf16 %v687_v27  ;;  %v1069_v34 = vunpack.c.h.bf16 %v687_v27 }
 0x36e   :  { %3719 = vmatpush.msrb.mxu2 %v1221_v32  ;;  %3699 = vmatpush.msrb.mxu1 %v1220_v61  ;;  %4897 = vst [vmem:[%s6499_s12 + $0x1a0] sm:$0xff] %v2662_v43  ;;  %v2722_v45 = vpop.f32.mrf.mxu0  ;;  %v1067_v32 = vunpack.c.h.bf16 %v686_v24  ;;  %v1066_v61 = vunpack.c.l.bf16 %v686_v24 }
 0x36f   :  { %3739 = vmatpush.msrb.mxu3 %v1222_v36  ;;  %3759 = vmatpush.msra.mxu0 %v1223_v37  ;;  %4900 = vst [vmem:[%s6499_s12 + $0x1b8] sm:$0xff] %v2722_v45  ;;  %v932_v37 = vld [vmem:[#allocation19 + $0x970] sm:$0xff]  ;;  %v769_v45 = vld [vmem:[#allocation19 + $0x458] sm:$0xff] }
 0x370   :  { %3720 = vmatpush.msrb.mxu2 %v1059_v38  ;;  %3700 = vmatpush.msrb.mxu1 %v1058_v39  ;;  %v850_v39 = vld [vmem:[#allocation19 + $0x6e0] sm:$0xff]  ;;  %v1558_v43 = vunpack.c.l.bf16 %v932_v37  ;;  %v1559_v44 = vunpack.c.h.bf16 %v932_v37  ;;  %v1233_v52 = vunpack.c.h.bf16 %v769_v45 }
 0x371   :  { %3740 = vmatpush.msrb.mxu3 %v1060_v40  ;;  %3760 = vmatpush.msra.mxu0 %v1061_v41  ;;  %v1557_v40 = vunpack.c.h.bf16 %v931_v35  ;;  %v1556_v41 = vunpack.c.l.bf16 %v931_v35  ;;  %v1395_v46 = vunpack.c.h.bf16 %v850_v39  ;;  %v855_v35 = vld [vmem:[#allocation19 + $0x708] sm:$0xff] }
 0x372   :  { %5135 = vmatmul.msk.f32.vlgmr.msrb.gmra.mxu1 %vm327_vm3, %v5675_v23  ;;  %5136 = vmatmul.msk.f32.vlgmr.msrb.gmra.mxu2 %vm327_vm3, %v5675_v23 }
 0x373   :  { %5137 = vmatmul.msk.f32.vlgmr.msrb.gmra.mxu3 %vm327_vm3, %v5675_v23  ;;  %5138 = vmatmul.msk.f32.vlgmr.msra.gmra.mxu0 %vm327_vm3, %v5675_v23  ;;  %v2682_v63 = vpop.f32.mrf.mxu2 }
 0x374   :  { %3797 = vmatpush.msra.mxu2 %v1549_v47  ;;  %3777 = vmatpush.msra.mxu1 %v1548_v48  ;;  %v2702_v0 = vpop.f32.mrf.mxu3  ;;  %4898 = vst [vmem:[%s6499_s12 + $0x1a8] sm:$0xff] %v2682_v63  ;;  %v1394_v47 = vunpack.c.l.bf16 %v850_v39  ;;  %v770_v48 = vld [vmem:[#allocation19 + $0x460] sm:$0xff] }
 0x375   :  { %3817 = vmatpush.msra.mxu3 %v1550_v50  ;;  %3837 = vmatpush.msrb.mxu0 %v1551_v51  ;;  %4899 = vst [vmem:[%s6499_s12 + $0x1b0] sm:$0xff] %v2702_v0  ;;  %v1397_v50 = vunpack.c.h.bf16 %v851_v42  ;;  %v688_v51 = vld [vmem:[#allocation19 + $0x1d0] sm:$0xff]  ;;  %v1235_v58 = vunpack.c.h.bf16 %v770_v48  ;;  %v933_v0 = vld [vmem:[#allocation19 + $0x978] sm:$0xff]  ;;  %v1404_v42 = vunpack.c.l.bf16 %v855_v35 }
 0x376   :  { %3798 = vmatpush.msra.mxu2 %v1387_v53  ;;  %3778 = vmatpush.msra.mxu1 %v1386_v54  ;;  %v1232_v53 = vunpack.c.l.bf16 %v769_v45  ;;  %v689_v54 = vld [vmem:[#allocation19 + $0x1d8] sm:$0xff] }
 0x377   :  { %3818 = vmatpush.msra.mxu3 %v1388_v56  ;;  %3838 = vmatpush.msrb.mxu0 %v1389_v57  ;;  %v2742_v8 = vpop.f32.mrf.mxu1  ;;  %v1234_v57 = vunpack.c.l.bf16 %v770_v48  ;;  %v1072_v62 = vunpack.c.l.bf16 %v689_v54  ;;  %v1073_v63 = vunpack.c.h.bf16 %v689_v54 }
 0x378   :  { %3799 = vmatpush.msra.mxu2 %v1225_v59  ;;  %3779 = vmatpush.msra.mxu1 %v1224_v60  ;;  %4901 = vst [vmem:[%s6499_s12 + $0x1c0] sm:$0xff] %v2742_v8  ;;  %v2802_v10 = vpop.f32.mrf.mxu0  ;;  %v1071_v59 = vunpack.c.h.bf16 %v688_v51  ;;  %v1070_v60 = vunpack.c.l.bf16 %v688_v51 }
 0x379   :  { %3819 = vmatpush.msra.mxu3 %v1226_v1  ;;  %3839 = vmatpush.msrb.mxu0 %v1227_v2  ;;  %4904 = vst [vmem:[%s6499_s12 + $0x1d8] sm:$0xff] %v2802_v10  ;;  %v934_v2 = vld [vmem:[#allocation19 + $0x980] sm:$0xff]  ;;  %v771_v10 = vld [vmem:[#allocation19 + $0x468] sm:$0xff] }
 0x37a   :  { %3800 = vmatpush.msra.mxu2 %v1063_v3  ;;  %3780 = vmatpush.msra.mxu1 %v1062_v4  ;;  %v852_v4 = vld [vmem:[#allocation19 + $0x6f0] sm:$0xff]  ;;  %v1562_v8 = vunpack.c.l.bf16 %v934_v2  ;;  %v1563_v9 = vunpack.c.h.bf16 %v934_v2  ;;  %v1237_v17 = vunpack.c.h.bf16 %v771_v10 }
 0x37b   :  { %3820 = vmatpush.msra.mxu3 %v1064_v5  ;;  %3840 = vmatpush.msrb.mxu0 %v1065_v6  ;;  %v1561_v5 = vunpack.c.h.bf16 %v933_v0  ;;  %v1560_v6 = vunpack.c.l.bf16 %v933_v0  ;;  %v1399_v11 = vunpack.c.h.bf16 %v852_v4  ;;  %v857_v0 = vld [vmem:[#allocation19 + $0x718] sm:$0xff] }
 0x37c   :  { %5139 = vmatmul.msk.f32.vlgmr.msra.gmra.mxu1 %vm327_vm3, %v5675_v23  ;;  %5140 = vmatmul.msk.f32.vlgmr.msra.gmra.mxu2 %vm327_vm3, %v5675_v23 }
 0x37d   :  { %5141 = vmatmul.msk.f32.vlgmr.msra.gmra.mxu3 %vm327_vm3, %v5675_v23  ;;  %5142 = vmatmul.msk.f32.vlgmr.msrb.gmra.mxu0 %vm327_vm3, %v5675_v23  ;;  %v2762_v28 = vpop.f32.mrf.mxu2 }
 0x37e   :  { %3877 = vmatpush.msrb.mxu2 %v1553_v12  ;;  %3857 = vmatpush.msrb.mxu1 %v1552_v13  ;;  %v2782_v29 = vpop.f32.mrf.mxu3  ;;  %4902 = vst [vmem:[%s6499_s12 + $0x1c8] sm:$0xff] %v2762_v28  ;;  %v1398_v12 = vunpack.c.l.bf16 %v852_v4  ;;  %v772_v13 = vld [vmem:[#allocation19 + $0x470] sm:$0xff] }
 0x37f   :  { %3897 = vmatpush.msrb.mxu3 %v1554_v15  ;;  %3917 = vmatpush.msra.mxu0 %v1555_v16  ;;  %4903 = vst [vmem:[%s6499_s12 + $0x1d0] sm:$0xff] %v2782_v29  ;;  %v1401_v15 = vunpack.c.h.bf16 %v853_v7  ;;  %v690_v16 = vld [vmem:[#allocation19 + $0x1e0] sm:$0xff]  ;;  %v1239_v24 = vunpack.c.h.bf16 %v772_v13  ;;  %v935_v29 = vld [vmem:[#allocation19 + $0x988] sm:$0xff]  ;;  %v1408_v7 = vunpack.c.l.bf16 %v857_v0 }
 0x380   :  { %3878 = vmatpush.msrb.mxu2 %v1391_v18  ;;  %3858 = vmatpush.msrb.mxu1 %v1390_v19  ;;  %v1236_v18 = vunpack.c.l.bf16 %v771_v10  ;;  %v691_v19 = vld [vmem:[#allocation19 + $0x1e8] sm:$0xff] }
 0x381   :  { %3898 = vmatpush.msrb.mxu3 %v1392_v21  ;;  %3918 = vmatpush.msra.mxu0 %v1393_v22  ;;  %v2822_v36 = vpop.f32.mrf.mxu1  ;;  %v1238_v22 = vunpack.c.l.bf16 %v772_v13  ;;  %v1076_v27 = vunpack.c.l.bf16 %v691_v19  ;;  %v1077_v28 = vunpack.c.h.bf16 %v691_v19 }
 0x382   :  { %3879 = vmatpush.msrb.mxu2 %v1229_v25  ;;  %3859 = vmatpush.msrb.mxu1 %v1228_v26  ;;  %4905 = vst [vmem:[%s6499_s12 + $0x1e0] sm:$0xff] %v2822_v36  ;;  %v2882_v38 = vpop.f32.mrf.mxu0  ;;  %v1075_v25 = vunpack.c.h.bf16 %v690_v16  ;;  %v1074_v26 = vunpack.c.l.bf16 %v690_v16 }
 0x383   :  { %3899 = vmatpush.msrb.mxu3 %v1230_v30  ;;  %3919 = vmatpush.msra.mxu0 %v1231_v31  ;;  %4908 = vst [vmem:[%s6499_s12 + $0x1f8] sm:$0xff] %v2882_v38  ;;  %v936_v31 = vld [vmem:[#allocation19 + $0x990] sm:$0xff]  ;;  %v773_v38 = vld [vmem:[#allocation19 + $0x478] sm:$0xff] }
 0x384   :  { %3880 = vmatpush.msrb.mxu2 %v1067_v32  ;;  %3860 = vmatpush.msrb.mxu1 %v1066_v61  ;;  %v854_v61 = vld [vmem:[#allocation19 + $0x700] sm:$0xff]  ;;  %v1566_v36 = vunpack.c.l.bf16 %v936_v31  ;;  %v1567_v37 = vunpack.c.h.bf16 %v936_v31  ;;  %v1241_v45 = vunpack.c.h.bf16 %v773_v38 }
 0x385   :  { %3900 = vmatpush.msrb.mxu3 %v1068_v33  ;;  %3920 = vmatpush.msra.mxu0 %v1069_v34  ;;  %v1565_v33 = vunpack.c.h.bf16 %v935_v29  ;;  %v1564_v34 = vunpack.c.l.bf16 %v935_v29  ;;  %v1403_v39 = vunpack.c.h.bf16 %v854_v61  ;;  %v859_v29 = vld [vmem:[#allocation19 + $0x728] sm:$0xff] }
 0x386   :  { %5143 = vmatmul.msk.f32.vlgmr.msrb.gmra.mxu1 %vm327_vm3, %v5675_v23  ;;  %5144 = vmatmul.msk.f32.vlgmr.msrb.gmra.mxu2 %vm327_vm3, %v5675_v23 }
 0x387   :  { %5145 = vmatmul.msk.f32.vlgmr.msrb.gmra.mxu3 %vm327_vm3, %v5675_v23  ;;  %5146 = vmatmul.msk.f32.vlgmr.msra.gmra.mxu0 %vm327_vm3, %v5675_v23  ;;  %v2842_v55 = vpop.f32.mrf.mxu2 }
 0x388   :  { %3957 = vmatpush.msra.mxu2 %v1557_v40  ;;  %3937 = vmatpush.msra.mxu1 %v1556_v41  ;;  %v2862_v56 = vpop.f32.mrf.mxu3  ;;  %4906 = vst [vmem:[%s6499_s12 + $0x1e8] sm:$0xff] %v2842_v55  ;;  %v1402_v40 = vunpack.c.l.bf16 %v854_v61  ;;  %v774_v41 = vld [vmem:[#allocation19 + $0x480] sm:$0xff] }
 0x389   :  { %3977 = vmatpush.msra.mxu3 %v1558_v43  ;;  %3997 = vmatpush.msrb.mxu0 %v1559_v44  ;;  %4907 = vst [vmem:[%s6499_s12 + $0x1f0] sm:$0xff] %v2862_v56  ;;  %v1405_v43 = vunpack.c.h.bf16 %v855_v35  ;;  %v692_v44 = vld [vmem:[#allocation19 + $0x1f0] sm:$0xff]  ;;  %v1243_v51 = vunpack.c.h.bf16 %v774_v41  ;;  %v937_v56 = vld [vmem:[#allocation19 + $0x998] sm:$0xff]  ;;  %v1412_v35 = vunpack.c.l.bf16 %v859_v29 }
 0x38a   :  { %3958 = vmatpush.msra.mxu2 %v1395_v46  ;;  %3938 = vmatpush.msra.mxu1 %v1394_v47  ;;  %v1240_v46 = vunpack.c.l.bf16 %v773_v38  ;;  %v693_v47 = vld [vmem:[#allocation19 + $0x1f8] sm:$0xff] }
 0x38b   :  { %3978 = vmatpush.msra.mxu3 %v1396_v49  ;;  %3998 = vmatpush.msrb.mxu0 %v1397_v50  ;;  %v2902_v1 = vpop.f32.mrf.mxu1  ;;  %v1242_v50 = vunpack.c.l.bf16 %v774_v41  ;;  %v1080_v54 = vunpack.c.l.bf16 %v693_v47  ;;  %v1081_v55 = vunpack.c.h.bf16 %v693_v47 }
 0x38c   :  { %3959 = vmatpush.msra.mxu2 %v1233_v52  ;;  %3939 = vmatpush.msra.mxu1 %v1232_v53  ;;  %4909 = vst [vmem:[%s6499_s12 + $0x200] sm:$0xff] %v2902_v1  ;;  %v2962_v3 = vpop.f32.mrf.mxu0  ;;  %v1079_v52 = vunpack.c.h.bf16 %v692_v44  ;;  %v1078_v53 = vunpack.c.l.bf16 %v692_v44 }
 0x38d   :  { %3979 = vmatpush.msra.mxu3 %v1234_v57  ;;  %3999 = vmatpush.msrb.mxu0 %v1235_v58  ;;  %4912 = vst [vmem:[%s6499_s12 + $0x218] sm:$0xff] %v2962_v3  ;;  %v938_v58 = vld [vmem:[#allocation19 + $0x9a0] sm:$0xff]  ;;  %v775_v3 = vld [vmem:[#allocation19 + $0x488] sm:$0xff] }
 0x38e   :  { %3960 = vmatpush.msra.mxu2 %v1071_v59  ;;  %3940 = vmatpush.msra.mxu1 %v1070_v60  ;;  %v856_v60 = vld [vmem:[#allocation19 + $0x710] sm:$0xff]  ;;  %v1570_v1 = vunpack.c.l.bf16 %v938_v58  ;;  %v1571_v2 = vunpack.c.h.bf16 %v938_v58  ;;  %v1245_v10 = vunpack.c.h.bf16 %v775_v3 }
 0x38f   :  { %3980 = vmatpush.msra.mxu3 %v1072_v62  ;;  %4000 = vmatpush.msrb.mxu0 %v1073_v63  ;;  %v1569_v62 = vunpack.c.h.bf16 %v937_v56  ;;  %v1568_v63 = vunpack.c.l.bf16 %v937_v56  ;;  %v1407_v4 = vunpack.c.h.bf16 %v856_v60  ;;  %v861_v56 = vld [vmem:[#allocation19 + $0x738] sm:$0xff] }
 0x390   :  { %5147 = vmatmul.msk.f32.vlgmr.msra.gmra.mxu1 %vm327_vm3, %v5675_v23  ;;  %5148 = vmatmul.msk.f32.vlgmr.msra.gmra.mxu2 %vm327_vm3, %v5675_v23 }
 0x391   :  { %5149 = vmatmul.msk.f32.vlgmr.msra.gmra.mxu3 %vm327_vm3, %v5675_v23  ;;  %5150 = vmatmul.msk.f32.vlgmr.msrb.gmra.mxu0 %vm327_vm3, %v5675_v23  ;;  %v2922_v20 = vpop.f32.mrf.mxu2 }
 0x392   :  { %4037 = vmatpush.msrb.mxu2 %v1561_v5  ;;  %4017 = vmatpush.msrb.mxu1 %v1560_v6  ;;  %v2942_v21 = vpop.f32.mrf.mxu3  ;;  %4910 = vst [vmem:[%s6499_s12 + $0x208] sm:$0xff] %v2922_v20  ;;  %v1406_v5 = vunpack.c.l.bf16 %v856_v60  ;;  %v776_v6 = vld [vmem:[#allocation19 + $0x490] sm:$0xff] }
 0x393   :  { %4057 = vmatpush.msrb.mxu3 %v1562_v8  ;;  %4077 = vmatpush.msra.mxu0 %v1563_v9  ;;  %4911 = vst [vmem:[%s6499_s12 + $0x210] sm:$0xff] %v2942_v21  ;;  %v1409_v8 = vunpack.c.h.bf16 %v857_v0  ;;  %v694_v9 = vld [vmem:[#allocation19 + $0x200] sm:$0xff]  ;;  %v1247_v16 = vunpack.c.h.bf16 %v776_v6  ;;  %v939_v21 = vld [vmem:[#allocation19 + $0x9a8] sm:$0xff]  ;;  %v1416_v0 = vunpack.c.l.bf16 %v861_v56 }
 0x394   :  { %4038 = vmatpush.msrb.mxu2 %v1399_v11  ;;  %4018 = vmatpush.msrb.mxu1 %v1398_v12  ;;  %v1244_v11 = vunpack.c.l.bf16 %v775_v3  ;;  %v695_v12 = vld [vmem:[#allocation19 + $0x208] sm:$0xff] }
 0x395   :  { %4058 = vmatpush.msrb.mxu3 %v1400_v14  ;;  %4078 = vmatpush.msra.mxu0 %v1401_v15  ;;  %v2982_v30 = vpop.f32.mrf.mxu1  ;;  %v1246_v15 = vunpack.c.l.bf16 %v776_v6  ;;  %v1084_v19 = vunpack.c.l.bf16 %v695_v12  ;;  %v1085_v20 = vunpack.c.h.bf16 %v695_v12 }
 0x396   :  { %4039 = vmatpush.msrb.mxu2 %v1237_v17  ;;  %4019 = vmatpush.msrb.mxu1 %v1236_v18  ;;  %4913 = vst [vmem:[%s6499_s12 + $0x220] sm:$0xff] %v2982_v30  ;;  %v3042_v32 = vpop.f32.mrf.mxu0  ;;  %v1083_v17 = vunpack.c.h.bf16 %v694_v9  ;;  %v1082_v18 = vunpack.c.l.bf16 %v694_v9 }
 0x397   :  { %4059 = vmatpush.msrb.mxu3 %v1238_v22  ;;  %4079 = vmatpush.msra.mxu0 %v1239_v24  ;;  %4916 = vst [vmem:[%s6499_s12 + $0x238] sm:$0xff] %v3042_v32  ;;  %v940_v24 = vld [vmem:[#allocation19 + $0x9b0] sm:$0xff]  ;;  %v777_v32 = vld [vmem:[#allocation19 + $0x498] sm:$0xff] }
 0x398   :  { %4040 = vmatpush.msrb.mxu2 %v1075_v25  ;;  %4020 = vmatpush.msrb.mxu1 %v1074_v26  ;;  %v858_v26 = vld [vmem:[#allocation19 + $0x720] sm:$0xff]  ;;  %v1574_v30 = vunpack.c.l.bf16 %v940_v24  ;;  %v1575_v31 = vunpack.c.h.bf16 %v940_v24  ;;  %v1249_v38 = vunpack.c.h.bf16 %v777_v32 }
 0x399   :  { %4060 = vmatpush.msrb.mxu3 %v1076_v27  ;;  %4080 = vmatpush.msra.mxu0 %v1077_v28  ;;  %v1573_v27 = vunpack.c.h.bf16 %v939_v21  ;;  %v1572_v28 = vunpack.c.l.bf16 %v939_v21  ;;  %v1411_v61 = vunpack.c.h.bf16 %v858_v26  ;;  %v863_v21 = vld [vmem:[#allocation19 + $0x748] sm:$0xff] }
 0x39a   :  { %5151 = vmatmul.msk.f32.vlgmr.msrb.gmra.mxu1 %vm327_vm3, %v5675_v23  ;;  %5152 = vmatmul.msk.f32.vlgmr.msrb.gmra.mxu2 %vm327_vm3, %v5675_v23 }
 0x39b   :  { %5153 = vmatmul.msk.f32.vlgmr.msrb.gmra.mxu3 %vm327_vm3, %v5675_v23  ;;  %5154 = vmatmul.msk.f32.vlgmr.msra.gmra.mxu0 %vm327_vm3, %v5675_v23  ;;  %v3002_v48 = vpop.f32.mrf.mxu2 }
 0x39c   :  { %4117 = vmatpush.msra.mxu2 %v1565_v33  ;;  %4097 = vmatpush.msra.mxu1 %v1564_v34  ;;  %v3022_v49 = vpop.f32.mrf.mxu3  ;;  %4914 = vst [vmem:[%s6499_s12 + $0x228] sm:$0xff] %v3002_v48  ;;  %v1410_v33 = vunpack.c.l.bf16 %v858_v26  ;;  %v778_v34 = vld [vmem:[#allocation19 + $0x4a0] sm:$0xff] }
 0x39d   :  { %4137 = vmatpush.msra.mxu3 %v1566_v36  ;;  %4157 = vmatpush.msrb.mxu0 %v1567_v37  ;;  %4915 = vst [vmem:[%s6499_s12 + $0x230] sm:$0xff] %v3022_v49  ;;  %v1413_v36 = vunpack.c.h.bf16 %v859_v29  ;;  %v696_v37 = vld [vmem:[#allocation19 + $0x210] sm:$0xff]  ;;  %v1251_v44 = vunpack.c.h.bf16 %v778_v34  ;;  %v941_v49 = vld [vmem:[#allocation19 + $0x9b8] sm:$0xff]  ;;  %v1420_v29 = vunpack.c.l.bf16 %v863_v21 }
 0x39e   :  { %4118 = vmatpush.msra.mxu2 %v1403_v39  ;;  %4098 = vmatpush.msra.mxu1 %v1402_v40  ;;  %v1248_v39 = vunpack.c.l.bf16 %v777_v32  ;;  %v697_v40 = vld [vmem:[#allocation19 + $0x218] sm:$0xff] }
 0x39f   :  { %4138 = vmatpush.msra.mxu3 %v1404_v42  ;;  %4158 = vmatpush.msrb.mxu0 %v1405_v43  ;;  %v3062_v57 = vpop.f32.mrf.mxu1  ;;  %v1250_v43 = vunpack.c.l.bf16 %v778_v34  ;;  %v1088_v47 = vunpack.c.l.bf16 %v697_v40  ;;  %v1089_v48 = vunpack.c.h.bf16 %v697_v40 }
 0x3a0   :  { %4119 = vmatpush.msra.mxu2 %v1241_v45  ;;  %4099 = vmatpush.msra.mxu1 %v1240_v46  ;;  %4917 = vst [vmem:[%s6499_s12 + $0x240] sm:$0xff] %v3062_v57  ;;  %v3122_v59 = vpop.f32.mrf.mxu0  ;;  %v1087_v45 = vunpack.c.h.bf16 %v696_v37  ;;  %v1086_v46 = vunpack.c.l.bf16 %v696_v37 }
 0x3a1   :  { %4139 = vmatpush.msra.mxu3 %v1242_v50  ;;  %4159 = vmatpush.msrb.mxu0 %v1243_v51  ;;  %4920 = vst [vmem:[%s6499_s12 + $0x258] sm:$0xff] %v3122_v59  ;;  %v942_v51 = vld [vmem:[#allocation19 + $0x9c0] sm:$0xff]  ;;  %v779_v59 = vld [vmem:[#allocation19 + $0x4a8] sm:$0xff] }
 0x3a2   :  { %4120 = vmatpush.msra.mxu2 %v1079_v52  ;;  %4100 = vmatpush.msra.mxu1 %v1078_v53  ;;  %v860_v53 = vld [vmem:[#allocation19 + $0x730] sm:$0xff]  ;;  %v1578_v57 = vunpack.c.l.bf16 %v942_v51  ;;  %v1579_v58 = vunpack.c.h.bf16 %v942_v51  ;;  %v1253_v3 = vunpack.c.h.bf16 %v779_v59 }
 0x3a3   :  { %4140 = vmatpush.msra.mxu3 %v1080_v54  ;;  %4160 = vmatpush.msrb.mxu0 %v1081_v55  ;;  %v1577_v54 = vunpack.c.h.bf16 %v941_v49  ;;  %v1576_v55 = vunpack.c.l.bf16 %v941_v49  ;;  %v1415_v60 = vunpack.c.h.bf16 %v860_v53  ;;  %v865_v49 = vld [vmem:[#allocation19 + $0x758] sm:$0xff] }
 0x3a4   :  { %5155 = vmatmul.msk.f32.vlgmr.msra.gmra.mxu1 %vm327_vm3, %v5675_v23  ;;  %5156 = vmatmul.msk.f32.vlgmr.msra.gmra.mxu2 %vm327_vm3, %v5675_v23 }
 0x3a5   :  { %5157 = vmatmul.msk.f32.vlgmr.msra.gmra.mxu3 %vm327_vm3, %v5675_v23  ;;  %5158 = vmatmul.msk.f32.vlgmr.msrb.gmra.mxu0 %vm327_vm3, %v5675_v23  ;;  %v3082_v13 = vpop.f32.mrf.mxu2 }
 0x3a6   :  { %4197 = vmatpush.msrb.mxu2 %v1569_v62  ;;  %4177 = vmatpush.msrb.mxu1 %v1568_v63  ;;  %v3102_v14 = vpop.f32.mrf.mxu3  ;;  %4918 = vst [vmem:[%s6499_s12 + $0x248] sm:$0xff] %v3082_v13  ;;  %v1414_v62 = vunpack.c.l.bf16 %v860_v53  ;;  %v780_v63 = vld [vmem:[#allocation19 + $0x4b0] sm:$0xff] }
 0x3a7   :  { %4217 = vmatpush.msrb.mxu3 %v1570_v1  ;;  %4237 = vmatpush.msra.mxu0 %v1571_v2  ;;  %4919 = vst [vmem:[%s6499_s12 + $0x250] sm:$0xff] %v3102_v14  ;;  %v1417_v1 = vunpack.c.h.bf16 %v861_v56  ;;  %v698_v2 = vld [vmem:[#allocation19 + $0x220] sm:$0xff]  ;;  %v1255_v9 = vunpack.c.h.bf16 %v780_v63  ;;  %v943_v14 = vld [vmem:[#allocation19 + $0x9c8] sm:$0xff]  ;;  %v1424_v56 = vunpack.c.l.bf16 %v865_v49 }
 0x3a8   :  { %4198 = vmatpush.msrb.mxu2 %v1407_v4  ;;  %4178 = vmatpush.msrb.mxu1 %v1406_v5  ;;  %v1252_v4 = vunpack.c.l.bf16 %v779_v59  ;;  %v699_v5 = vld [vmem:[#allocation19 + $0x228] sm:$0xff] }
 0x3a9   :  { %4218 = vmatpush.msrb.mxu3 %v1408_v7  ;;  %4238 = vmatpush.msra.mxu0 %v1409_v8  ;;  %v3142_v22 = vpop.f32.mrf.mxu1  ;;  %v1254_v8 = vunpack.c.l.bf16 %v780_v63  ;;  %v1092_v12 = vunpack.c.l.bf16 %v699_v5  ;;  %v1093_v13 = vunpack.c.h.bf16 %v699_v5 }
 0x3aa   :  { %4199 = vmatpush.msrb.mxu2 %v1245_v10  ;;  %4179 = vmatpush.msrb.mxu1 %v1244_v11  ;;  %4921 = vst [vmem:[%s6499_s12 + $0x260] sm:$0xff] %v3142_v22  ;;  %v3202_v25 = vpop.f32.mrf.mxu0  ;;  %v1091_v10 = vunpack.c.h.bf16 %v698_v2  ;;  %v1090_v11 = vunpack.c.l.bf16 %v698_v2 }
 0x3ab   :  { %4219 = vmatpush.msrb.mxu3 %v1246_v15  ;;  %4239 = vmatpush.msra.mxu0 %v1247_v16  ;;  %4924 = vst [vmem:[%s6499_s12 + $0x278] sm:$0xff] %v3202_v25  ;;  %v944_v16 = vld [vmem:[#allocation19 + $0x9d0] sm:$0xff]  ;;  %v781_v25 = vld [vmem:[#allocation19 + $0x4b8] sm:$0xff] }
 0x3ac   :  { %4200 = vmatpush.msrb.mxu2 %v1083_v17  ;;  %4180 = vmatpush.msrb.mxu1 %v1082_v18  ;;  %v862_v18 = vld [vmem:[#allocation19 + $0x740] sm:$0xff]  ;;  %v1582_v22 = vunpack.c.l.bf16 %v944_v16  ;;  %v1583_v24 = vunpack.c.h.bf16 %v944_v16  ;;  %v1257_v32 = vunpack.c.h.bf16 %v781_v25 }
 0x3ad   :  { %4220 = vmatpush.msrb.mxu3 %v1084_v19  ;;  %4240 = vmatpush.msra.mxu0 %v1085_v20  ;;  %v1581_v19 = vunpack.c.h.bf16 %v943_v14  ;;  %v1580_v20 = vunpack.c.l.bf16 %v943_v14  ;;  %v1419_v26 = vunpack.c.h.bf16 %v862_v18  ;;  %v867_v14 = vld [vmem:[#allocation19 + $0x768] sm:$0xff] }
 0x3ae   :  { %5159 = vmatmul.msk.f32.vlgmr.msrb.gmra.mxu1 %vm327_vm3, %v5675_v23  ;;  %5160 = vmatmul.msk.f32.vlgmr.msrb.gmra.mxu2 %vm327_vm3, %v5675_v23 }
 0x3af   :  { %5161 = vmatmul.msk.f32.vlgmr.msrb.gmra.mxu3 %vm327_vm3, %v5675_v23  ;;  %5162 = vmatmul.msk.f32.vlgmr.msra.gmra.mxu0 %vm327_vm3, %v5675_v23  ;;  %v3162_v41 = vpop.f32.mrf.mxu2 }
 0x3b0   :  { %4277 = vmatpush.msra.mxu2 %v1573_v27  ;;  %4257 = vmatpush.msra.mxu1 %v1572_v28  ;;  %v3182_v42 = vpop.f32.mrf.mxu3  ;;  %4922 = vst [vmem:[%s6499_s12 + $0x268] sm:$0xff] %v3162_v41  ;;  %v1418_v27 = vunpack.c.l.bf16 %v862_v18  ;;  %v782_v28 = vld [vmem:[#allocation19 + $0x4c0] sm:$0xff] }
 0x3b1   :  { %4297 = vmatpush.msra.mxu3 %v1574_v30  ;;  %4317 = vmatpush.msrb.mxu0 %v1575_v31  ;;  %4923 = vst [vmem:[%s6499_s12 + $0x270] sm:$0xff] %v3182_v42  ;;  %v1421_v30 = vunpack.c.h.bf16 %v863_v21  ;;  %v700_v31 = vld [vmem:[#allocation19 + $0x230] sm:$0xff]  ;;  %v1259_v37 = vunpack.c.h.bf16 %v782_v28  ;;  %v945_v42 = vld [vmem:[#allocation19 + $0x9d8] sm:$0xff]  ;;  %v1428_v21 = vunpack.c.l.bf16 %v867_v14 }
 0x3b2   :  { %4278 = vmatpush.msra.mxu2 %v1411_v61  ;;  %4258 = vmatpush.msra.mxu1 %v1410_v33  ;;  %v1256_v61 = vunpack.c.l.bf16 %v781_v25  ;;  %v701_v33 = vld [vmem:[#allocation19 + $0x238] sm:$0xff] }
 0x3b3   :  { %4298 = vmatpush.msra.mxu3 %v1412_v35  ;;  %4318 = vmatpush.msrb.mxu0 %v1413_v36  ;;  %v3222_v50 = vpop.f32.mrf.mxu1  ;;  %v1258_v36 = vunpack.c.l.bf16 %v782_v28  ;;  %v1096_v40 = vunpack.c.l.bf16 %v701_v33  ;;  %v1097_v41 = vunpack.c.h.bf16 %v701_v33 }
 0x3b4   :  { %4279 = vmatpush.msra.mxu2 %v1249_v38  ;;  %4259 = vmatpush.msra.mxu1 %v1248_v39  ;;  %4925 = vst [vmem:[%s6499_s12 + $0x280] sm:$0xff] %v3222_v50  ;;  %v3282_v52 = vpop.f32.mrf.mxu0  ;;  %v1095_v38 = vunpack.c.h.bf16 %v700_v31  ;;  %v1094_v39 = vunpack.c.l.bf16 %v700_v31 }
 0x3b5   :  { %4299 = vmatpush.msra.mxu3 %v1250_v43  ;;  %4319 = vmatpush.msrb.mxu0 %v1251_v44  ;;  %4928 = vst [vmem:[%s6499_s12 + $0x298] sm:$0xff] %v3282_v52  ;;  %v946_v44 = vld [vmem:[#allocation19 + $0x9e0] sm:$0xff]  ;;  %v783_v52 = vld [vmem:[#allocation19 + $0x4c8] sm:$0xff] }
 0x3b6   :  { %4280 = vmatpush.msra.mxu2 %v1087_v45  ;;  %4260 = vmatpush.msra.mxu1 %v1086_v46  ;;  %v864_v46 = vld [vmem:[#allocation19 + $0x750] sm:$0xff]  ;;  %v1586_v50 = vunpack.c.l.bf16 %v946_v44  ;;  %v1587_v51 = vunpack.c.h.bf16 %v946_v44  ;;  %v1261_v59 = vunpack.c.h.bf16 %v783_v52 }
 0x3b7   :  { %4300 = vmatpush.msra.mxu3 %v1088_v47  ;;  %4320 = vmatpush.msrb.mxu0 %v1089_v48  ;;  %v1585_v47 = vunpack.c.h.bf16 %v945_v42  ;;  %v1584_v48 = vunpack.c.l.bf16 %v945_v42  ;;  %v1423_v53 = vunpack.c.h.bf16 %v864_v46  ;;  %v869_v42 = vld [vmem:[#allocation19 + $0x778] sm:$0xff] }
 0x3b8   :  { %5163 = vmatmul.msk.f32.vlgmr.msra.gmra.mxu1 %vm327_vm3, %v5675_v23  ;;  %5164 = vmatmul.msk.f32.vlgmr.msra.gmra.mxu2 %vm327_vm3, %v5675_v23 }
 0x3b9   :  { %5165 = vmatmul.msk.f32.vlgmr.msra.gmra.mxu3 %vm327_vm3, %v5675_v23  ;;  %5166 = vmatmul.msk.f32.vlgmr.msrb.gmra.mxu0 %vm327_vm3, %v5675_v23  ;;  %v3242_v6 = vpop.f32.mrf.mxu2 }
 0x3ba   :  { %4357 = vmatpush.msrb.mxu2 %v1577_v54  ;;  %4337 = vmatpush.msrb.mxu1 %v1576_v55  ;;  %v3262_v7 = vpop.f32.mrf.mxu3  ;;  %4926 = vst [vmem:[%s6499_s12 + $0x288] sm:$0xff] %v3242_v6  ;;  %v1422_v54 = vunpack.c.l.bf16 %v864_v46  ;;  %v784_v55 = vld [vmem:[#allocation19 + $0x4d0] sm:$0xff] }
 0x3bb   :  { %4377 = vmatpush.msrb.mxu3 %v1578_v57  ;;  %4397 = vmatpush.msra.mxu0 %v1579_v58  ;;  %4927 = vst [vmem:[%s6499_s12 + $0x290] sm:$0xff] %v3262_v7  ;;  %v1425_v57 = vunpack.c.h.bf16 %v865_v49  ;;  %v702_v58 = vld [vmem:[#allocation19 + $0x240] sm:$0xff]  ;;  %v1263_v2 = vunpack.c.h.bf16 %v784_v55  ;;  %v947_v7 = vld [vmem:[#allocation19 + $0x9e8] sm:$0xff]  ;;  %v1432_v49 = vunpack.c.l.bf16 %v869_v42 }
 0x3bc   :  { %4358 = vmatpush.msrb.mxu2 %v1415_v60  ;;  %4338 = vmatpush.msrb.mxu1 %v1414_v62  ;;  %v1260_v60 = vunpack.c.l.bf16 %v783_v52  ;;  %v703_v62 = vld [vmem:[#allocation19 + $0x248] sm:$0xff] }
 0x3bd   :  { %4378 = vmatpush.msrb.mxu3 %v1416_v0  ;;  %4398 = vmatpush.msra.mxu0 %v1417_v1  ;;  %v3302_v15 = vpop.f32.mrf.mxu1  ;;  %v1262_v1 = vunpack.c.l.bf16 %v784_v55  ;;  %v1100_v5 = vunpack.c.l.bf16 %v703_v62  ;;  %v1101_v6 = vunpack.c.h.bf16 %v703_v62  ;;  %v707_v55 = vld [vmem:[#allocation19 + $0x268] sm:$0xff] }
 0x3be   :  { %4359 = vmatpush.msrb.mxu2 %v1253_v3  ;;  %4339 = vmatpush.msrb.mxu1 %v1252_v4  ;;  %4929 = vst [vmem:[%s6499_s12 + $0x2a0] sm:$0xff] %v3302_v15  ;;  %v3362_v17 = vpop.f32.mrf.mxu0  ;;  %v1099_v3 = vunpack.c.h.bf16 %v702_v58  ;;  %v1098_v4 = vunpack.c.l.bf16 %v702_v58  ;;  %v1108_v62 = vunpack.c.l.bf16 %v707_v55 }
 0x3bf   :  { %4379 = vmatpush.msrb.mxu3 %v1254_v8  ;;  %4399 = vmatpush.msra.mxu0 %v1255_v9  ;;  %4932 = vst [vmem:[%s6499_s12 + $0x2b8] sm:$0xff] %v3362_v17  ;;  %v948_v9 = vld [vmem:[#allocation19 + $0x9f0] sm:$0xff]  ;;  %v785_v17 = vld [vmem:[#allocation19 + $0x4d8] sm:$0xff] }
 0x3c0   :  { %4360 = vmatpush.msrb.mxu2 %v1091_v10  ;;  %4340 = vmatpush.msrb.mxu1 %v1090_v11  ;;  %v866_v11 = vld [vmem:[#allocation19 + $0x760] sm:$0xff]  ;;  %v1590_v15 = vunpack.c.l.bf16 %v948_v9  ;;  %v1591_v16 = vunpack.c.h.bf16 %v948_v9  ;;  %v1265_v25 = vunpack.c.h.bf16 %v785_v17 }
 0x3c1   :  { %4380 = vmatpush.msrb.mxu3 %v1092_v12  ;;  %4400 = vmatpush.msra.mxu0 %v1093_v13  ;;  %v1589_v12 = vunpack.c.h.bf16 %v947_v7  ;;  %v1588_v13 = vunpack.c.l.bf16 %v947_v7  ;;  %v1427_v18 = vunpack.c.h.bf16 %v866_v11  ;;  %v871_v7 = vld [vmem:[#allocation19 + $0x788] sm:$0xff] }
 0x3c2   :  { %5167 = vmatmul.msk.f32.vlgmr.msrb.gmra.mxu1 %vm327_vm3, %v5675_v23  ;;  %5168 = vmatmul.msk.f32.vlgmr.msrb.gmra.mxu2 %vm327_vm3, %v5675_v23 }
 0x3c3   :  { %5169 = vmatmul.msk.f32.vlgmr.msrb.gmra.mxu3 %vm327_vm3, %v5675_v23  ;;  %5170 = vmatmul.msk.f32.vlgmr.msra.gmra.mxu0 %vm327_vm3, %v5675_v23  ;;  %v3322_v34 = vpop.f32.mrf.mxu2 }
 0x3c4   :  { %4437 = vmatpush.msra.mxu2 %v1581_v19  ;;  %4417 = vmatpush.msra.mxu1 %v1580_v20  ;;  %v3342_v35 = vpop.f32.mrf.mxu3  ;;  %4930 = vst [vmem:[%s6499_s12 + $0x2a8] sm:$0xff] %v3322_v34  ;;  %v1426_v19 = vunpack.c.l.bf16 %v866_v11  ;;  %v786_v20 = vld [vmem:[#allocation19 + $0x4e0] sm:$0xff] }
 0x3c5   :  { %4457 = vmatpush.msra.mxu3 %v1582_v22  ;;  %4477 = vmatpush.msrb.mxu0 %v1583_v24  ;;  %4931 = vst [vmem:[%s6499_s12 + $0x2b0] sm:$0xff] %v3342_v35  ;;  %v1429_v22 = vunpack.c.h.bf16 %v867_v14  ;;  %v704_v24 = vld [vmem:[#allocation19 + $0x250] sm:$0xff]  ;;  %v1267_v31 = vunpack.c.h.bf16 %v786_v20  ;;  %v949_v35 = vld [vmem:[#allocation19 + $0x9f8] sm:$0xff]  ;;  %v1436_v14 = vunpack.c.l.bf16 %v871_v7 }
 0x3c6   :  { %4438 = vmatpush.msra.mxu2 %v1419_v26  ;;  %4418 = vmatpush.msra.mxu1 %v1418_v27  ;;  %v1264_v26 = vunpack.c.l.bf16 %v785_v17  ;;  %v705_v27 = vld [vmem:[#allocation19 + $0x258] sm:$0xff] }
 0x3c7   :  { %4458 = vmatpush.msra.mxu3 %v1420_v29  ;;  %4478 = vmatpush.msrb.mxu0 %v1421_v30  ;;  %v3382_v43 = vpop.f32.mrf.mxu1  ;;  %v1266_v30 = vunpack.c.l.bf16 %v786_v20  ;;  %v1104_v33 = vunpack.c.l.bf16 %v705_v27  ;;  %v1105_v34 = vunpack.c.h.bf16 %v705_v27  ;;  %v709_v20 = vld [vmem:[#allocation19 + $0x278] sm:$0xff] }
 0x3c8   :  { %4439 = vmatpush.msra.mxu2 %v1257_v32  ;;  %4419 = vmatpush.msra.mxu1 %v1256_v61  ;;  %4933 = vst [vmem:[%s6499_s12 + $0x2c0] sm:$0xff] %v3382_v43  ;;  %v3442_v45 = vpop.f32.mrf.mxu0  ;;  %v1103_v32 = vunpack.c.h.bf16 %v704_v24  ;;  %v1102_v61 = vunpack.c.l.bf16 %v704_v24  ;;  %v1112_v27 = vunpack.c.l.bf16 %v709_v20 }
 0x3c9   :  { %4459 = vmatpush.msra.mxu3 %v1258_v36  ;;  %4479 = vmatpush.msrb.mxu0 %v1259_v37  ;;  %4936 = vst [vmem:[%s6499_s12 + $0x2d8] sm:$0xff] %v3442_v45  ;;  %v950_v37 = vld [vmem:[#allocation19 + $0xa00] sm:$0xff]  ;;  %v787_v45 = vld [vmem:[#allocation19 + $0x4e8] sm:$0xff] }
 0x3ca   :  { %4440 = vmatpush.msra.mxu2 %v1095_v38  ;;  %4420 = vmatpush.msra.mxu1 %v1094_v39  ;;  %v868_v39 = vld [vmem:[#allocation19 + $0x770] sm:$0xff]  ;;  %v1594_v43 = vunpack.c.l.bf16 %v950_v37  ;;  %v1595_v44 = vunpack.c.h.bf16 %v950_v37  ;;  %v710_v37 = vld [vmem:[#allocation19 + $0x280] sm:$0xff] }
 0x3cb   :  { %4460 = vmatpush.msra.mxu3 %v1096_v40  ;;  %4480 = vmatpush.msrb.mxu0 %v1097_v41  ;;  %v1593_v40 = vunpack.c.h.bf16 %v949_v35  ;;  %v1592_v41 = vunpack.c.l.bf16 %v949_v35  ;;  %v1431_v46 = vunpack.c.h.bf16 %v868_v39 }
 0x3cc   :  { %5171 = vmatmul.msk.f32.vlgmr.msra.gmra.mxu1 %vm327_vm3, %v5675_v23  ;;  %5172 = vmatmul.msk.f32.vlgmr.msra.gmra.mxu2 %vm327_vm3, %v5675_v23 }
 0x3cd   :  { %5173 = vmatmul.msk.f32.vlgmr.msra.gmra.mxu3 %vm327_vm3, %v5675_v23  ;;  %5174 = vmatmul.msk.f32.vlgmr.msrb.gmra.mxu0 %vm327_vm3, %v5675_v23  ;;  %v3402_v63 = vpop.f32.mrf.mxu2 }
 0x3ce   :  { %4517 = vmatpush.msrb.mxu2 %v1585_v47  ;;  %4497 = vmatpush.msrb.mxu1 %v1584_v48  ;;  %v3422_v0 = vpop.f32.mrf.mxu3  ;;  %4934 = vst [vmem:[%s6499_s12 + $0x2c8] sm:$0xff] %v3402_v63  ;;  %v1430_v47 = vunpack.c.l.bf16 %v868_v39  ;;  %v788_v48 = vld [vmem:[#allocation19 + $0x4f0] sm:$0xff]  ;;  %v1109_v63 = vunpack.c.h.bf16 %v707_v55 }
 0x3cf   :  { %4537 = vmatpush.msrb.mxu3 %v1586_v50  ;;  %4557 = vmatpush.msra.mxu0 %v1587_v51  ;;  %4935 = vst [vmem:[%s6499_s12 + $0x2d0] sm:$0xff] %v3422_v0  ;;  %v1433_v50 = vunpack.c.h.bf16 %v869_v42  ;;  %v706_v51 = vld [vmem:[#allocation19 + $0x260] sm:$0xff]  ;;  %v1271_v58 = vunpack.c.h.bf16 %v788_v48  ;;  %v951_v0 = vld [vmem:[#allocation19 + $0xa08] sm:$0xff]  ;;  %v1115_v42 = vunpack.c.h.bf16 %v710_v37 }
 0x3d0   :  { %4518 = vmatpush.msrb.mxu2 %v1423_v53  ;;  %4498 = vmatpush.msrb.mxu1 %v1422_v54  ;;  %v1269_v53 = vunpack.c.h.bf16 %v787_v45  ;;  %v1268_v54 = vunpack.c.l.bf16 %v787_v45 }
 0x3d1   :  { %4538 = vmatpush.msrb.mxu3 %v1424_v56  ;;  %4558 = vmatpush.msra.mxu0 %v1425_v57  ;;  %v3462_v8 = vpop.f32.mrf.mxu1  ;;  %v1270_v57 = vunpack.c.l.bf16 %v788_v48 }
 0x3d2   :  { %4519 = vmatpush.msrb.mxu2 %v1261_v59  ;;  %4499 = vmatpush.msrb.mxu1 %v1260_v60  ;;  %4937 = vst [vmem:[%s6499_s12 + $0x2e0] sm:$0xff] %v3462_v8  ;;  %v3522_v10 = vpop.f32.mrf.mxu0  ;;  %v1107_v59 = vunpack.c.h.bf16 %v706_v51  ;;  %v1106_v60 = vunpack.c.l.bf16 %v706_v51 }
 0x3d3   :  { %4539 = vmatpush.msrb.mxu3 %v1262_v1  ;;  %4559 = vmatpush.msra.mxu0 %v1263_v2  ;;  %4940 = vst [vmem:[%s6499_s12 + $0x2f8] sm:$0xff] %v3522_v10  ;;  %v952_v2 = vld [vmem:[#allocation19 + $0xa10] sm:$0xff]  ;;  %v789_v10 = vld [vmem:[#allocation19 + $0x4f8] sm:$0xff] }
 0x3d4   :  { %4520 = vmatpush.msrb.mxu2 %v1099_v3  ;;  %4500 = vmatpush.msrb.mxu1 %v1098_v4  ;;  %v870_v4 = vld [vmem:[#allocation19 + $0x780] sm:$0xff]  ;;  %v1598_v8 = vunpack.c.l.bf16 %v952_v2  ;;  %v1599_v9 = vunpack.c.h.bf16 %v952_v2 }
 0x3d5   :  { %4540 = vmatpush.msrb.mxu3 %v1100_v5  ;;  %4560 = vmatpush.msra.mxu0 %v1101_v6  ;;  %v1597_v5 = vunpack.c.h.bf16 %v951_v0  ;;  %v1596_v6 = vunpack.c.l.bf16 %v951_v0  ;;  %v1435_v11 = vunpack.c.h.bf16 %v870_v4 }
 0x3d6   :  { %5175 = vmatmul.msk.f32.vlgmr.msrb.gmra.mxu1 %vm327_vm3, %v5675_v23  ;;  %5176 = vmatmul.msk.f32.vlgmr.msrb.gmra.mxu2 %vm327_vm3, %v5675_v23 }
 0x3d7   :  { %5177 = vmatmul.msk.f32.vlgmr.msrb.gmra.mxu3 %vm327_vm3, %v5675_v23  ;;  %5178 = vmatmul.msk.f32.vlgmr.msra.gmra.mxu0 %vm327_vm3, %v5675_v23  ;;  %v3482_v28 = vpop.f32.mrf.mxu2 }
 0x3d8   :  { %4597 = vmatpush.msra.mxu2 %v1589_v12  ;;  %4577 = vmatpush.msra.mxu1 %v1588_v13  ;;  %v3502_v29 = vpop.f32.mrf.mxu3  ;;  %4938 = vst [vmem:[%s6499_s12 + $0x2e8] sm:$0xff] %v3482_v28  ;;  %v1434_v12 = vunpack.c.l.bf16 %v870_v4  ;;  %v790_v13 = vld [vmem:[#allocation19 + $0x500] sm:$0xff]  ;;  %v1113_v28 = vunpack.c.h.bf16 %v709_v20 }
 0x3d9   :  { %4617 = vmatpush.msra.mxu3 %v1590_v15  ;;  %4637 = vmatpush.msrb.mxu0 %v1591_v16  ;;  %4939 = vst [vmem:[%s6499_s12 + $0x2f0] sm:$0xff] %v3502_v29  ;;  %v1437_v15 = vunpack.c.h.bf16 %v871_v7  ;;  %v708_v16 = vld [vmem:[#allocation19 + $0x270] sm:$0xff]  ;;  %v1275_v24 = vunpack.c.h.bf16 %v790_v13  ;;  %v953_v29 = vld [vmem:[#allocation19 + $0xa18] sm:$0xff] }
 0x3da   :  { %4598 = vmatpush.msra.mxu2 %v1427_v18  ;;  %4578 = vmatpush.msra.mxu1 %v1426_v19  ;;  %v1273_v18 = vunpack.c.h.bf16 %v789_v10  ;;  %v1272_v19 = vunpack.c.l.bf16 %v789_v10 }
 0x3db   :  { %4618 = vmatpush.msra.mxu3 %v1428_v21  ;;  %4638 = vmatpush.msrb.mxu0 %v1429_v22  ;;  %v3542_v36 = vpop.f32.mrf.mxu1  ;;  %v1274_v22 = vunpack.c.l.bf16 %v790_v13 }
 0x3dc   :  { %4599 = vmatpush.msra.mxu2 %v1265_v25  ;;  %4579 = vmatpush.msra.mxu1 %v1264_v26  ;;  %4941 = vst [vmem:[%s6499_s12 + $0x300] sm:$0xff] %v3542_v36  ;;  %v3602_v38 = vpop.f32.mrf.mxu0  ;;  %v1111_v25 = vunpack.c.h.bf16 %v708_v16  ;;  %v1110_v26 = vunpack.c.l.bf16 %v708_v16 }
 0x3dd   :  { %4619 = vmatpush.msra.mxu3 %v1266_v30  ;;  %4639 = vmatpush.msrb.mxu0 %v1267_v31  ;;  %4944 = vst [vmem:[%s6499_s12 + $0x318] sm:$0xff] %v3602_v38 }
 0x3de   :  { %4600 = vmatpush.msra.mxu2 %v1103_v32  ;;  %4580 = vmatpush.msra.mxu1 %v1102_v61  ;;  %v872_v32 = vld [vmem:[#allocation19 + $0x790] sm:$0xff]  ;;  %v1601_v61 = vunpack.c.h.bf16 %v953_v29 }
 0x3df   :  { %4620 = vmatpush.msra.mxu3 %v1104_v33  ;;  %4640 = vmatpush.msrb.mxu0 %v1105_v34  ;;  %v1600_v33 = vunpack.c.l.bf16 %v953_v29  ;;  %v791_v34 = vld [vmem:[#allocation19 + $0x508] sm:$0xff]  ;;  %v1439_v35 = vunpack.c.h.bf16 %v872_v32  ;;  %v1438_v36 = vunpack.c.l.bf16 %v872_v32 }
 0x3e0   :  { %5179 = vmatmul.msk.f32.vlgmr.msra.gmra.mxu1 %vm327_vm3, %v5675_v23  ;;  %5180 = vmatmul.msk.f32.vlgmr.msra.gmra.mxu2 %vm327_vm3, %v5675_v23  ;;  %v1277_v39 = vunpack.c.h.bf16 %v791_v34 }
 0x3e1   :  { %5181 = vmatmul.msk.f32.vlgmr.msra.gmra.mxu3 %vm327_vm3, %v5675_v23  ;;  %5182 = vmatmul.msk.f32.vlgmr.msrb.gmra.mxu0 %vm327_vm3, %v5675_v23  ;;  %v3562_v52 = vpop.f32.mrf.mxu2 }
 0x3e2   :  { %4677 = vmatpush.msrb.mxu2 %v1593_v40  ;;  %4657 = vmatpush.msrb.mxu1 %v1592_v41  ;;  %4942 = vst [vmem:[%s6499_s12 + $0x308] sm:$0xff] %v3562_v52  ;;  %v3582_v56 = vpop.f32.mrf.mxu3  ;;  %v1276_v40 = vunpack.c.l.bf16 %v791_v34 }
 0x3e3   :  { %4697 = vmatpush.msrb.mxu3 %v1594_v43  ;;  %4717 = vmatpush.msra.mxu0 %v1595_v44  ;;  %4943 = vst [vmem:[%s6499_s12 + $0x310] sm:$0xff] %v3582_v56  ;;  %v1114_v43 = vunpack.c.l.bf16 %v710_v37 }
 0x3e4   :  { %4678 = vmatpush.msrb.mxu2 %v1431_v46  ;;  %4658 = vmatpush.msrb.mxu1 %v1430_v47 }
 0x3e5   :  { %4698 = vmatpush.msrb.mxu3 %v1432_v49  ;;  %4718 = vmatpush.msra.mxu0 %v1433_v50  ;;  %v3622_v1 = vpop.f32.mrf.mxu1 }
 0x3e6   :  { %4679 = vmatpush.msrb.mxu2 %v1269_v53  ;;  %4659 = vmatpush.msrb.mxu1 %v1268_v54  ;;  %4945 = vst [vmem:[%s6499_s12 + $0x320] sm:$0xff] %v3622_v1  ;;  %v3682_v3 = vpop.f32.mrf.mxu0 }
 0x3e7   :  { %4699 = vmatpush.msrb.mxu3 %v1270_v57  ;;  %4719 = vmatpush.msra.mxu0 %v1271_v58  ;;  %4948 = vst [vmem:[%s6499_s12 + $0x338] sm:$0xff] %v3682_v3 }
 0x3e8   :  { %4680 = vmatpush.msrb.mxu2 %v1107_v59  ;;  %4660 = vmatpush.msrb.mxu1 %v1106_v60 }
 0x3e9   :  { %4700 = vmatpush.msrb.mxu3 %v1108_v62  ;;  %4720 = vmatpush.msra.mxu0 %v1109_v63 }
 0x3ea   :  { %5183 = vmatmul.msk.f32.vlgmr.msrb.gmra.mxu1 %vm327_vm3, %v5675_v23  ;;  %5184 = vmatmul.msk.f32.vlgmr.msrb.gmra.mxu2 %vm327_vm3, %v5675_v23 }
 0x3eb   :  { %5185 = vmatmul.msk.f32.vlgmr.msrb.gmra.mxu3 %vm327_vm3, %v5675_v23  ;;  %5186 = vmatmul.msk.f32.vlgmr.msra.gmra.mxu0 %vm327_vm3, %v5675_v23  ;;  %v3642_v17 = vpop.f32.mrf.mxu2 }
 0x3ec   :  { %4757 = vmatpush.msra.mxu2 %v1597_v5  ;;  %4737 = vmatpush.msra.mxu1 %v1596_v6  ;;  %4946 = vst [vmem:[%s6499_s12 + $0x328] sm:$0xff] %v3642_v17  ;;  %v3662_v21 = vpop.f32.mrf.mxu3 }
 0x3ed   :  { %4777 = vmatpush.msra.mxu3 %v1598_v8  ;;  %4797 = vmatpush.msrb.mxu0 %v1599_v9  ;;  %4947 = vst [vmem:[%s6499_s12 + $0x330] sm:$0xff] %v3662_v21 }
 0x3ee   :  { %4758 = vmatpush.msra.mxu2 %v1435_v11  ;;  %4738 = vmatpush.msra.mxu1 %v1434_v12 }
 0x3ef   :  { %4778 = vmatpush.msra.mxu3 %v1436_v14  ;;  %4798 = vmatpush.msrb.mxu0 %v1437_v15  ;;  %v3702_v30 = vpop.f32.mrf.mxu1 }
 0x3f0   :  { %4759 = vmatpush.msra.mxu2 %v1273_v18  ;;  %4739 = vmatpush.msra.mxu1 %v1272_v19  ;;  %4949 = vst [vmem:[%s6499_s12 + $0x340] sm:$0xff] %v3702_v30  ;;  %v3762_v31 = vpop.f32.mrf.mxu0 }
 0x3f1   :  { %4779 = vmatpush.msra.mxu3 %v1274_v22  ;;  %4799 = vmatpush.msrb.mxu0 %v1275_v24  ;;  %4952 = vst [vmem:[%s6499_s12 + $0x358] sm:$0xff] %v3762_v31 }
 0x3f2   :  { %4760 = vmatpush.msra.mxu2 %v1111_v25  ;;  %4740 = vmatpush.msra.mxu1 %v1110_v26 }
 0x3f3   :  { %4780 = vmatpush.msra.mxu3 %v1112_v27  ;;  %4800 = vmatpush.msrb.mxu0 %v1113_v28 }
 0x3f4   :  { %5187 = vmatmul.msk.f32.vlgmr.msra.gmra.mxu1 %vm327_vm3, %v5675_v23  ;;  %5188 = vmatmul.msk.f32.vlgmr.msra.gmra.mxu2 %vm327_vm3, %v5675_v23 }
 0x3f5   :  { %5189 = vmatmul.msk.f32.vlgmr.msra.gmra.mxu3 %vm327_vm3, %v5675_v23  ;;  %5190 = vmatmul.msk.f32.vlgmr.msrb.gmra.mxu0 %vm327_vm3, %v5675_v23  ;;  %v3722_v38 = vpop.f32.mrf.mxu2 }
 0x3f6   :  { %4837 = vmatpush.msrb.mxu2 %v1601_v61  ;;  %4817 = vmatpush.msrb.mxu1 %v1600_v33  ;;  %4950 = vst [vmem:[%s6499_s12 + $0x348] sm:$0xff] %v3722_v38  ;;  %v3742_v41 = vpop.f32.mrf.mxu3 }
 0x3f7   :  { %4951 = vst [vmem:[%s6499_s12 + $0x350] sm:$0xff] %v3742_v41 }
 0x3f8   :  { %4838 = vmatpush.msrb.mxu2 %v1439_v35  ;;  %4818 = vmatpush.msrb.mxu1 %v1438_v36 }
 0x3f9   :  { %v3782_v44 = vpop.f32.mrf.mxu1 }
 0x3fa   :  { %4839 = vmatpush.msrb.mxu2 %v1277_v39  ;;  %4819 = vmatpush.msrb.mxu1 %v1276_v40  ;;  %4953 = vst [vmem:[%s6499_s12 + $0x360] sm:$0xff] %v3782_v44  ;;  %v3842_v45 = vpop.f32.mrf.mxu0 }
 0x3fb   :  { %4956 = vst [vmem:[%s6499_s12 + $0x378] sm:$0xff] %v3842_v45 }
 0x3fc   :  { %4840 = vmatpush.msrb.mxu2 %v1115_v42  ;;  %4820 = vmatpush.msrb.mxu1 %v1114_v43 }
 0x3fd   :  { %5191 = vmatmul.msk.f32.vlgmr.msrb.gmra.mxu1 %vm327_vm3, %v5675_v23  ;;  %5192 = vmatmul.msk.f32.vlgmr.msrb.gmra.mxu2 %vm327_vm3, %v5675_v23 }
 0x3ff   :  { %v3802_v46 = vpop.f32.mrf.mxu2 }
 0x400   :  { %4954 = vst [vmem:[%s6499_s12 + $0x368] sm:$0xff] %v3802_v46  ;;  %v3822_v47 = vpop.f32.mrf.mxu3 }
 0x401   :  { %4955 = vst [vmem:[%s6499_s12 + $0x370] sm:$0xff] %v3822_v47 }
 0x403   :  { %v3862_v48 = vpop.f32.mrf.mxu1 }
 0x404   :  { %4957 = vst [vmem:[%s6499_s12 + $0x380] sm:$0xff] %v3862_v48  ;;  %v3922_v49 = vpop.f32.mrf.mxu0 }
 0x405   :  { %4960 = vst [vmem:[%s6499_s12 + $0x398] sm:$0xff] %v3922_v49 }
 0x409   :  { %v3882_v23 = vpop.f32.mrf.mxu2 }
 0x40a   :  { %4958 = vst [vmem:[%s6499_s12 + $0x388] sm:$0xff] %v3882_v23  ;;  %v3902_v50 = vpop.f32.mrf.mxu3 }
 0x40b   :  { %4959 = vst [vmem:[%s6499_s12 + $0x390] sm:$0xff] %v3902_v50 }
 0x40d   :  { %v3942_v51 = vpop.f32.mrf.mxu1 }
 0x40e   :  { %4961 = vst [vmem:[%s6499_s12 + $0x3a0] sm:$0xff] %v3942_v51  ;;  %v4002_v52 = vpop.f32.mrf.mxu0 }
 0x40f   :  { %4964 = vst [vmem:[%s6499_s12 + $0x3b8] sm:$0xff] %v4002_v52 }
 0x413   :  { %v3962_v53 = vpop.f32.mrf.mxu2 }
 0x414   :  { %4962 = vst [vmem:[%s6499_s12 + $0x3a8] sm:$0xff] %v3962_v53  ;;  %v3982_v54 = vpop.f32.mrf.mxu3 }
 0x415   :  { %4963 = vst [vmem:[%s6499_s12 + $0x3b0] sm:$0xff] %v3982_v54 }
 0x417   :  { %v4022_v55 = vpop.f32.mrf.mxu1 }
 0x418   :  { %4965 = vst [vmem:[%s6499_s12 + $0x3c0] sm:$0xff] %v4022_v55  ;;  %v4082_v56 = vpop.f32.mrf.mxu0 }
 0x419   :  { %4968 = vst [vmem:[%s6499_s12 + $0x3d8] sm:$0xff] %v4082_v56 }
 0x41d   :  { %v4042_v57 = vpop.f32.mrf.mxu2 }
 0x41e   :  { %4966 = vst [vmem:[%s6499_s12 + $0x3c8] sm:$0xff] %v4042_v57  ;;  %v4062_v58 = vpop.f32.mrf.mxu3 }
 0x41f   :  { %4967 = vst [vmem:[%s6499_s12 + $0x3d0] sm:$0xff] %v4062_v58 }
 0x421   :  { %v4102_v59 = vpop.f32.mrf.mxu1 }
 0x422   :  { %4969 = vst [vmem:[%s6499_s12 + $0x3e0] sm:$0xff] %v4102_v59  ;;  %v4162_v60 = vpop.f32.mrf.mxu0 }
 0x423   :  { %4972 = vst [vmem:[%s6499_s12 + $0x3f8] sm:$0xff] %v4162_v60 }
 0x427   :  { %v4122_v62 = vpop.f32.mrf.mxu2 }
 0x428   :  { %4970 = vst [vmem:[%s6499_s12 + $0x3e8] sm:$0xff] %v4122_v62  ;;  %v4142_v63 = vpop.f32.mrf.mxu3 }
 0x429   :  { %4971 = vst [vmem:[%s6499_s12 + $0x3f0] sm:$0xff] %v4142_v63 }
 0x42b   :  { %v4182_v0 = vpop.f32.mrf.mxu1 }
 0x42c   :  { %4973 = vst [vmem:[%s6499_s12 + $0x400] sm:$0xff] %v4182_v0  ;;  %v4242_v1 = vpop.f32.mrf.mxu0 }
 0x42d   :  { %4976 = vst [vmem:[%s6499_s12 + $0x418] sm:$0xff] %v4242_v1 }
 0x431   :  { %v4202_v2 = vpop.f32.mrf.mxu2 }
 0x432   :  { %4974 = vst [vmem:[%s6499_s12 + $0x408] sm:$0xff] %v4202_v2  ;;  %v4222_v3 = vpop.f32.mrf.mxu3 }
 0x433   :  { %4975 = vst [vmem:[%s6499_s12 + $0x410] sm:$0xff] %v4222_v3 }
 0x435   :  { %v4262_v4 = vpop.f32.mrf.mxu1 }
 0x436   :  { %4977 = vst [vmem:[%s6499_s12 + $0x420] sm:$0xff] %v4262_v4  ;;  %v4322_v5 = vpop.f32.mrf.mxu0 }
 0x437   :  { %4980 = vst [vmem:[%s6499_s12 + $0x438] sm:$0xff] %v4322_v5 }
 0x43b   :  { %v4282_v6 = vpop.f32.mrf.mxu2 }
 0x43c   :  { %4978 = vst [vmem:[%s6499_s12 + $0x428] sm:$0xff] %v4282_v6  ;;  %v4302_v7 = vpop.f32.mrf.mxu3 }
 0x43d   :  { %4979 = vst [vmem:[%s6499_s12 + $0x430] sm:$0xff] %v4302_v7 }
 0x43f   :  { %v4342_v8 = vpop.f32.mrf.mxu1 }
 0x440   :  { %4981 = vst [vmem:[%s6499_s12 + $0x440] sm:$0xff] %v4342_v8  ;;  %v4402_v9 = vpop.f32.mrf.mxu0 }
 0x441   :  { %4984 = vst [vmem:[%s6499_s12 + $0x458] sm:$0xff] %v4402_v9 }
 0x445   :  { %v4362_v10 = vpop.f32.mrf.mxu2 }
 0x446   :  { %4982 = vst [vmem:[%s6499_s12 + $0x448] sm:$0xff] %v4362_v10  ;;  %v4382_v11 = vpop.f32.mrf.mxu3 }
 0x447   :  { %4983 = vst [vmem:[%s6499_s12 + $0x450] sm:$0xff] %v4382_v11 }
 0x449   :  { %v4422_v12 = vpop.f32.mrf.mxu1 }
 0x44a   :  { %4985 = vst [vmem:[%s6499_s12 + $0x460] sm:$0xff] %v4422_v12  ;;  %v4482_v13 = vpop.f32.mrf.mxu0 }
 0x44b   :  { %4988 = vst [vmem:[%s6499_s12 + $0x478] sm:$0xff] %v4482_v13 }
 0x44f   :  { %v4442_v14 = vpop.f32.mrf.mxu2 }
 0x450   :  { %4986 = vst [vmem:[%s6499_s12 + $0x468] sm:$0xff] %v4442_v14  ;;  %v4462_v15 = vpop.f32.mrf.mxu3 }
 0x451   :  { %4987 = vst [vmem:[%s6499_s12 + $0x470] sm:$0xff] %v4462_v15 }
 0x453   :  { %v4502_v16 = vpop.f32.mrf.mxu1 }
 0x454   :  { %4989 = vst [vmem:[%s6499_s12 + $0x480] sm:$0xff] %v4502_v16  ;;  %v4562_v17 = vpop.f32.mrf.mxu0 }
 0x455   :  { %4992 = vst [vmem:[%s6499_s12 + $0x498] sm:$0xff] %v4562_v17 }
 0x459   :  { %v4522_v18 = vpop.f32.mrf.mxu2 }
 0x45a   :  { %4990 = vst [vmem:[%s6499_s12 + $0x488] sm:$0xff] %v4522_v18  ;;  %v4542_v19 = vpop.f32.mrf.mxu3 }
 0x45b   :  { %4991 = vst [vmem:[%s6499_s12 + $0x490] sm:$0xff] %v4542_v19 }
 0x45d   :  { %v4582_v20 = vpop.f32.mrf.mxu1 }
 0x45e   :  { %4993 = vst [vmem:[%s6499_s12 + $0x4a0] sm:$0xff] %v4582_v20  ;;  %v4642_v21 = vpop.f32.mrf.mxu0 }
 0x45f   :  { %4996 = vst [vmem:[%s6499_s12 + $0x4b8] sm:$0xff] %v4642_v21 }
 0x463   :  { %v4602_v22 = vpop.f32.mrf.mxu2 }
 0x464   :  { %4994 = vst [vmem:[%s6499_s12 + $0x4a8] sm:$0xff] %v4602_v22  ;;  %v4622_v24 = vpop.f32.mrf.mxu3 }
 0x465   :  { %4995 = vst [vmem:[%s6499_s12 + $0x4b0] sm:$0xff] %v4622_v24 }
 0x467   :  { %v4662_v25 = vpop.f32.mrf.mxu1 }
 0x468   :  { %4997 = vst [vmem:[%s6499_s12 + $0x4c0] sm:$0xff] %v4662_v25  ;;  %v4722_v26 = vpop.f32.mrf.mxu0 }
 0x469   :  { %5000 = vst [vmem:[%s6499_s12 + $0x4d8] sm:$0xff] %v4722_v26 }
 0x46d   :  { %v4682_v27 = vpop.f32.mrf.mxu2 }
 0x46e   :  { %4998 = vst [vmem:[%s6499_s12 + $0x4c8] sm:$0xff] %v4682_v27  ;;  %v4702_v28 = vpop.f32.mrf.mxu3 }
 0x46f   :  { %4999 = vst [vmem:[%s6499_s12 + $0x4d0] sm:$0xff] %v4702_v28 }
 0x471   :  { %v4742_v29 = vpop.f32.mrf.mxu1 }
 0x472   :  { %5001 = vst [vmem:[%s6499_s12 + $0x4e0] sm:$0xff] %v4742_v29  ;;  %v4802_v30 = vpop.f32.mrf.mxu0 }
 0x473   :  { %5004 = vst [vmem:[%s6499_s12 + $0x4f8] sm:$0xff] %v4802_v30 }
 0x477   :  { %v4762_v31 = vpop.f32.mrf.mxu2 }
 0x478   :  { %5002 = vst [vmem:[%s6499_s12 + $0x4e8] sm:$0xff] %v4762_v31  ;;  %v4782_v32 = vpop.f32.mrf.mxu3 }
 0x479   :  { %5003 = vst [vmem:[%s6499_s12 + $0x4f0] sm:$0xff] %v4782_v32 }
 0x47a   :  { %v4822_v61 = vpop.f32.mrf.mxu1 }
 0x47b   :  { %5005 = vst [vmem:[%s6499_s12 + $0x500] sm:$0xff] %v4822_v61 }
 0x480   :  { %v4842_v33 = vpop.f32.mrf.mxu2 }
 0x481   :  { %5006 = vst [vmem:[%s6499_s12 + $0x508] sm:$0xff] %v4842_v33 }
 0x482   :  { %5011 = vsyncpa [#allocation3], 1 }
 0x483   :  { %5012 = vsyncpa [#allocation5], 1 }
 0x484   :  { %5013 = vsyncpa [#allocation8], 1 }
 0x485   :  { %5014 = vsyncpa [#allocation11], 1 }
 0x486   :  { %5015 = vsyncpa [#allocation14], 1 }
 0x487   :  { %5016 = vsyncpa [#allocation17], 1 }
 0x488   :  { %5017 = vsyncpa [#allocation20], 1 }

</bundles_post_ra>
